<compile_context>
chip_gen: v7x
topology: tpu7x:2x2x1
jax: 0.10.0
libtpu: 0.0.40
codegen_flags: <defaults>
</compile_context>

<pallas_src>
import functools

import jax
import jax.numpy as jnp
from jax import lax
from jax.experimental import pallas as pl
from jax.experimental.pallas import tpu as pltpu

_VMEM_LIMIT = 48 * 1024 * 1024     # explicit scoped-VMEM limit (fits v7x 64MiB)
_COMPUTE_T = jnp.bfloat16          # MXU operand dtype
_ACC_T = jnp.float32               # accumulator / bias / mask dtype


def _cparams(sem):
    return pltpu.CompilerParams(dimension_semantics=sem,
                                vmem_limit_bytes=_VMEM_LIMIT)


def _divisors(n):
    return [d for d in range(1, n + 1) if n % d == 0]


def _pick_rows_conv(H, W, max_elems):
    """Rows per tile for the 3x3 conv (needs (TH*W)%8==0 and W%8==0 to tile)."""
    if H * W <= max_elems or W % 8 != 0:
        return H
    valid = [d for d in _divisors(H) if d == H or (d * W) % 8 == 0]
    fitting = [d for d in valid if d * W <= max_elems]
    return max(fitting) if fitting else min(valid)


def _pick_rows_add(H, W, max_elems):
    """Rows per tile for the fused upsample+lateral (fine and coarse tiles
    must both satisfy the (8,128) divisibility rule unless full)."""
    if H * W <= max_elems:
        return H
    valid = []
    for d in _divisors(H):
        if d == H:
            valid.append(d)
            continue
        if d % 2 or (d * W) % 8 or ((d // 2) * (W // 2)) % 8:
            continue
        valid.append(d)
    fitting = [d for d in valid if d * W <= max_elems]
    return max(fitting) if fitting else min(valid)


# ----------------------------------------------------------------------------
# 3x3 conv, stride 1, padding 1 (NHWC), optional ReLU on the input
# (used to fuse p7 = conv3x3(relu(p6))).  Row-tiled with 1-row halos.
# ----------------------------------------------------------------------------
def _conv3x3_s1(x_nhwc, w_hwio, b, *, relu_in=False, tile_elems=4096):
    N, H, W, Cin = x_nhwc.shape
    Cout = w_hwio.shape[-1]
    HW = H * W

    TH = _pick_rows_conv(H, W, tile_elems)      # rows per grid step
    n_t = H // TH
    tiled = n_t > 1
    L = TH * W                                  # flattened elements per tile
    halo = W + 1                                # flattened-row halo each side
    Lp = L + 2 * halo

    x2 = x_nhwc.reshape(N, HW, Cin)             # free row-major flatten
    w9 = w_hwio.reshape(9, Cin, Cout).astype(_COMPUTE_T)   # flat tap index
    b2 = b.reshape(1, Cout).astype(_ACC_T)

    def kernel(*refs):
        if tiled:
            x_ref, xt_ref, xb_ref, w_ref, b_ref, o_ref, xp_ref = refs
        else:
            x_ref, w_ref, b_ref, o_ref, xp_ref = refs

        x = x_ref[...].astype(_ACC_T)
        if relu_in:
            x = jnp.maximum(x, 0.0)

        # Padded, flattened tile lives in a f32 VMEM scratch (f32 so the
        # odd-offset tap slices below stay un-packed); operands are cast to
        # bf16 right before each MXU dot.
        xp_ref[0:halo, :] = jnp.zeros((halo, Cin), _ACC_T)
        xp_ref[halo + L:, :] = jnp.zeros((halo, Cin), _ACC_T)
        xp_ref[halo:halo + L, :] = x

        if tiled:
            i = pl.program_id(1)
            top = xt_ref[...].astype(_ACC_T)      # row i*TH - 1 (clamped)
            bot = xb_ref[...].astype(_ACC_T)      # row (i+1)*TH (clamped)
            if relu_in:
                top = jnp.maximum(top, 0.0)
                bot = jnp.maximum(bot, 0.0)
            top = top * (i > 0).astype(_ACC_T)               # zero at image top
            bot = bot * (i < n_t - 1).astype(_ACC_T)         # zero at image bottom
            xp_ref[1:1 + W, :] = top
            xp_ref[halo + L:halo + L + W, :] = bot

        bias = b_ref[...]                         # (1, Cout) f32

        # Taps grouped by kw -> three f32 accumulators; edge masking is applied
        # once, post-dot, on the (L, Cout) results.
        accs = []
        for kw in range(3):
            acc = jnp.zeros((L, Cout), _ACC_T)
            for kh in range(3):
                s = kh * W + kw                               # static offset
                patch = xp_ref[s:s + L, :].astype(_COMPUTE_T)
                acc = acc + jnp.dot(patch, w_ref[kh * 3 + kw],
                                    preferred_element_type=_ACC_T)
            accs.append(acc)

        col = lax.broadcasted_iota(jnp.int32, (L, 1), 0) % W
        y = accs[1] + bias
        y = y + jnp.where(col > 0, accs[0], 0.0)       # left taps valid?
        y = y + jnp.where(col < W - 1, accs[2], 0.0)   # right taps valid?
        o_ref[...] = y.astype(o_ref.dtype)             # single lane-dense store

    in_specs = [pl.BlockSpec((None, L, Cin), lambda n, i: (n, i, 0))]
    operands = [x2]
    if tiled:
        # 1-row halo blocks of the same (flattened) input; block size W along
        # the HW axis so the block index equals the row index.
        in_specs.append(pl.BlockSpec(
            (None, W, Cin), lambda n, i: (n, jnp.maximum(i * TH - 1, 0), 0)))
        in_specs.append(pl.BlockSpec(
            (None, W, Cin), lambda n, i: (n, jnp.minimum((i + 1) * TH, H - 1), 0)))
        operands += [x2, x2]
    in_specs.append(pl.BlockSpec((9, Cin, Cout), lambda n, i: (0, 0, 0)))
    in_specs.append(pl.BlockSpec((1, Cout), lambda n, i: (0, 0)))
    operands += [w9, b2]

    out = pl.pallas_call(
        kernel,
        out_shape=jax.ShapeDtypeStruct((N, HW, Cout), x_nhwc.dtype),
        grid=(N, n_t),
        in_specs=in_specs,
        out_specs=pl.BlockSpec((None, L, Cout), lambda n, i: (n, i, 0)),
        scratch_shapes=[pltpu.VMEM((Lp, Cin), _ACC_T)],
        compiler_params=_cparams(("parallel", "parallel")),
    )(*operands)
    return out.reshape(N, H, W, Cout)


def conv3x3(x_nhwc, w_hwio, b, *, stride=1, relu_in=False, tile_elems=4096):
    y = _conv3x3_s1(x_nhwc, w_hwio, b, relu_in=relu_in, tile_elems=tile_elems)
    if stride == 2:
        # out_s2[i, j] == out_s1[2i, 2j] for 3x3 / pad 1; decimate in the
        # wrapper (only used on the two smallest pyramid levels).
        # TODO(synk): compute stride-2 directly (2*i input-row index_map) if
        # c5 becomes large.
        y = y[:, ::2, ::2, :]
    return y


# ----------------------------------------------------------------------------
# Plain 1x1 conv (c5 lateral): one (H*W, Cin) x (Cin, Cout) bf16 matmul / image.
# ----------------------------------------------------------------------------
def conv1x1(x_nhwc, w_io, b):
    N, H, W, Cin = x_nhwc.shape
    Cout = w_io.shape[-1]
    HW = H * W
    x2 = x_nhwc.reshape(N, HW, Cin)
    w_c = w_io.astype(_COMPUTE_T)
    b2 = b.reshape(1, Cout).astype(_ACC_T)

    def kernel(x_ref, w_ref, b_ref, o_ref):
        y = jnp.dot(x_ref[...].astype(_COMPUTE_T), w_ref[...],
                    preferred_element_type=_ACC_T) + b_ref[...]
        o_ref[...] = y.astype(o_ref.dtype)

    out = pl.pallas_call(
        kernel,
        out_shape=jax.ShapeDtypeStruct((N, HW, Cout), x_nhwc.dtype),
        grid=(N,),
        in_specs=[
            pl.BlockSpec((None, HW, Cin), lambda n: (n, 0, 0)),
            pl.BlockSpec((Cin, Cout), lambda n: (0, 0)),
            pl.BlockSpec((1, Cout), lambda n: (0, 0)),
        ],
        out_specs=pl.BlockSpec((None, HW, Cout), lambda n: (n, 0, 0)),
        compiler_params=_cparams(("parallel",)),
    )(x2, w_c, b2)
    return out.reshape(N, H, W, Cout)


# ----------------------------------------------------------------------------
# Fused: lateral 1x1 conv + 2x nearest-neighbour upsample of the coarse map
# + add, on multi-row tiles.  Each fine tile reads its coarse tile exactly
# once; the 2x2 replication (both H and W) is one bf16 0/1 matmul per tile.
# ----------------------------------------------------------------------------
def conv1x1_add_upsampled(x_nhwc, w_io, b, coarse_nhwc, *, tile_elems=4096):
    N, H, W, Cin = x_nhwc.shape
    Cout = w_io.shape[-1]
    Nc, Hc, Wc, Cc = coarse_nhwc.shape
    # nn.Upsample(scale_factor=2) requires an exact 2x relationship, as in the
    # PyTorch module.
    assert N == Nc and H == 2 * Hc and W == 2 * Wc and Cc == Cout

    TH = _pick_rows_add(H, W, tile_elems)
    n_t = H // TH
    THc = TH // 2
    L = TH * W
    Lc = THc * Wc

    x2 = x_nhwc.reshape(N, H * W, Cin)
    u2 = coarse_nhwc.reshape(N, Hc * Wc, Cout)
    w_c = w_io.astype(_COMPUTE_T)
    b2 = b.reshape(1, Cout).astype(_ACC_T)

    # R[p, q] = 1 iff coarse element q is the nearest-neighbour source of fine
    # element p (within one tile); covers both height and width replication.
    p = jnp.arange(L)
    src = (p // W // 2) * Wc + (p % W) // 2
    R = (src[:, None] == jnp.arange(Lc)[None, :]).astype(_COMPUTE_T)

    def kernel(x_ref, u_ref, w_ref, b_ref, r_ref, o_ref):
        y = jnp.dot(x_ref[...].astype(_COMPUTE_T), w_ref[...],
                    preferred_element_type=_ACC_T)
        y = y + b_ref[...]
        y = y + jnp.dot(r_ref[...], u_ref[...].astype(_COMPUTE_T),
                        preferred_element_type=_ACC_T)
        o_ref[...] = y.astype(o_ref.dtype)

    out = pl.pallas_call(
        kernel,
        out_shape=jax.ShapeDtypeStruct((N, H * W, Cout), x_nhwc.dtype),
        grid=(N, n_t),
        in_specs=[
            pl.BlockSpec((None, L, Cin), lambda n, i: (n, i, 0)),
            pl.BlockSpec((None, Lc, Cout), lambda n, i: (n, i, 0)),
            pl.BlockSpec((Cin, Cout), lambda n, i: (0, 0)),
            pl.BlockSpec((1, Cout), lambda n, i: (0, 0)),
            pl.BlockSpec((L, Lc), lambda n, i: (0, 0)),
        ],
        out_specs=pl.BlockSpec((None, L, Cout), lambda n, i: (n, i, 0)),
        compiler_params=_cparams(("parallel", "parallel")),
    )(x2, u2, w_c, b2, R)
    return out.reshape(N, H, W, Cout)


# ----------------------------------------------------------------------------
# FPN forward (matches the PyTorch module's forward semantics, NCHW in/out).
# ----------------------------------------------------------------------------
def fpn_forward(c3, c4, c5, P, *, tile_elems=4096):
    to_nhwc = lambda x: jnp.transpose(x, (0, 2, 3, 1))
    to_nchw = lambda x: jnp.transpose(x, (0, 3, 1, 2))
    c3n, c4n, c5n = to_nhwc(c3), to_nhwc(c4), to_nhwc(c5)

    p6 = conv3x3(c5n, P["p6_w"], P["p6_b"], stride=2, tile_elems=tile_elems)
    p7 = conv3x3(p6, P["p7_w"], P["p7_b"], stride=2, relu_in=True,
                 tile_elems=tile_elems)

    m5 = conv1x1(c5n, P["c5_w"], P["c5_b"])
    p5 = conv3x3(m5, P["p5_w"], P["p5_b"], tile_elems=tile_elems)

    m4 = conv1x1_add_upsampled(c4n, P["c4_w"], P["c4_b"], m5,
                               tile_elems=tile_elems)
    p4 = conv3x3(m4, P["p4_w"], P["p4_b"], tile_elems=tile_elems)

    m3 = conv1x1_add_upsampled(c3n, P["c3_w"], P["c3_b"], m4,
                               tile_elems=tile_elems)
    p3 = conv3x3(m3, P["p3_w"], P["p3_b"], tile_elems=tile_elems)

    return [to_nchw(p3), to_nchw(p4), to_nchw(p5), to_nchw(p6), to_nchw(p7)]


# ----------------------------------------------------------------------------
# Pure-JAX reference that mirrors the kernels' bf16-operand / f32-accumulate
# rounding points (lax.conv on bf16 operands, f32 accumulation).
# ----------------------------------------------------------------------------
def _up2(x):
    return jnp.repeat(jnp.repeat(x, 2, axis=1), 2, axis=2)


def ref_forward_nhwc(c3n, c4n, c5n, P):
    bf = lambda t: t.astype(jnp.bfloat16)

    def conv(x, w_hwio, b, stride, pad):
        y = lax.conv_general_dilated(
            bf(x), bf(w_hwio), (stride, stride), [(pad, pad), (pad, pad)],
            dimension_numbers=("NHWC", "HWIO", "NHWC"),
            preferred_element_type=jnp.float32)
        return y + b

    as4 = lambda w: w.reshape(1, 1, *w.shape)  # (Cin,Cout) -> HWIO
    p6 = conv(c5n, P["p6_w"], P["p6_b"], 2, 1)
    p7 = conv(jax.nn.relu(p6), P["p7_w"], P["p7_b"], 2, 1)
    m5 = conv(c5n, as4(P["c5_w"]), P["c5_b"], 1, 0)
    p5 = conv(m5, P["p5_w"], P["p5_b"], 1, 1)
    m4 = _up2(bf(m5).astype(jnp.float32)) + conv(c4n, as4(P["c4_w"]), P["c4_b"], 1, 0)
    p4 = conv(m4, P["p4_w"], P["p4_b"], 1, 1)
    m3 = _up2(bf(m4).astype(jnp.float32)) + conv(c3n, as4(P["c3_w"]), P["c3_b"], 1, 0)
    p3 = conv(m3, P["p3_w"], P["p3_b"], 1, 1)
    return [p3, p4, p5, p6, p7]


def init_params(key, channel_depth, fpn_channels):
    c3_d, c4_d, c5_d = channel_depth
    specs = {
        "p6": (3, c5_d, fpn_channels),
        "p7": (3, fpn_channels, fpn_channels),
        "c5": (1, c5_d, fpn_channels),
        "p5": (3, fpn_channels, fpn_channels),
        "c4": (1, c4_d, fpn_channels),
        "p4": (3, fpn_channels, fpn_channels),
        "c3": (1, c3_d, fpn_channels),
        "p3": (3, fpn_channels, fpn_channels),
    }
    P = {}
    keys = jax.random.split(key, 2 * len(specs))
    for i, (name, (k, cin, cout)) in enumerate(specs.items()):
        kw, kb = keys[2 * i], keys[2 * i + 1]
        if k == 3:
            w = jax.random.normal(kw, (3, 3, cin, cout), jnp.float32) * 0.1
        else:
            w = jax.random.normal(kw, (cin, cout), jnp.float32) * 0.1
        P[name + "_w"] = w
        P[name + "_b"] = jax.random.normal(kb, (cout,), jnp.float32) * 0.1
    return P


if __name__ == "__main__":
    key = jax.random.PRNGKey(0)
    k_p, k3, k4, k5 = jax.random.split(key, 4)

    channel_depth = (4, 8, 16)     # (c3_d, c4_d, c5_d)
    fpn_channels = 32
    N = 2

    # NCHW inputs, consecutive pyramid levels.
    c3 = jax.random.normal(k3, (N, channel_depth[0], 16, 16), jnp.float32)
    c4 = jax.random.normal(k4, (N, channel_depth[1], 8, 8), jnp.float32)
    c5 = jax.random.normal(k5, (N, channel_depth[2], 4, 4), jnp.float32)

    params = init_params(k_p, channel_depth, fpn_channels)

    # Small tile_elems so the 16x16 level exercises the row-tiled (halo) path.
    fwd = jax.jit(functools.partial(fpn_forward, tile_elems=128))
    outs = jax.block_until_ready(fwd(c3, c4, c5, params))

    # Verify against the pure-JAX reference.
    to_nhwc = lambda x: jnp.transpose(x, (0, 2, 3, 1))
    refs = ref_forward_nhwc(to_nhwc(c3), to_nhwc(c4), to_nhwc(c5), params)
    refs = [jnp.transpose(r, (0, 3, 1, 2)) for r in refs]
    for got, want in zip(outs, refs):
        assert got.shape == want.shape, (got.shape, want.shape)
        err = float(jnp.max(jnp.abs(got - want)))
        assert jnp.allclose(got, want, rtol=3e-3, atol=3e-3), err

    print("KERNEL_OK")
</pallas_src>

<mosaic_0001>
module attributes {stable_mosaic.version = 11 : i64} {
  func.func @kernel(%arg0: i32, %arg1: memref<1x16x16xf32, #tpu.memory_space<vmem>>, %arg2: memref<16x32xbf16, #tpu.memory_space<vmem>>, %arg3: memref<1x32xf32, #tpu.memory_space<vmem>>, %arg4: memref<1x16x32xf32, #tpu.memory_space<vmem>>) attributes {dimension_semantics = [#tpu.dimension_semantics<parallel>], iteration_bounds = array<i64: 2>, scalar_prefetch = 0 : i64, scratch_operands = 0 : i64, tpu.core_type = #tpu.core_type<tc>, window_params = [{transform_indices = @transform_0, window_bounds = array<i64: 1, 16, 16>}, {pipeline_mode = #tpu.pipeline_mode<synchronous>, transform_indices = @transform_1, window_bounds = array<i64: 16, 32>}, {pipeline_mode = #tpu.pipeline_mode<synchronous>, transform_indices = @transform_2, window_bounds = array<i64: 1, 32>}, {transform_indices = @transform_3, window_bounds = array<i64: 1, 16, 32>}]} {
    %c0 = arith.constant 0 : index
    %c0_0 = arith.constant 0 : index
    %c0_1 = arith.constant 0 : index
    %0 = vector.load %arg1[%c0, %c0_0, %c0_1] : memref<1x16x16xf32, #tpu.memory_space<vmem>>, vector<1x16x16xf32>
    %1 = vector.shape_cast %0 : vector<1x16x16xf32> to vector<16x16xf32>
    %2 = arith.truncf %1 : vector<16x16xf32> to vector<16x16xbf16>
    %c0_2 = arith.constant 0 : index
    %c0_3 = arith.constant 0 : index
    %3 = vector.load %arg2[%c0_2, %c0_3] : memref<16x32xbf16, #tpu.memory_space<vmem>>, vector<16x32xbf16>
    %cst = arith.constant dense<0.000000e+00> : vector<16x32xf32>
    %4 = tpu.matmul %2, %3, %cst {dimension_numbers = #tpu.dot_dimension_numbers<[1], [0], [0], [1], [0, 0, 1, 1], [], []>} : vector<16x16xbf16>, vector<16x32xbf16>, vector<16x32xf32> -> vector<16x32xf32>
    %c0_4 = arith.constant 0 : index
    %c0_5 = arith.constant 0 : index
    %5 = vector.load %arg3[%c0_4, %c0_5] : memref<1x32xf32, #tpu.memory_space<vmem>>, vector<1x32xf32>
    %6 = vector.broadcast %5 : vector<1x32xf32> to vector<16x32xf32>
    %7 = arith.addf %4, %6 : vector<16x32xf32>
    %c0_6 = arith.constant 0 : index
    %c0_7 = arith.constant 0 : index
    %c0_8 = arith.constant 0 : index
    %8 = vector.load %arg4[%c0_6, %c0_7, %c0_8] : memref<1x16x32xf32, #tpu.memory_space<vmem>>, vector<1x16x32xf32>
    %9 = vector.shape_cast %8 : vector<1x16x32xf32> to vector<16x32xf32>
    %10 = vector.shape_cast %7 : vector<16x32xf32> to vector<1x16x32xf32>
    tpu.vector_store %arg4[%c0_6, %c0_7, %c0_8], %10 {strides = array<i32>} : memref<1x16x32xf32, #tpu.memory_space<vmem>>, vector<1x16x32xf32>,
    return
  }
  func.func @transform_0(%arg0: i32) -> (i32, i32, i32) {
    %c0_i32 = arith.constant 0 : i32
    %c0_i32_0 = arith.constant 0 : i32
    %c0_i32_1 = arith.constant 0 : i32
    return %arg0, %c0_i32, %c0_i32_0 : i32, i32, i32
  }
  func.func @transform_1(%arg0: i32) -> (i32, i32) {
    %c0_i32 = arith.constant 0 : i32
    %c0_i32_0 = arith.constant 0 : i32
    %c0_i32_1 = arith.constant 0 : i32
    return %c0_i32, %c0_i32_0 : i32, i32
  }
  func.func @transform_2(%arg0: i32) -> (i32, i32) {
    %c0_i32 = arith.constant 0 : i32
    %c0_i32_0 = arith.constant 0 : i32
    %c0_i32_1 = arith.constant 0 : i32
    return %c0_i32, %c0_i32_0 : i32, i32
  }
  func.func @transform_3(%arg0: i32) -> (i32, i32, i32) {
    %c0_i32 = arith.constant 0 : i32
    %c0_i32_0 = arith.constant 0 : i32
    %c0_i32_1 = arith.constant 0 : i32
    return %arg0, %c0_i32, %c0_i32_0 : i32, i32, i32
  }
}

module attributes {stable_mosaic.version = 11 : i64} {
  func.func @kernel(%arg0: i32, %arg1: i32, %arg2: memref<1x64x8xf32, #tpu.memory_space<vmem>>, %arg3: memref<1x16x32xf32, #tpu.memory_space<vmem>>, %arg4: memref<8x32xbf16, #tpu.memory_space<vmem>>, %arg5: memref<1x32xf32, #tpu.memory_space<vmem>>, %arg6: memref<64x16xbf16, #tpu.memory_space<vmem>>, %arg7: memref<1x64x32xf32, #tpu.memory_space<vmem>>) attributes {dimension_semantics = [#tpu.dimension_semantics<parallel>, #tpu.dimension_semantics<parallel>], iteration_bounds = array<i64: 2, 1>, scalar_prefetch = 0 : i64, scratch_operands = 0 : i64, tpu.core_type = #tpu.core_type<tc>, window_params = [{transform_indices = @transform_0, window_bounds = array<i64: 1, 64, 8>}, {transform_indices = @transform_1, window_bounds = array<i64: 1, 16, 32>}, {pipeline_mode = #tpu.pipeline_mode<synchronous>, transform_indices = @transform_2, window_bounds = array<i64: 8, 32>}, {pipeline_mode = #tpu.pipeline_mode<synchronous>, transform_indices = @transform_3, window_bounds = array<i64: 1, 32>}, {pipeline_mode = #tpu.pipeline_mode<synchronous>, transform_indices = @transform_4, window_bounds = array<i64: 64, 16>}, {transform_indices = @transform_5, window_bounds = array<i64: 1, 64, 32>}]} {
    %c0 = arith.constant 0 : index
    %c0_0 = arith.constant 0 : index
    %c0_1 = arith.constant 0 : index
    %0 = vector.load %arg2[%c0, %c0_0, %c0_1] : memref<1x64x8xf32, #tpu.memory_space<vmem>>, vector<1x64x8xf32>
    %1 = vector.shape_cast %0 : vector<1x64x8xf32> to vector<64x8xf32>
    %2 = arith.truncf %1 : vector<64x8xf32> to vector<64x8xbf16>
    %c0_2 = arith.constant 0 : index
    %c0_3 = arith.constant 0 : index
    %3 = vector.load %arg4[%c0_2, %c0_3] : memref<8x32xbf16, #tpu.memory_space<vmem>>, vector<8x32xbf16>
    %cst = arith.constant dense<0.000000e+00> : vector<64x32xf32>
    %4 = tpu.matmul %2, %3, %cst {dimension_numbers = #tpu.dot_dimension_numbers<[1], [0], [0], [1], [0, 0, 1, 1], [], []>} : vector<64x8xbf16>, vector<8x32xbf16>, vector<64x32xf32> -> vector<64x32xf32>
    %c0_4 = arith.constant 0 : index
    %c0_5 = arith.constant 0 : index
    %5 = vector.load %arg5[%c0_4, %c0_5] : memref<1x32xf32, #tpu.memory_space<vmem>>, vector<1x32xf32>
    %6 = vector.broadcast %5 : vector<1x32xf32> to vector<64x32xf32>
    %7 = arith.addf %4, %6 : vector<64x32xf32>
    %c0_6 = arith.constant 0 : index
    %c0_7 = arith.constant 0 : index
    %8 = vector.load %arg6[%c0_6, %c0_7] : memref<64x16xbf16, #tpu.memory_space<vmem>>, vector<64x16xbf16>
    %c0_8 = arith.constant 0 : index
    %c0_9 = arith.constant 0 : index
    %c0_10 = arith.constant 0 : index
    %9 = vector.load %arg3[%c0_8, %c0_9, %c0_10] : memref<1x16x32xf32, #tpu.memory_space<vmem>>, vector<1x16x32xf32>
    %10 = vector.shape_cast %9 : vector<1x16x32xf32> to vector<16x32xf32>
    %11 = arith.truncf %10 : vector<16x32xf32> to vector<16x32xbf16>
    %cst_11 = arith.constant dense<0.000000e+00> : vector<64x32xf32>
    %12 = tpu.matmul %8, %11, %cst_11 {dimension_numbers = #tpu.dot_dimension_numbers<[1], [0], [0], [1], [0, 0, 1, 1], [], []>} : vector<64x16xbf16>, vector<16x32xbf16>, vector<64x32xf32> -> vector<64x32xf32>
    %13 = arith.addf %7, %12 : vector<64x32xf32>
    %c0_12 = arith.constant 0 : index
    %c0_13 = arith.constant 0 : index
    %c0_14 = arith.constant 0 : index
    %14 = vector.load %arg7[%c0_12, %c0_13, %c0_14] : memref<1x64x32xf32, #tpu.memory_space<vmem>>, vector<1x64x32xf32>
    %15 = vector.shape_cast %14 : vector<1x64x32xf32> to vector<64x32xf32>
    %16 = vector.shape_cast %13 : vector<64x32xf32> to vector<1x64x32xf32>
    tpu.vector_store %arg7[%c0_12, %c0_13, %c0_14], %16 {strides = array<i32>} : memref<1x64x32xf32, #tpu.memory_space<vmem>>, vector<1x64x32xf32>,
    return
  }
  func.func @transform_0(%arg0: i32, %arg1: i32) -> (i32, i32, i32) {
    %c0_i32 = arith.constant 0 : i32
    %c0_i32_0 = arith.constant 0 : i32
    return %arg0, %arg1, %c0_i32 : i32, i32, i32
  }
  func.func @transform_1(%arg0: i32, %arg1: i32) -> (i32, i32, i32) {
    %c0_i32 = arith.constant 0 : i32
    %c0_i32_0 = arith.constant 0 : i32
    return %arg0, %arg1, %c0_i32 : i32, i32, i32
  }
  func.func @transform_2(%arg0: i32, %arg1: i32) -> (i32, i32) {
    %c0_i32 = arith.constant 0 : i32
    %c0_i32_0 = arith.constant 0 : i32
    %c0_i32_1 = arith.constant 0 : i32
    return %c0_i32, %c0_i32_0 : i32, i32
  }
  func.func @transform_3(%arg0: i32, %arg1: i32) -> (i32, i32) {
    %c0_i32 = arith.constant 0 : i32
    %c0_i32_0 = arith.constant 0 : i32
    %c0_i32_1 = arith.constant 0 : i32
    return %c0_i32, %c0_i32_0 : i32, i32
  }
  func.func @transform_4(%arg0: i32, %arg1: i32) -> (i32, i32) {
    %c0_i32 = arith.constant 0 : i32
    %c0_i32_0 = arith.constant 0 : i32
    %c0_i32_1 = arith.constant 0 : i32
    return %c0_i32, %c0_i32_0 : i32, i32
  }
  func.func @transform_5(%arg0: i32, %arg1: i32) -> (i32, i32, i32) {
    %c0_i32 = arith.constant 0 : i32
    %c0_i32_0 = arith.constant 0 : i32
    return %arg0, %arg1, %c0_i32 : i32, i32, i32
  }
}

module attributes {stable_mosaic.version = 11 : i64} {
  func.func @kernel(%arg0: i32, %arg1: i32, %arg2: memref<1x128x4xf32, #tpu.memory_space<vmem>>, %arg3: memref<1x32x32xf32, #tpu.memory_space<vmem>>, %arg4: memref<4x32xbf16, #tpu.memory_space<vmem>>, %arg5: memref<1x32xf32, #tpu.memory_space<vmem>>, %arg6: memref<128x32xbf16, #tpu.memory_space<vmem>>, %arg7: memref<1x128x32xf32, #tpu.memory_space<vmem>>) attributes {dimension_semantics = [#tpu.dimension_semantics<parallel>, #tpu.dimension_semantics<parallel>], iteration_bounds = array<i64: 2, 2>, scalar_prefetch = 0 : i64, scratch_operands = 0 : i64, tpu.core_type = #tpu.core_type<tc>, window_params = [{transform_indices = @transform_0, window_bounds = array<i64: 1, 128, 4>}, {transform_indices = @transform_1, window_bounds = array<i64: 1, 32, 32>}, {pipeline_mode = #tpu.pipeline_mode<synchronous>, transform_indices = @transform_2, window_bounds = array<i64: 4, 32>}, {pipeline_mode = #tpu.pipeline_mode<synchronous>, transform_indices = @transform_3, window_bounds = array<i64: 1, 32>}, {pipeline_mode = #tpu.pipeline_mode<synchronous>, transform_indices = @transform_4, window_bounds = array<i64: 128, 32>}, {transform_indices = @transform_5, window_bounds = array<i64: 1, 128, 32>}]} {
    %c0 = arith.constant 0 : index
    %c0_0 = arith.constant 0 : index
    %c0_1 = arith.constant 0 : index
    %0 = vector.load %arg2[%c0, %c0_0, %c0_1] : memref<1x128x4xf32, #tpu.memory_space<vmem>>, vector<1x128x4xf32>
    %1 = vector.shape_cast %0 : vector<1x128x4xf32> to vector<128x4xf32>
    %2 = arith.truncf %1 : vector<128x4xf32> to vector<128x4xbf16>
    %c0_2 = arith.constant 0 : index
    %c0_3 = arith.constant 0 : index
    %3 = vector.load %arg4[%c0_2, %c0_3] : memref<4x32xbf16, #tpu.memory_space<vmem>>, vector<4x32xbf16>
    %cst = arith.constant dense<0.000000e+00> : vector<128x32xf32>
    %4 = tpu.matmul %2, %3, %cst {dimension_numbers = #tpu.dot_dimension_numbers<[1], [0], [0], [1], [0, 0, 1, 1], [], []>} : vector<128x4xbf16>, vector<4x32xbf16>, vector<128x32xf32> -> vector<128x32xf32>
    %c0_4 = arith.constant 0 : index
    %c0_5 = arith.constant 0 : index
    %5 = vector.load %arg5[%c0_4, %c0_5] : memref<1x32xf32, #tpu.memory_space<vmem>>, vector<1x32xf32>
    %6 = vector.broadcast %5 : vector<1x32xf32> to vector<128x32xf32>
    %7 = arith.addf %4, %6 : vector<128x32xf32>
    %c0_6 = arith.constant 0 : index
    %c0_7 = arith.constant 0 : index
    %8 = vector.load %arg6[%c0_6, %c0_7] : memref<128x32xbf16, #tpu.memory_space<vmem>>, vector<128x32xbf16>
    %c0_8 = arith.constant 0 : index
    %c0_9 = arith.constant 0 : index
    %c0_10 = arith.constant 0 : index
    %9 = vector.load %arg3[%c0_8, %c0_9, %c0_10] : memref<1x32x32xf32, #tpu.memory_space<vmem>>, vector<1x32x32xf32>
    %10 = vector.shape_cast %9 : vector<1x32x32xf32> to vector<32x32xf32>
    %11 = arith.truncf %10 : vector<32x32xf32> to vector<32x32xbf16>
    %cst_11 = arith.constant dense<0.000000e+00> : vector<128x32xf32>
    %12 = tpu.matmul %8, %11, %cst_11 {dimension_numbers = #tpu.dot_dimension_numbers<[1], [0], [0], [1], [0, 0, 1, 1], [], []>} : vector<128x32xbf16>, vector<32x32xbf16>, vector<128x32xf32> -> vector<128x32xf32>
    %13 = arith.addf %7, %12 : vector<128x32xf32>
    %c0_12 = arith.constant 0 : index
    %c0_13 = arith.constant 0 : index
    %c0_14 = arith.constant 0 : index
    %14 = vector.load %arg7[%c0_12, %c0_13, %c0_14] : memref<1x128x32xf32, #tpu.memory_space<vmem>>, vector<1x128x32xf32>
    %15 = vector.shape_cast %14 : vector<1x128x32xf32> to vector<128x32xf32>
    %16 = vector.shape_cast %13 : vector<128x32xf32> to vector<1x128x32xf32>
    tpu.vector_store %arg7[%c0_12, %c0_13, %c0_14], %16 {strides = array<i32>} : memref<1x128x32xf32, #tpu.memory_space<vmem>>, vector<1x128x32xf32>,
    return
  }
  func.func @transform_0(%arg0: i32, %arg1: i32) -> (i32, i32, i32) {
    %c0_i32 = arith.constant 0 : i32
    %c0_i32_0 = arith.constant 0 : i32
    return %arg0, %arg1, %c0_i32 : i32, i32, i32
  }
  func.func @transform_1(%arg0: i32, %arg1: i32) -> (i32, i32, i32) {
    %c0_i32 = arith.constant 0 : i32
    %c0_i32_0 = arith.constant 0 : i32
    return %arg0, %arg1, %c0_i32 : i32, i32, i32
  }
  func.func @transform_2(%arg0: i32, %arg1: i32) -> (i32, i32) {
    %c0_i32 = arith.constant 0 : i32
    %c0_i32_0 = arith.constant 0 : i32
    %c0_i32_1 = arith.constant 0 : i32
    return %c0_i32, %c0_i32_0 : i32, i32
  }
  func.func @transform_3(%arg0: i32, %arg1: i32) -> (i32, i32) {
    %c0_i32 = arith.constant 0 : i32
    %c0_i32_0 = arith.constant 0 : i32
    %c0_i32_1 = arith.constant 0 : i32
    return %c0_i32, %c0_i32_0 : i32, i32
  }
  func.func @transform_4(%arg0: i32, %arg1: i32) -> (i32, i32) {
    %c0_i32 = arith.constant 0 : i32
    %c0_i32_0 = arith.constant 0 : i32
    %c0_i32_1 = arith.constant 0 : i32
    return %c0_i32, %c0_i32_0 : i32, i32
  }
  func.func @transform_5(%arg0: i32, %arg1: i32) -> (i32, i32, i32) {
    %c0_i32 = arith.constant 0 : i32
    %c0_i32_0 = arith.constant 0 : i32
    return %arg0, %arg1, %c0_i32 : i32, i32, i32
  }
}

module attributes {stable_mosaic.version = 11 : i64} {
  func.func @kernel(%arg0: i32, %arg1: i32, %arg2: memref<1x128x32xf32, #tpu.memory_space<vmem>>, %arg3: memref<1x16x32xf32, #tpu.memory_space<vmem>>, %arg4: memref<1x16x32xf32, #tpu.memory_space<vmem>>, %arg5: memref<9x32x32xbf16, #tpu.memory_space<vmem>>, %arg6: memref<1x32xf32, #tpu.memory_space<vmem>>, %arg7: memref<1x128x32xf32, #tpu.memory_space<vmem>>, %arg8: memref<162x32xf32, #tpu.memory_space<vmem>>) attributes {dimension_semantics = [#tpu.dimension_semantics<parallel>, #tpu.dimension_semantics<parallel>], iteration_bounds = array<i64: 2, 2>, scalar_prefetch = 0 : i64, scratch_operands = 1 : i64, tpu.core_type = #tpu.core_type<tc>, window_params = [{transform_indices = @transform_0, window_bounds = array<i64: 1, 128, 32>}, {transform_indices = @transform_1, window_bounds = array<i64: 1, 16, 32>}, {transform_indices = @transform_2, window_bounds = array<i64: 1, 16, 32>}, {pipeline_mode = #tpu.pipeline_mode<synchronous>, transform_indices = @transform_3, window_bounds = array<i64: 9, 32, 32>}, {pipeline_mode = #tpu.pipeline_mode<synchronous>, transform_indices = @transform_4, window_bounds = array<i64: 1, 32>}, {transform_indices = @transform_5, window_bounds = array<i64: 1, 128, 32>}]} {
    %c0 = arith.constant 0 : index
    %c0_0 = arith.constant 0 : index
    %c0_1 = arith.constant 0 : index
    %0 = vector.load %arg2[%c0, %c0_0, %c0_1] : memref<1x128x32xf32, #tpu.memory_space<vmem>>, vector<1x128x32xf32>
    %1 = vector.shape_cast %0 : vector<1x128x32xf32> to vector<128x32xf32>
    %cst = arith.constant 0.000000e+00 : f32
    %2 = vector.broadcast %cst : f32 to vector<17x32xf32>
    %c0_2 = arith.constant 0 : index
    %c0_3 = arith.constant 0 : index
    %3 = vector.load %arg8[%c0_2, %c0_3] : memref<162x32xf32, #tpu.memory_space<vmem>>, vector<17x32xf32>
    tpu.vector_store %arg8[%c0_2, %c0_3], %2 {strides = array<i32>} : memref<162x32xf32, #tpu.memory_space<vmem>>, vector<17x32xf32>,
    %cst_4 = arith.constant 0.000000e+00 : f32
    %4 = vector.broadcast %cst_4 : f32 to vector<17x32xf32>
    %c145 = arith.constant 145 : index
    %c0_5 = arith.constant 0 : index
    %5 = vector.load %arg8[%c145, %c0_5] : memref<162x32xf32, #tpu.memory_space<vmem>>, vector<17x32xf32>
    tpu.vector_store %arg8[%c145, %c0_5], %4 {strides = array<i32>} : memref<162x32xf32, #tpu.memory_space<vmem>>, vector<17x32xf32>,
    %c17 = arith.constant 17 : index
    %c0_6 = arith.constant 0 : index
    %6 = vector.load %arg8[%c17, %c0_6] : memref<162x32xf32, #tpu.memory_space<vmem>>, vector<128x32xf32>
    tpu.vector_store %arg8[%c17, %c0_6], %1 {strides = array<i32>} : memref<162x32xf32, #tpu.memory_space<vmem>>, vector<128x32xf32>,
    %c0_7 = arith.constant 0 : index
    %c0_8 = arith.constant 0 : index
    %c0_9 = arith.constant 0 : index
    %7 = vector.load %arg3[%c0_7, %c0_8, %c0_9] : memref<1x16x32xf32, #tpu.memory_space<vmem>>, vector<1x16x32xf32>
    %8 = vector.shape_cast %7 : vector<1x16x32xf32> to vector<16x32xf32>
    %c0_10 = arith.constant 0 : index
    %c0_11 = arith.constant 0 : index
    %c0_12 = arith.constant 0 : index
    %9 = vector.load %arg4[%c0_10, %c0_11, %c0_12] : memref<1x16x32xf32, #tpu.memory_space<vmem>>, vector<1x16x32xf32>
    %10 = vector.shape_cast %9 : vector<1x16x32xf32> to vector<16x32xf32>
    %c0_i32 = arith.constant 0 : i32
    %11 = arith.cmpi sgt, %arg1, %c0_i32 : i32
    %12 = arith.extui %11 : i1 to i32
    %13 = arith.sitofp %12 : i32 to f32
    %14 = vector.broadcast %13 : f32 to vector<16x32xf32>
    %15 = arith.mulf %8, %14 : vector<16x32xf32>
    %c1_i32 = arith.constant 1 : i32
    %16 = arith.cmpi slt, %arg1, %c1_i32 : i32
    %17 = arith.extui %16 : i1 to i32
    %18 = arith.sitofp %17 : i32 to f32
    %19 = vector.broadcast %18 : f32 to vector<16x32xf32>
    %20 = arith.mulf %10, %19 : vector<16x32xf32>
    %c1 = arith.constant 1 : index
    %c0_13 = arith.constant 0 : index
    %21 = vector.load %arg8[%c1, %c0_13] : memref<162x32xf32, #tpu.memory_space<vmem>>, vector<16x32xf32>
    tpu.vector_store %arg8[%c1, %c0_13], %15 {strides = array<i32>} : memref<162x32xf32, #tpu.memory_space<vmem>>, vector<16x32xf32>,
    %c145_14 = arith.constant 145 : index
    %c0_15 = arith.constant 0 : index
    %22 = vector.load %arg8[%c145_14, %c0_15] : memref<162x32xf32, #tpu.memory_space<vmem>>, vector<16x32xf32>
    tpu.vector_store %arg8[%c145_14, %c0_15], %20 {strides = array<i32>} : memref<162x32xf32, #tpu.memory_space<vmem>>, vector<16x32xf32>,
    %c0_16 = arith.constant 0 : index
    %c0_17 = arith.constant 0 : index
    %23 = vector.load %arg6[%c0_16, %c0_17] : memref<1x32xf32, #tpu.memory_space<vmem>>, vector<1x32xf32>
    %cst_18 = arith.constant 0.000000e+00 : f32
    %24 = vector.broadcast %cst_18 : f32 to vector<128x32xf32>
    %c0_19 = arith.constant 0 : index
    %c0_20 = arith.constant 0 : index
    %25 = vector.load %arg8[%c0_19, %c0_20] : memref<162x32xf32, #tpu.memory_space<vmem>>, vector<128x32xf32>
    %26 = arith.truncf %25 : vector<128x32xf32> to vector<128x32xbf16>
    %c0_21 = arith.constant 0 : index
    %c0_22 = arith.constant 0 : index
    %c0_23 = arith.constant 0 : index
    %27 = vector.load %arg5[%c0_21, %c0_22, %c0_23] : memref<9x32x32xbf16, #tpu.memory_space<vmem>>, vector<1x32x32xbf16>
    %28 = vector.shape_cast %27 : vector<1x32x32xbf16> to vector<32x32xbf16>
    %cst_24 = arith.constant dense<0.000000e+00> : vector<128x32xf32>
    %29 = tpu.matmul %26, %28, %cst_24 {dimension_numbers = #tpu.dot_dimension_numbers<[1], [0], [0], [1], [0, 0, 1, 1], [], []>} : vector<128x32xbf16>, vector<32x32xbf16>, vector<128x32xf32> -> vector<128x32xf32>
    %30 = arith.addf %24, %29 : vector<128x32xf32>
    %c16 = arith.constant 16 : index
    %c0_25 = arith.constant 0 : index
    %31 = vector.load %arg8[%c16, %c0_25] : memref<162x32xf32, #tpu.memory_space<vmem>>, vector<128x32xf32>
    %32 = arith.truncf %31 : vector<128x32xf32> to vector<128x32xbf16>
    %c3 = arith.constant 3 : index
    %c0_26 = arith.constant 0 : index
    %c0_27 = arith.constant 0 : index
    %33 = vector.load %arg5[%c3, %c0_26, %c0_27] : memref<9x32x32xbf16, #tpu.memory_space<vmem>>, vector<1x32x32xbf16>
    %34 = vector.shape_cast %33 : vector<1x32x32xbf16> to vector<32x32xbf16>
    %cst_28 = arith.constant dense<0.000000e+00> : vector<128x32xf32>
    %35 = tpu.matmul %32, %34, %cst_28 {dimension_numbers = #tpu.dot_dimension_numbers<[1], [0], [0], [1], [0, 0, 1, 1], [], []>} : vector<128x32xbf16>, vector<32x32xbf16>, vector<128x32xf32> -> vector<128x32xf32>
    %36 = arith.addf %30, %35 : vector<128x32xf32>
    %c32 = arith.constant 32 : index
    %c0_29 = arith.constant 0 : index
    %37 = vector.load %arg8[%c32, %c0_29] : memref<162x32xf32, #tpu.memory_space<vmem>>, vector<128x32xf32>
    %38 = arith.truncf %37 : vector<128x32xf32> to vector<128x32xbf16>
    %c6 = arith.constant 6 : index
    %c0_30 = arith.constant 0 : index
    %c0_31 = arith.constant 0 : index
    %39 = vector.load %arg5[%c6, %c0_30, %c0_31] : memref<9x32x32xbf16, #tpu.memory_space<vmem>>, vector<1x32x32xbf16>
    %40 = vector.shape_cast %39 : vector<1x32x32xbf16> to vector<32x32xbf16>
    %cst_32 = arith.constant dense<0.000000e+00> : vector<128x32xf32>
    %41 = tpu.matmul %38, %40, %cst_32 {dimension_numbers = #tpu.dot_dimension_numbers<[1], [0], [0], [1], [0, 0, 1, 1], [], []>} : vector<128x32xbf16>, vector<32x32xbf16>, vector<128x32xf32> -> vector<128x32xf32>
    %42 = arith.addf %36, %41 : vector<128x32xf32>
    %cst_33 = arith.constant 0.000000e+00 : f32
    %43 = vector.broadcast %cst_33 : f32 to vector<128x32xf32>
    %c1_34 = arith.constant 1 : index
    %c0_35 = arith.constant 0 : index
    %44 = vector.load %arg8[%c1_34, %c0_35] : memref<162x32xf32, #tpu.memory_space<vmem>>, vector<128x32xf32>
    %45 = arith.truncf %44 : vector<128x32xf32> to vector<128x32xbf16>
    %c1_36 = arith.constant 1 : index
    %c0_37 = arith.constant 0 : index
    %c0_38 = arith.constant 0 : index
    %46 = vector.load %arg5[%c1_36, %c0_37, %c0_38] : memref<9x32x32xbf16, #tpu.memory_space<vmem>>, vector<1x32x32xbf16>
    %47 = vector.shape_cast %46 : vector<1x32x32xbf16> to vector<32x32xbf16>
    %cst_39 = arith.constant dense<0.000000e+00> : vector<128x32xf32>
    %48 = tpu.matmul %45, %47, %cst_39 {dimension_numbers = #tpu.dot_dimension_numbers<[1], [0], [0], [1], [0, 0, 1, 1], [], []>} : vector<128x32xbf16>, vector<32x32xbf16>, vector<128x32xf32> -> vector<128x32xf32>
    %49 = arith.addf %43, %48 : vector<128x32xf32>
    %c17_40 = arith.constant 17 : index
    %c0_41 = arith.constant 0 : index
    %50 = vector.load %arg8[%c17_40, %c0_41] : memref<162x32xf32, #tpu.memory_space<vmem>>, vector<128x32xf32>
    %51 = arith.truncf %50 : vector<128x32xf32> to vector<128x32xbf16>
    %c4 = arith.constant 4 : index
    %c0_42 = arith.constant 0 : index
    %c0_43 = arith.constant 0 : index
    %52 = vector.load %arg5[%c4, %c0_42, %c0_43] : memref<9x32x32xbf16, #tpu.memory_space<vmem>>, vector<1x32x32xbf16>
    %53 = vector.shape_cast %52 : vector<1x32x32xbf16> to vector<32x32xbf16>
    %cst_44 = arith.constant dense<0.000000e+00> : vector<128x32xf32>
    %54 = tpu.matmul %51, %53, %cst_44 {dimension_numbers = #tpu.dot_dimension_numbers<[1], [0], [0], [1], [0, 0, 1, 1], [], []>} : vector<128x32xbf16>, vector<32x32xbf16>, vector<128x32xf32> -> vector<128x32xf32>
    %55 = arith.addf %49, %54 : vector<128x32xf32>
    %c33 = arith.constant 33 : index
    %c0_45 = arith.constant 0 : index
    %56 = vector.load %arg8[%c33, %c0_45] : memref<162x32xf32, #tpu.memory_space<vmem>>, vector<128x32xf32>
    %57 = arith.truncf %56 : vector<128x32xf32> to vector<128x32xbf16>
    %c7 = arith.constant 7 : index
    %c0_46 = arith.constant 0 : index
    %c0_47 = arith.constant 0 : index
    %58 = vector.load %arg5[%c7, %c0_46, %c0_47] : memref<9x32x32xbf16, #tpu.memory_space<vmem>>, vector<1x32x32xbf16>
    %59 = vector.shape_cast %58 : vector<1x32x32xbf16> to vector<32x32xbf16>
    %cst_48 = arith.constant dense<0.000000e+00> : vector<128x32xf32>
    %60 = tpu.matmul %57, %59, %cst_48 {dimension_numbers = #tpu.dot_dimension_numbers<[1], [0], [0], [1], [0, 0, 1, 1], [], []>} : vector<128x32xbf16>, vector<32x32xbf16>, vector<128x32xf32> -> vector<128x32xf32>
    %61 = arith.addf %55, %60 : vector<128x32xf32>
    %cst_49 = arith.constant 0.000000e+00 : f32
    %62 = vector.broadcast %cst_49 : f32 to vector<128x32xf32>
    %c2 = arith.constant 2 : index
    %c0_50 = arith.constant 0 : index
    %63 = vector.load %arg8[%c2, %c0_50] : memref<162x32xf32, #tpu.memory_space<vmem>>, vector<128x32xf32>
    %64 = arith.truncf %63 : vector<128x32xf32> to vector<128x32xbf16>
    %c2_51 = arith.constant 2 : index
    %c0_52 = arith.constant 0 : index
    %c0_53 = arith.constant 0 : index
    %65 = vector.load %arg5[%c2_51, %c0_52, %c0_53] : memref<9x32x32xbf16, #tpu.memory_space<vmem>>, vector<1x32x32xbf16>
    %66 = vector.shape_cast %65 : vector<1x32x32xbf16> to vector<32x32xbf16>
    %cst_54 = arith.constant dense<0.000000e+00> : vector<128x32xf32>
    %67 = tpu.matmul %64, %66, %cst_54 {dimension_numbers = #tpu.dot_dimension_numbers<[1], [0], [0], [1], [0, 0, 1, 1], [], []>} : vector<128x32xbf16>, vector<32x32xbf16>, vector<128x32xf32> -> vector<128x32xf32>
    %68 = arith.addf %62, %67 : vector<128x32xf32>
    %c18 = arith.constant 18 : index
    %c0_55 = arith.constant 0 : index
    %69 = vector.load %arg8[%c18, %c0_55] : memref<162x32xf32, #tpu.memory_space<vmem>>, vector<128x32xf32>
    %70 = arith.truncf %69 : vector<128x32xf32> to vector<128x32xbf16>
    %c5 = arith.constant 5 : index
    %c0_56 = arith.constant 0 : index
    %c0_57 = arith.constant 0 : index
    %71 = vector.load %arg5[%c5, %c0_56, %c0_57] : memref<9x32x32xbf16, #tpu.memory_space<vmem>>, vector<1x32x32xbf16>
    %72 = vector.shape_cast %71 : vector<1x32x32xbf16> to vector<32x32xbf16>
    %cst_58 = arith.constant dense<0.000000e+00> : vector<128x32xf32>
    %73 = tpu.matmul %70, %72, %cst_58 {dimension_numbers = #tpu.dot_dimension_numbers<[1], [0], [0], [1], [0, 0, 1, 1], [], []>} : vector<128x32xbf16>, vector<32x32xbf16>, vector<128x32xf32> -> vector<128x32xf32>
    %74 = arith.addf %68, %73 : vector<128x32xf32>
    %c34 = arith.constant 34 : index
    %c0_59 = arith.constant 0 : index
    %75 = vector.load %arg8[%c34, %c0_59] : memref<162x32xf32, #tpu.memory_space<vmem>>, vector<128x32xf32>
    %76 = arith.truncf %75 : vector<128x32xf32> to vector<128x32xbf16>
    %c8 = arith.constant 8 : index
    %c0_60 = arith.constant 0 : index
    %c0_61 = arith.constant 0 : index
    %77 = vector.load %arg5[%c8, %c0_60, %c0_61] : memref<9x32x32xbf16, #tpu.memory_space<vmem>>, vector<1x32x32xbf16>
    %78 = vector.shape_cast %77 : vector<1x32x32xbf16> to vector<32x32xbf16>
    %cst_62 = arith.constant dense<0.000000e+00> : vector<128x32xf32>
    %79 = tpu.matmul %76, %78, %cst_62 {dimension_numbers = #tpu.dot_dimension_numbers<[1], [0], [0], [1], [0, 0, 1, 1], [], []>} : vector<128x32xbf16>, vector<32x32xbf16>, vector<128x32xf32> -> vector<128x32xf32>
    %80 = arith.addf %74, %79 : vector<128x32xf32>
    %81 = tpu.iota {dimensions = array<i32: 0>} : vector<128x1xi32>
    %c16_i32 = arith.constant 16 : i32
    %c0_i32_63 = arith.constant 0 : i32
    %82 = arith.cmpi eq, %c16_i32, %c0_i32_63 : i32
    %c1_i32_64 = arith.constant 1 : i32
    %83 = arith.select %82, %c1_i32_64, %c16_i32 : i32
    %84 = vector.broadcast %83 : i32 to vector<128x1xi32>
    %85 = arith.remsi %81, %84 : vector<128x1xi32>
    %c0_i32_65 = arith.constant 0 : i32
    %86 = vector.broadcast %c0_i32_65 : i32 to vector<128x1xi32>
    %87 = arith.cmpi ne, %85, %86 : vector<128x1xi32>
    %c0_i32_66 = arith.constant 0 : i32
    %88 = vector.broadcast %c0_i32_66 : i32 to vector<128x1xi32>
    %89 = arith.cmpi slt, %85, %88 : vector<128x1xi32>
    %c0_i32_67 = arith.constant 0 : i32
    %90 = arith.cmpi slt, %83, %c0_i32_67 : i32
    %91 = vector.broadcast %90 : i1 to vector<128x1xi1>
    %92 = vector.broadcast %91 : vector<128x1xi1> to vector<128x1xi1>
    %93 = arith.xori %89, %92 : vector<128x1xi1>
    %94 = arith.andi %93, %87 : vector<128x1xi1>
    %95 = vector.broadcast %83 : i32 to vector<128x1xi32>
    %96 = arith.addi %85, %95 : vector<128x1xi32>
    %97 = arith.select %94, %96, %85 : vector<128x1xi1>, vector<128x1xi32>
    %98 = vector.broadcast %23 : vector<1x32xf32> to vector<128x32xf32>
    %99 = arith.addf %61, %98 : vector<128x32xf32>
    %c0_i32_68 = arith.constant 0 : i32
    %100 = vector.broadcast %c0_i32_68 : i32 to vector<128x1xi32>
    %101 = arith.cmpi sgt, %97, %100 : vector<128x1xi32>
    %cst_69 = arith.constant 0.000000e+00 : f32
    %102 = vector.shape_cast %101 : vector<128x1xi1> to vector<128x1xi1>
    %103 = vector.broadcast %102 : vector<128x1xi1> to vector<128x32xi1>
    %104 = vector.broadcast %cst_69 : f32 to vector<128x32xf32>
    %105 = arith.select %103, %42, %104 : vector<128x32xi1>, vector<128x32xf32>
    %106 = arith.addf %99, %105 : vector<128x32xf32>
    %c15_i32 = arith.constant 15 : i32
    %107 = vector.broadcast %c15_i32 : i32 to vector<128x1xi32>
    %108 = arith.cmpi slt, %97, %107 : vector<128x1xi32>
    %cst_70 = arith.constant 0.000000e+00 : f32
    %109 = vector.shape_cast %108 : vector<128x1xi1> to vector<128x1xi1>
    %110 = vector.broadcast %109 : vector<128x1xi1> to vector<128x32xi1>
    %111 = vector.broadcast %cst_70 : f32 to vector<128x32xf32>
    %112 = arith.select %110, %80, %111 : vector<128x32xi1>, vector<128x32xf32>
    %113 = arith.addf %106, %112 : vector<128x32xf32>
    %c0_71 = arith.constant 0 : index
    %c0_72 = arith.constant 0 : index
    %c0_73 = arith.constant 0 : index
    %114 = vector.load %arg7[%c0_71, %c0_72, %c0_73] : memref<1x128x32xf32, #tpu.memory_space<vmem>>, vector<1x128x32xf32>
    %115 = vector.shape_cast %114 : vector<1x128x32xf32> to vector<128x32xf32>
    %116 = vector.shape_cast %113 : vector<128x32xf32> to vector<1x128x32xf32>
    tpu.vector_store %arg7[%c0_71, %c0_72, %c0_73], %116 {strides = array<i32>} : memref<1x128x32xf32, #tpu.memory_space<vmem>>, vector<1x128x32xf32>,
    return
  }
  func.func @transform_0(%arg0: i32, %arg1: i32) -> (i32, i32, i32) {
    %c0_i32 = arith.constant 0 : i32
    %c0_i32_0 = arith.constant 0 : i32
    return %arg0, %arg1, %c0_i32 : i32, i32, i32
  }
  func.func @transform_1(%arg0: i32, %arg1: i32) -> (i32, i32, i32) {
    %c8_i32 = arith.constant 8 : i32
    %0 = arith.muli %arg1, %c8_i32 : i32
    %c1_i32 = arith.constant 1 : i32
    %1 = arith.subi %0, %c1_i32 : i32
    %c0_i32 = arith.constant 0 : i32
    %2 = arith.maxsi %1, %c0_i32 : i32
    %c0_i32_0 = arith.constant 0 : i32
    %c0_i32_1 = arith.constant 0 : i32
    return %arg0, %2, %c0_i32_0 : i32, i32, i32
  }
  func.func @transform_2(%arg0: i32, %arg1: i32) -> (i32, i32, i32) {
    %c1_i32 = arith.constant 1 : i32
    %0 = arith.addi %arg1, %c1_i32 : i32
    %c8_i32 = arith.constant 8 : i32
    %1 = arith.muli %0, %c8_i32 : i32
    %c15_i32 = arith.constant 15 : i32
    %2 = arith.minsi %1, %c15_i32 : i32
    %c0_i32 = arith.constant 0 : i32
    %c0_i32_0 = arith.constant 0 : i32
    return %arg0, %2, %c0_i32 : i32, i32, i32
  }
  func.func @transform_3(%arg0: i32, %arg1: i32) -> (i32, i32, i32) {
    %c0_i32 = arith.constant 0 : i32
    %c0_i32_0 = arith.constant 0 : i32
    %c0_i32_1 = arith.constant 0 : i32
    %c0_i32_2 = arith.constant 0 : i32
    return %c0_i32, %c0_i32_0, %c0_i32_1 : i32, i32, i32
  }
  func.func @transform_4(%arg0: i32, %arg1: i32) -> (i32, i32) {
    %c0_i32 = arith.constant 0 : i32
    %c0_i32_0 = arith.constant 0 : i32
    %c0_i32_1 = arith.constant 0 : i32
    return %c0_i32, %c0_i32_0 : i32, i32
  }
  func.func @transform_5(%arg0: i32, %arg1: i32) -> (i32, i32, i32) {
    %c0_i32 = arith.constant 0 : i32
    %c0_i32_0 = arith.constant 0 : i32
    return %arg0, %arg1, %c0_i32 : i32, i32, i32
  }
}

module attributes {stable_mosaic.version = 11 : i64} {
  func.func @kernel(%arg0: i32, %arg1: i32, %arg2: memref<1x64x32xf32, #tpu.memory_space<vmem>>, %arg3: memref<9x32x32xbf16, #tpu.memory_space<vmem>>, %arg4: memref<1x32xf32, #tpu.memory_space<vmem>>, %arg5: memref<1x64x32xf32, #tpu.memory_space<vmem>>, %arg6: memref<82x32xf32, #tpu.memory_space<vmem>>) attributes {dimension_semantics = [#tpu.dimension_semantics<parallel>, #tpu.dimension_semantics<parallel>], iteration_bounds = array<i64: 2, 1>, scalar_prefetch = 0 : i64, scratch_operands = 1 : i64, tpu.core_type = #tpu.core_type<tc>, window_params = [{transform_indices = @transform_0, window_bounds = array<i64: 1, 64, 32>}, {pipeline_mode = #tpu.pipeline_mode<synchronous>, transform_indices = @transform_1, window_bounds = array<i64: 9, 32, 32>}, {pipeline_mode = #tpu.pipeline_mode<synchronous>, transform_indices = @transform_2, window_bounds = array<i64: 1, 32>}, {transform_indices = @transform_3, window_bounds = array<i64: 1, 64, 32>}]} {
    %c0 = arith.constant 0 : index
    %c0_0 = arith.constant 0 : index
    %c0_1 = arith.constant 0 : index
    %0 = vector.load %arg2[%c0, %c0_0, %c0_1] : memref<1x64x32xf32, #tpu.memory_space<vmem>>, vector<1x64x32xf32>
    %1 = vector.shape_cast %0 : vector<1x64x32xf32> to vector<64x32xf32>
    %cst = arith.constant 0.000000e+00 : f32
    %2 = vector.broadcast %cst : f32 to vector<9x32xf32>
    %c0_2 = arith.constant 0 : index
    %c0_3 = arith.constant 0 : index
    %3 = vector.load %arg6[%c0_2, %c0_3] : memref<82x32xf32, #tpu.memory_space<vmem>>, vector<9x32xf32>
    tpu.vector_store %arg6[%c0_2, %c0_3], %2 {strides = array<i32>} : memref<82x32xf32, #tpu.memory_space<vmem>>, vector<9x32xf32>,
    %cst_4 = arith.constant 0.000000e+00 : f32
    %4 = vector.broadcast %cst_4 : f32 to vector<9x32xf32>
    %c73 = arith.constant 73 : index
    %c0_5 = arith.constant 0 : index
    %5 = vector.load %arg6[%c73, %c0_5] : memref<82x32xf32, #tpu.memory_space<vmem>>, vector<9x32xf32>
    tpu.vector_store %arg6[%c73, %c0_5], %4 {strides = array<i32>} : memref<82x32xf32, #tpu.memory_space<vmem>>, vector<9x32xf32>,
    %c9 = arith.constant 9 : index
    %c0_6 = arith.constant 0 : index
    %6 = vector.load %arg6[%c9, %c0_6] : memref<82x32xf32, #tpu.memory_space<vmem>>, vector<64x32xf32>
    tpu.vector_store %arg6[%c9, %c0_6], %1 {strides = array<i32>} : memref<82x32xf32, #tpu.memory_space<vmem>>, vector<64x32xf32>,
    %c0_7 = arith.constant 0 : index
    %c0_8 = arith.constant 0 : index
    %7 = vector.load %arg4[%c0_7, %c0_8] : memref<1x32xf32, #tpu.memory_space<vmem>>, vector<1x32xf32>
    %cst_9 = arith.constant 0.000000e+00 : f32
    %8 = vector.broadcast %cst_9 : f32 to vector<64x32xf32>
    %c0_10 = arith.constant 0 : index
    %c0_11 = arith.constant 0 : index
    %9 = vector.load %arg6[%c0_10, %c0_11] : memref<82x32xf32, #tpu.memory_space<vmem>>, vector<64x32xf32>
    %10 = arith.truncf %9 : vector<64x32xf32> to vector<64x32xbf16>
    %c0_12 = arith.constant 0 : index
    %c0_13 = arith.constant 0 : index
    %c0_14 = arith.constant 0 : index
    %11 = vector.load %arg3[%c0_12, %c0_13, %c0_14] : memref<9x32x32xbf16, #tpu.memory_space<vmem>>, vector<1x32x32xbf16>
    %12 = vector.shape_cast %11 : vector<1x32x32xbf16> to vector<32x32xbf16>
    %cst_15 = arith.constant dense<0.000000e+00> : vector<64x32xf32>
    %13 = tpu.matmul %10, %12, %cst_15 {dimension_numbers = #tpu.dot_dimension_numbers<[1], [0], [0], [1], [0, 0, 1, 1], [], []>} : vector<64x32xbf16>, vector<32x32xbf16>, vector<64x32xf32> -> vector<64x32xf32>
    %14 = arith.addf %8, %13 : vector<64x32xf32>
    %c8 = arith.constant 8 : index
    %c0_16 = arith.constant 0 : index
    %15 = vector.load %arg6[%c8, %c0_16] : memref<82x32xf32, #tpu.memory_space<vmem>>, vector<64x32xf32>
    %16 = arith.truncf %15 : vector<64x32xf32> to vector<64x32xbf16>
    %c3 = arith.constant 3 : index
    %c0_17 = arith.constant 0 : index
    %c0_18 = arith.constant 0 : index
    %17 = vector.load %arg3[%c3, %c0_17, %c0_18] : memref<9x32x32xbf16, #tpu.memory_space<vmem>>, vector<1x32x32xbf16>
    %18 = vector.shape_cast %17 : vector<1x32x32xbf16> to vector<32x32xbf16>
    %cst_19 = arith.constant dense<0.000000e+00> : vector<64x32xf32>
    %19 = tpu.matmul %16, %18, %cst_19 {dimension_numbers = #tpu.dot_dimension_numbers<[1], [0], [0], [1], [0, 0, 1, 1], [], []>} : vector<64x32xbf16>, vector<32x32xbf16>, vector<64x32xf32> -> vector<64x32xf32>
    %20 = arith.addf %14, %19 : vector<64x32xf32>
    %c16 = arith.constant 16 : index
    %c0_20 = arith.constant 0 : index
    %21 = vector.load %arg6[%c16, %c0_20] : memref<82x32xf32, #tpu.memory_space<vmem>>, vector<64x32xf32>
    %22 = arith.truncf %21 : vector<64x32xf32> to vector<64x32xbf16>
    %c6 = arith.constant 6 : index
    %c0_21 = arith.constant 0 : index
    %c0_22 = arith.constant 0 : index
    %23 = vector.load %arg3[%c6, %c0_21, %c0_22] : memref<9x32x32xbf16, #tpu.memory_space<vmem>>, vector<1x32x32xbf16>
    %24 = vector.shape_cast %23 : vector<1x32x32xbf16> to vector<32x32xbf16>
    %cst_23 = arith.constant dense<0.000000e+00> : vector<64x32xf32>
    %25 = tpu.matmul %22, %24, %cst_23 {dimension_numbers = #tpu.dot_dimension_numbers<[1], [0], [0], [1], [0, 0, 1, 1], [], []>} : vector<64x32xbf16>, vector<32x32xbf16>, vector<64x32xf32> -> vector<64x32xf32>
    %26 = arith.addf %20, %25 : vector<64x32xf32>
    %cst_24 = arith.constant 0.000000e+00 : f32
    %27 = vector.broadcast %cst_24 : f32 to vector<64x32xf32>
    %c1 = arith.constant 1 : index
    %c0_25 = arith.constant 0 : index
    %28 = vector.load %arg6[%c1, %c0_25] : memref<82x32xf32, #tpu.memory_space<vmem>>, vector<64x32xf32>
    %29 = arith.truncf %28 : vector<64x32xf32> to vector<64x32xbf16>
    %c1_26 = arith.constant 1 : index
    %c0_27 = arith.constant 0 : index
    %c0_28 = arith.constant 0 : index
    %30 = vector.load %arg3[%c1_26, %c0_27, %c0_28] : memref<9x32x32xbf16, #tpu.memory_space<vmem>>, vector<1x32x32xbf16>
    %31 = vector.shape_cast %30 : vector<1x32x32xbf16> to vector<32x32xbf16>
    %cst_29 = arith.constant dense<0.000000e+00> : vector<64x32xf32>
    %32 = tpu.matmul %29, %31, %cst_29 {dimension_numbers = #tpu.dot_dimension_numbers<[1], [0], [0], [1], [0, 0, 1, 1], [], []>} : vector<64x32xbf16>, vector<32x32xbf16>, vector<64x32xf32> -> vector<64x32xf32>
    %33 = arith.addf %27, %32 : vector<64x32xf32>
    %c9_30 = arith.constant 9 : index
    %c0_31 = arith.constant 0 : index
    %34 = vector.load %arg6[%c9_30, %c0_31] : memref<82x32xf32, #tpu.memory_space<vmem>>, vector<64x32xf32>
    %35 = arith.truncf %34 : vector<64x32xf32> to vector<64x32xbf16>
    %c4 = arith.constant 4 : index
    %c0_32 = arith.constant 0 : index
    %c0_33 = arith.constant 0 : index
    %36 = vector.load %arg3[%c4, %c0_32, %c0_33] : memref<9x32x32xbf16, #tpu.memory_space<vmem>>, vector<1x32x32xbf16>
    %37 = vector.shape_cast %36 : vector<1x32x32xbf16> to vector<32x32xbf16>
    %cst_34 = arith.constant dense<0.000000e+00> : vector<64x32xf32>
    %38 = tpu.matmul %35, %37, %cst_34 {dimension_numbers = #tpu.dot_dimension_numbers<[1], [0], [0], [1], [0, 0, 1, 1], [], []>} : vector<64x32xbf16>, vector<32x32xbf16>, vector<64x32xf32> -> vector<64x32xf32>
    %39 = arith.addf %33, %38 : vector<64x32xf32>
    %c17 = arith.constant 17 : index
    %c0_35 = arith.constant 0 : index
    %40 = vector.load %arg6[%c17, %c0_35] : memref<82x32xf32, #tpu.memory_space<vmem>>, vector<64x32xf32>
    %41 = arith.truncf %40 : vector<64x32xf32> to vector<64x32xbf16>
    %c7 = arith.constant 7 : index
    %c0_36 = arith.constant 0 : index
    %c0_37 = arith.constant 0 : index
    %42 = vector.load %arg3[%c7, %c0_36, %c0_37] : memref<9x32x32xbf16, #tpu.memory_space<vmem>>, vector<1x32x32xbf16>
    %43 = vector.shape_cast %42 : vector<1x32x32xbf16> to vector<32x32xbf16>
    %cst_38 = arith.constant dense<0.000000e+00> : vector<64x32xf32>
    %44 = tpu.matmul %41, %43, %cst_38 {dimension_numbers = #tpu.dot_dimension_numbers<[1], [0], [0], [1], [0, 0, 1, 1], [], []>} : vector<64x32xbf16>, vector<32x32xbf16>, vector<64x32xf32> -> vector<64x32xf32>
    %45 = arith.addf %39, %44 : vector<64x32xf32>
    %cst_39 = arith.constant 0.000000e+00 : f32
    %46 = vector.broadcast %cst_39 : f32 to vector<64x32xf32>
    %c2 = arith.constant 2 : index
    %c0_40 = arith.constant 0 : index
    %47 = vector.load %arg6[%c2, %c0_40] : memref<82x32xf32, #tpu.memory_space<vmem>>, vector<64x32xf32>
    %48 = arith.truncf %47 : vector<64x32xf32> to vector<64x32xbf16>
    %c2_41 = arith.constant 2 : index
    %c0_42 = arith.constant 0 : index
    %c0_43 = arith.constant 0 : index
    %49 = vector.load %arg3[%c2_41, %c0_42, %c0_43] : memref<9x32x32xbf16, #tpu.memory_space<vmem>>, vector<1x32x32xbf16>
    %50 = vector.shape_cast %49 : vector<1x32x32xbf16> to vector<32x32xbf16>
    %cst_44 = arith.constant dense<0.000000e+00> : vector<64x32xf32>
    %51 = tpu.matmul %48, %50, %cst_44 {dimension_numbers = #tpu.dot_dimension_numbers<[1], [0], [0], [1], [0, 0, 1, 1], [], []>} : vector<64x32xbf16>, vector<32x32xbf16>, vector<64x32xf32> -> vector<64x32xf32>
    %52 = arith.addf %46, %51 : vector<64x32xf32>
    %c10 = arith.constant 10 : index
    %c0_45 = arith.constant 0 : index
    %53 = vector.load %arg6[%c10, %c0_45] : memref<82x32xf32, #tpu.memory_space<vmem>>, vector<64x32xf32>
    %54 = arith.truncf %53 : vector<64x32xf32> to vector<64x32xbf16>
    %c5 = arith.constant 5 : index
    %c0_46 = arith.constant 0 : index
    %c0_47 = arith.constant 0 : index
    %55 = vector.load %arg3[%c5, %c0_46, %c0_47] : memref<9x32x32xbf16, #tpu.memory_space<vmem>>, vector<1x32x32xbf16>
    %56 = vector.shape_cast %55 : vector<1x32x32xbf16> to vector<32x32xbf16>
    %cst_48 = arith.constant dense<0.000000e+00> : vector<64x32xf32>
    %57 = tpu.matmul %54, %56, %cst_48 {dimension_numbers = #tpu.dot_dimension_numbers<[1], [0], [0], [1], [0, 0, 1, 1], [], []>} : vector<64x32xbf16>, vector<32x32xbf16>, vector<64x32xf32> -> vector<64x32xf32>
    %58 = arith.addf %52, %57 : vector<64x32xf32>
    %c18 = arith.constant 18 : index
    %c0_49 = arith.constant 0 : index
    %59 = vector.load %arg6[%c18, %c0_49] : memref<82x32xf32, #tpu.memory_space<vmem>>, vector<64x32xf32>
    %60 = arith.truncf %59 : vector<64x32xf32> to vector<64x32xbf16>
    %c8_50 = arith.constant 8 : index
    %c0_51 = arith.constant 0 : index
    %c0_52 = arith.constant 0 : index
    %61 = vector.load %arg3[%c8_50, %c0_51, %c0_52] : memref<9x32x32xbf16, #tpu.memory_space<vmem>>, vector<1x32x32xbf16>
    %62 = vector.shape_cast %61 : vector<1x32x32xbf16> to vector<32x32xbf16>
    %cst_53 = arith.constant dense<0.000000e+00> : vector<64x32xf32>
    %63 = tpu.matmul %60, %62, %cst_53 {dimension_numbers = #tpu.dot_dimension_numbers<[1], [0], [0], [1], [0, 0, 1, 1], [], []>} : vector<64x32xbf16>, vector<32x32xbf16>, vector<64x32xf32> -> vector<64x32xf32>
    %64 = arith.addf %58, %63 : vector<64x32xf32>
    %65 = tpu.iota {dimensions = array<i32: 0>} : vector<64x1xi32>
    %c8_i32 = arith.constant 8 : i32
    %c0_i32 = arith.constant 0 : i32
    %66 = arith.cmpi eq, %c8_i32, %c0_i32 : i32
    %c1_i32 = arith.constant 1 : i32
    %67 = arith.select %66, %c1_i32, %c8_i32 : i32
    %68 = vector.broadcast %67 : i32 to vector<64x1xi32>
    %69 = arith.remsi %65, %68 : vector<64x1xi32>
    %c0_i32_54 = arith.constant 0 : i32
    %70 = vector.broadcast %c0_i32_54 : i32 to vector<64x1xi32>
    %71 = arith.cmpi ne, %69, %70 : vector<64x1xi32>
    %c0_i32_55 = arith.constant 0 : i32
    %72 = vector.broadcast %c0_i32_55 : i32 to vector<64x1xi32>
    %73 = arith.cmpi slt, %69, %72 : vector<64x1xi32>
    %c0_i32_56 = arith.constant 0 : i32
    %74 = arith.cmpi slt, %67, %c0_i32_56 : i32
    %75 = vector.broadcast %74 : i1 to vector<64x1xi1>
    %76 = vector.broadcast %75 : vector<64x1xi1> to vector<64x1xi1>
    %77 = arith.xori %73, %76 : vector<64x1xi1>
    %78 = arith.andi %77, %71 : vector<64x1xi1>
    %79 = vector.broadcast %67 : i32 to vector<64x1xi32>
    %80 = arith.addi %69, %79 : vector<64x1xi32>
    %81 = arith.select %78, %80, %69 : vector<64x1xi1>, vector<64x1xi32>
    %82 = vector.broadcast %7 : vector<1x32xf32> to vector<64x32xf32>
    %83 = arith.addf %45, %82 : vector<64x32xf32>
    %c0_i32_57 = arith.constant 0 : i32
    %84 = vector.broadcast %c0_i32_57 : i32 to vector<64x1xi32>
    %85 = arith.cmpi sgt, %81, %84 : vector<64x1xi32>
    %cst_58 = arith.constant 0.000000e+00 : f32
    %86 = vector.shape_cast %85 : vector<64x1xi1> to vector<64x1xi1>
    %87 = vector.broadcast %86 : vector<64x1xi1> to vector<64x32xi1>
    %88 = vector.broadcast %cst_58 : f32 to vector<64x32xf32>
    %89 = arith.select %87, %26, %88 : vector<64x32xi1>, vector<64x32xf32>
    %90 = arith.addf %83, %89 : vector<64x32xf32>
    %c7_i32 = arith.constant 7 : i32
    %91 = vector.broadcast %c7_i32 : i32 to vector<64x1xi32>
    %92 = arith.cmpi slt, %81, %91 : vector<64x1xi32>
    %cst_59 = arith.constant 0.000000e+00 : f32
    %93 = vector.shape_cast %92 : vector<64x1xi1> to vector<64x1xi1>
    %94 = vector.broadcast %93 : vector<64x1xi1> to vector<64x32xi1>
    %95 = vector.broadcast %cst_59 : f32 to vector<64x32xf32>
    %96 = arith.select %94, %64, %95 : vector<64x32xi1>, vector<64x32xf32>
    %97 = arith.addf %90, %96 : vector<64x32xf32>
    %c0_60 = arith.constant 0 : index
    %c0_61 = arith.constant 0 : index
    %c0_62 = arith.constant 0 : index
    %98 = vector.load %arg5[%c0_60, %c0_61, %c0_62] : memref<1x64x32xf32, #tpu.memory_space<vmem>>, vector<1x64x32xf32>
    %99 = vector.shape_cast %98 : vector<1x64x32xf32> to vector<64x32xf32>
    %100 = vector.shape_cast %97 : vector<64x32xf32> to vector<1x64x32xf32>
    tpu.vector_store %arg5[%c0_60, %c0_61, %c0_62], %100 {strides = array<i32>} : memref<1x64x32xf32, #tpu.memory_space<vmem>>, vector<1x64x32xf32>,
    return
  }
  func.func @transform_0(%arg0: i32, %arg1: i32) -> (i32, i32, i32) {
    %c0_i32 = arith.constant 0 : i32
    %c0_i32_0 = arith.constant 0 : i32
    return %arg0, %arg1, %c0_i32 : i32, i32, i32
  }
  func.func @transform_1(%arg0: i32, %arg1: i32) -> (i32, i32, i32) {
    %c0_i32 = arith.constant 0 : i32
    %c0_i32_0 = arith.constant 0 : i32
    %c0_i32_1 = arith.constant 0 : i32
    %c0_i32_2 = arith.constant 0 : i32
    return %c0_i32, %c0_i32_0, %c0_i32_1 : i32, i32, i32
  }
  func.func @transform_2(%arg0: i32, %arg1: i32) -> (i32, i32) {
    %c0_i32 = arith.constant 0 : i32
    %c0_i32_0 = arith.constant 0 : i32
    %c0_i32_1 = arith.constant 0 : i32
    return %c0_i32, %c0_i32_0 : i32, i32
  }
  func.func @transform_3(%arg0: i32, %arg1: i32) -> (i32, i32, i32) {
    %c0_i32 = arith.constant 0 : i32
    %c0_i32_0 = arith.constant 0 : i32
    return %arg0, %arg1, %c0_i32 : i32, i32, i32
  }
}

module attributes {stable_mosaic.version = 11 : i64} {
  func.func @kernel(%arg0: i32, %arg1: i32, %arg2: memref<1x16x16xf32, #tpu.memory_space<vmem>>, %arg3: memref<9x16x32xbf16, #tpu.memory_space<vmem>>, %arg4: memref<1x32xf32, #tpu.memory_space<vmem>>, %arg5: memref<1x16x32xf32, #tpu.memory_space<vmem>>, %arg6: memref<26x16xf32, #tpu.memory_space<vmem>>) attributes {dimension_semantics = [#tpu.dimension_semantics<parallel>, #tpu.dimension_semantics<parallel>], iteration_bounds = array<i64: 2, 1>, scalar_prefetch = 0 : i64, scratch_operands = 1 : i64, tpu.core_type = #tpu.core_type<tc>, window_params = [{transform_indices = @transform_0, window_bounds = array<i64: 1, 16, 16>}, {pipeline_mode = #tpu.pipeline_mode<synchronous>, transform_indices = @transform_1, window_bounds = array<i64: 9, 16, 32>}, {pipeline_mode = #tpu.pipeline_mode<synchronous>, transform_indices = @transform_2, window_bounds = array<i64: 1, 32>}, {transform_indices = @transform_3, window_bounds = array<i64: 1, 16, 32>}]} {
    %c0 = arith.constant 0 : index
    %c0_0 = arith.constant 0 : index
    %c0_1 = arith.constant 0 : index
    %0 = vector.load %arg2[%c0, %c0_0, %c0_1] : memref<1x16x16xf32, #tpu.memory_space<vmem>>, vector<1x16x16xf32>
    %1 = vector.shape_cast %0 : vector<1x16x16xf32> to vector<16x16xf32>
    %cst = arith.constant 0.000000e+00 : f32
    %2 = vector.broadcast %cst : f32 to vector<5x16xf32>
    %c0_2 = arith.constant 0 : index
    %c0_3 = arith.constant 0 : index
    %3 = vector.load %arg6[%c0_2, %c0_3] : memref<26x16xf32, #tpu.memory_space<vmem>>, vector<5x16xf32>
    tpu.vector_store %arg6[%c0_2, %c0_3], %2 {strides = array<i32>} : memref<26x16xf32, #tpu.memory_space<vmem>>, vector<5x16xf32>,
    %cst_4 = arith.constant 0.000000e+00 : f32
    %4 = vector.broadcast %cst_4 : f32 to vector<5x16xf32>
    %c21 = arith.constant 21 : index
    %c0_5 = arith.constant 0 : index
    %5 = vector.load %arg6[%c21, %c0_5] : memref<26x16xf32, #tpu.memory_space<vmem>>, vector<5x16xf32>
    tpu.vector_store %arg6[%c21, %c0_5], %4 {strides = array<i32>} : memref<26x16xf32, #tpu.memory_space<vmem>>, vector<5x16xf32>,
    %c5 = arith.constant 5 : index
    %c0_6 = arith.constant 0 : index
    %6 = vector.load %arg6[%c5, %c0_6] : memref<26x16xf32, #tpu.memory_space<vmem>>, vector<16x16xf32>
    tpu.vector_store %arg6[%c5, %c0_6], %1 {strides = array<i32>} : memref<26x16xf32, #tpu.memory_space<vmem>>, vector<16x16xf32>,
    %c0_7 = arith.constant 0 : index
    %c0_8 = arith.constant 0 : index
    %7 = vector.load %arg4[%c0_7, %c0_8] : memref<1x32xf32, #tpu.memory_space<vmem>>, vector<1x32xf32>
    %cst_9 = arith.constant 0.000000e+00 : f32
    %8 = vector.broadcast %cst_9 : f32 to vector<16x32xf32>
    %c0_10 = arith.constant 0 : index
    %c0_11 = arith.constant 0 : index
    %9 = vector.load %arg6[%c0_10, %c0_11] : memref<26x16xf32, #tpu.memory_space<vmem>>, vector<16x16xf32>
    %10 = arith.truncf %9 : vector<16x16xf32> to vector<16x16xbf16>
    %c0_12 = arith.constant 0 : index
    %c0_13 = arith.constant 0 : index
    %c0_14 = arith.constant 0 : index
    %11 = vector.load %arg3[%c0_12, %c0_13, %c0_14] : memref<9x16x32xbf16, #tpu.memory_space<vmem>>, vector<1x16x32xbf16>
    %12 = vector.shape_cast %11 : vector<1x16x32xbf16> to vector<16x32xbf16>
    %cst_15 = arith.constant dense<0.000000e+00> : vector<16x32xf32>
    %13 = tpu.matmul %10, %12, %cst_15 {dimension_numbers = #tpu.dot_dimension_numbers<[1], [0], [0], [1], [0, 0, 1, 1], [], []>} : vector<16x16xbf16>, vector<16x32xbf16>, vector<16x32xf32> -> vector<16x32xf32>
    %14 = arith.addf %8, %13 : vector<16x32xf32>
    %c4 = arith.constant 4 : index
    %c0_16 = arith.constant 0 : index
    %15 = vector.load %arg6[%c4, %c0_16] : memref<26x16xf32, #tpu.memory_space<vmem>>, vector<16x16xf32>
    %16 = arith.truncf %15 : vector<16x16xf32> to vector<16x16xbf16>
    %c3 = arith.constant 3 : index
    %c0_17 = arith.constant 0 : index
    %c0_18 = arith.constant 0 : index
    %17 = vector.load %arg3[%c3, %c0_17, %c0_18] : memref<9x16x32xbf16, #tpu.memory_space<vmem>>, vector<1x16x32xbf16>
    %18 = vector.shape_cast %17 : vector<1x16x32xbf16> to vector<16x32xbf16>
    %cst_19 = arith.constant dense<0.000000e+00> : vector<16x32xf32>
    %19 = tpu.matmul %16, %18, %cst_19 {dimension_numbers = #tpu.dot_dimension_numbers<[1], [0], [0], [1], [0, 0, 1, 1], [], []>} : vector<16x16xbf16>, vector<16x32xbf16>, vector<16x32xf32> -> vector<16x32xf32>
    %20 = arith.addf %14, %19 : vector<16x32xf32>
    %c8 = arith.constant 8 : index
    %c0_20 = arith.constant 0 : index
    %21 = vector.load %arg6[%c8, %c0_20] : memref<26x16xf32, #tpu.memory_space<vmem>>, vector<16x16xf32>
    %22 = arith.truncf %21 : vector<16x16xf32> to vector<16x16xbf16>
    %c6 = arith.constant 6 : index
    %c0_21 = arith.constant 0 : index
    %c0_22 = arith.constant 0 : index
    %23 = vector.load %arg3[%c6, %c0_21, %c0_22] : memref<9x16x32xbf16, #tpu.memory_space<vmem>>, vector<1x16x32xbf16>
    %24 = vector.shape_cast %23 : vector<1x16x32xbf16> to vector<16x32xbf16>
    %cst_23 = arith.constant dense<0.000000e+00> : vector<16x32xf32>
    %25 = tpu.matmul %22, %24, %cst_23 {dimension_numbers = #tpu.dot_dimension_numbers<[1], [0], [0], [1], [0, 0, 1, 1], [], []>} : vector<16x16xbf16>, vector<16x32xbf16>, vector<16x32xf32> -> vector<16x32xf32>
    %26 = arith.addf %20, %25 : vector<16x32xf32>
    %cst_24 = arith.constant 0.000000e+00 : f32
    %27 = vector.broadcast %cst_24 : f32 to vector<16x32xf32>
    %c1 = arith.constant 1 : index
    %c0_25 = arith.constant 0 : index
    %28 = vector.load %arg6[%c1, %c0_25] : memref<26x16xf32, #tpu.memory_space<vmem>>, vector<16x16xf32>
    %29 = arith.truncf %28 : vector<16x16xf32> to vector<16x16xbf16>
    %c1_26 = arith.constant 1 : index
    %c0_27 = arith.constant 0 : index
    %c0_28 = arith.constant 0 : index
    %30 = vector.load %arg3[%c1_26, %c0_27, %c0_28] : memref<9x16x32xbf16, #tpu.memory_space<vmem>>, vector<1x16x32xbf16>
    %31 = vector.shape_cast %30 : vector<1x16x32xbf16> to vector<16x32xbf16>
    %cst_29 = arith.constant dense<0.000000e+00> : vector<16x32xf32>
    %32 = tpu.matmul %29, %31, %cst_29 {dimension_numbers = #tpu.dot_dimension_numbers<[1], [0], [0], [1], [0, 0, 1, 1], [], []>} : vector<16x16xbf16>, vector<16x32xbf16>, vector<16x32xf32> -> vector<16x32xf32>
    %33 = arith.addf %27, %32 : vector<16x32xf32>
    %c5_30 = arith.constant 5 : index
    %c0_31 = arith.constant 0 : index
    %34 = vector.load %arg6[%c5_30, %c0_31] : memref<26x16xf32, #tpu.memory_space<vmem>>, vector<16x16xf32>
    %35 = arith.truncf %34 : vector<16x16xf32> to vector<16x16xbf16>
    %c4_32 = arith.constant 4 : index
    %c0_33 = arith.constant 0 : index
    %c0_34 = arith.constant 0 : index
    %36 = vector.load %arg3[%c4_32, %c0_33, %c0_34] : memref<9x16x32xbf16, #tpu.memory_space<vmem>>, vector<1x16x32xbf16>
    %37 = vector.shape_cast %36 : vector<1x16x32xbf16> to vector<16x32xbf16>
    %cst_35 = arith.constant dense<0.000000e+00> : vector<16x32xf32>
    %38 = tpu.matmul %35, %37, %cst_35 {dimension_numbers = #tpu.dot_dimension_numbers<[1], [0], [0], [1], [0, 0, 1, 1], [], []>} : vector<16x16xbf16>, vector<16x32xbf16>, vector<16x32xf32> -> vector<16x32xf32>
    %39 = arith.addf %33, %38 : vector<16x32xf32>
    %c9 = arith.constant 9 : index
    %c0_36 = arith.constant 0 : index
    %40 = vector.load %arg6[%c9, %c0_36] : memref<26x16xf32, #tpu.memory_space<vmem>>, vector<16x16xf32>
    %41 = arith.truncf %40 : vector<16x16xf32> to vector<16x16xbf16>
    %c7 = arith.constant 7 : index
    %c0_37 = arith.constant 0 : index
    %c0_38 = arith.constant 0 : index
    %42 = vector.load %arg3[%c7, %c0_37, %c0_38] : memref<9x16x32xbf16, #tpu.memory_space<vmem>>, vector<1x16x32xbf16>
    %43 = vector.shape_cast %42 : vector<1x16x32xbf16> to vector<16x32xbf16>
    %cst_39 = arith.constant dense<0.000000e+00> : vector<16x32xf32>
    %44 = tpu.matmul %41, %43, %cst_39 {dimension_numbers = #tpu.dot_dimension_numbers<[1], [0], [0], [1], [0, 0, 1, 1], [], []>} : vector<16x16xbf16>, vector<16x32xbf16>, vector<16x32xf32> -> vector<16x32xf32>
    %45 = arith.addf %39, %44 : vector<16x32xf32>
    %cst_40 = arith.constant 0.000000e+00 : f32
    %46 = vector.broadcast %cst_40 : f32 to vector<16x32xf32>
    %c2 = arith.constant 2 : index
    %c0_41 = arith.constant 0 : index
    %47 = vector.load %arg6[%c2, %c0_41] : memref<26x16xf32, #tpu.memory_space<vmem>>, vector<16x16xf32>
    %48 = arith.truncf %47 : vector<16x16xf32> to vector<16x16xbf16>
    %c2_42 = arith.constant 2 : index
    %c0_43 = arith.constant 0 : index
    %c0_44 = arith.constant 0 : index
    %49 = vector.load %arg3[%c2_42, %c0_43, %c0_44] : memref<9x16x32xbf16, #tpu.memory_space<vmem>>, vector<1x16x32xbf16>
    %50 = vector.shape_cast %49 : vector<1x16x32xbf16> to vector<16x32xbf16>
    %cst_45 = arith.constant dense<0.000000e+00> : vector<16x32xf32>
    %51 = tpu.matmul %48, %50, %cst_45 {dimension_numbers = #tpu.dot_dimension_numbers<[1], [0], [0], [1], [0, 0, 1, 1], [], []>} : vector<16x16xbf16>, vector<16x32xbf16>, vector<16x32xf32> -> vector<16x32xf32>
    %52 = arith.addf %46, %51 : vector<16x32xf32>
    %c6_46 = arith.constant 6 : index
    %c0_47 = arith.constant 0 : index
    %53 = vector.load %arg6[%c6_46, %c0_47] : memref<26x16xf32, #tpu.memory_space<vmem>>, vector<16x16xf32>
    %54 = arith.truncf %53 : vector<16x16xf32> to vector<16x16xbf16>
    %c5_48 = arith.constant 5 : index
    %c0_49 = arith.constant 0 : index
    %c0_50 = arith.constant 0 : index
    %55 = vector.load %arg3[%c5_48, %c0_49, %c0_50] : memref<9x16x32xbf16, #tpu.memory_space<vmem>>, vector<1x16x32xbf16>
    %56 = vector.shape_cast %55 : vector<1x16x32xbf16> to vector<16x32xbf16>
    %cst_51 = arith.constant dense<0.000000e+00> : vector<16x32xf32>
    %57 = tpu.matmul %54, %56, %cst_51 {dimension_numbers = #tpu.dot_dimension_numbers<[1], [0], [0], [1], [0, 0, 1, 1], [], []>} : vector<16x16xbf16>, vector<16x32xbf16>, vector<16x32xf32> -> vector<16x32xf32>
    %58 = arith.addf %52, %57 : vector<16x32xf32>
    %c10 = arith.constant 10 : index
    %c0_52 = arith.constant 0 : index
    %59 = vector.load %arg6[%c10, %c0_52] : memref<26x16xf32, #tpu.memory_space<vmem>>, vector<16x16xf32>
    %60 = arith.truncf %59 : vector<16x16xf32> to vector<16x16xbf16>
    %c8_53 = arith.constant 8 : index
    %c0_54 = arith.constant 0 : index
    %c0_55 = arith.constant 0 : index
    %61 = vector.load %arg3[%c8_53, %c0_54, %c0_55] : memref<9x16x32xbf16, #tpu.memory_space<vmem>>, vector<1x16x32xbf16>
    %62 = vector.shape_cast %61 : vector<1x16x32xbf16> to vector<16x32xbf16>
    %cst_56 = arith.constant dense<0.000000e+00> : vector<16x32xf32>
    %63 = tpu.matmul %60, %62, %cst_56 {dimension_numbers = #tpu.dot_dimension_numbers<[1], [0], [0], [1], [0, 0, 1, 1], [], []>} : vector<16x16xbf16>, vector<16x32xbf16>, vector<16x32xf32> -> vector<16x32xf32>
    %64 = arith.addf %58, %63 : vector<16x32xf32>
    %65 = tpu.iota {dimensions = array<i32: 0>} : vector<16x1xi32>
    %c4_i32 = arith.constant 4 : i32
    %c0_i32 = arith.constant 0 : i32
    %66 = arith.cmpi eq, %c4_i32, %c0_i32 : i32
    %c1_i32 = arith.constant 1 : i32
    %67 = arith.select %66, %c1_i32, %c4_i32 : i32
    %68 = vector.broadcast %67 : i32 to vector<16x1xi32>
    %69 = arith.remsi %65, %68 : vector<16x1xi32>
    %c0_i32_57 = arith.constant 0 : i32
    %70 = vector.broadcast %c0_i32_57 : i32 to vector<16x1xi32>
    %71 = arith.cmpi ne, %69, %70 : vector<16x1xi32>
    %c0_i32_58 = arith.constant 0 : i32
    %72 = vector.broadcast %c0_i32_58 : i32 to vector<16x1xi32>
    %73 = arith.cmpi slt, %69, %72 : vector<16x1xi32>
    %c0_i32_59 = arith.constant 0 : i32
    %74 = arith.cmpi slt, %67, %c0_i32_59 : i32
    %75 = vector.broadcast %74 : i1 to vector<16x1xi1>
    %76 = vector.broadcast %75 : vector<16x1xi1> to vector<16x1xi1>
    %77 = arith.xori %73, %76 : vector<16x1xi1>
    %78 = arith.andi %77, %71 : vector<16x1xi1>
    %79 = vector.broadcast %67 : i32 to vector<16x1xi32>
    %80 = arith.addi %69, %79 : vector<16x1xi32>
    %81 = arith.select %78, %80, %69 : vector<16x1xi1>, vector<16x1xi32>
    %82 = vector.broadcast %7 : vector<1x32xf32> to vector<16x32xf32>
    %83 = arith.addf %45, %82 : vector<16x32xf32>
    %c0_i32_60 = arith.constant 0 : i32
    %84 = vector.broadcast %c0_i32_60 : i32 to vector<16x1xi32>
    %85 = arith.cmpi sgt, %81, %84 : vector<16x1xi32>
    %cst_61 = arith.constant 0.000000e+00 : f32
    %86 = vector.shape_cast %85 : vector<16x1xi1> to vector<16x1xi1>
    %87 = vector.broadcast %86 : vector<16x1xi1> to vector<16x32xi1>
    %88 = vector.broadcast %cst_61 : f32 to vector<16x32xf32>
    %89 = arith.select %87, %26, %88 : vector<16x32xi1>, vector<16x32xf32>
    %90 = arith.addf %83, %89 : vector<16x32xf32>
    %c3_i32 = arith.constant 3 : i32
    %91 = vector.broadcast %c3_i32 : i32 to vector<16x1xi32>
    %92 = arith.cmpi slt, %81, %91 : vector<16x1xi32>
    %cst_62 = arith.constant 0.000000e+00 : f32
    %93 = vector.shape_cast %92 : vector<16x1xi1> to vector<16x1xi1>
    %94 = vector.broadcast %93 : vector<16x1xi1> to vector<16x32xi1>
    %95 = vector.broadcast %cst_62 : f32 to vector<16x32xf32>
    %96 = arith.select %94, %64, %95 : vector<16x32xi1>, vector<16x32xf32>
    %97 = arith.addf %90, %96 : vector<16x32xf32>
    %c0_63 = arith.constant 0 : index
    %c0_64 = arith.constant 0 : index
    %c0_65 = arith.constant 0 : index
    %98 = vector.load %arg5[%c0_63, %c0_64, %c0_65] : memref<1x16x32xf32, #tpu.memory_space<vmem>>, vector<1x16x32xf32>
    %99 = vector.shape_cast %98 : vector<1x16x32xf32> to vector<16x32xf32>
    %100 = vector.shape_cast %97 : vector<16x32xf32> to vector<1x16x32xf32>
    tpu.vector_store %arg5[%c0_63, %c0_64, %c0_65], %100 {strides = array<i32>} : memref<1x16x32xf32, #tpu.memory_space<vmem>>, vector<1x16x32xf32>,
    return
  }
  func.func @transform_0(%arg0: i32, %arg1: i32) -> (i32, i32, i32) {
    %c0_i32 = arith.constant 0 : i32
    %c0_i32_0 = arith.constant 0 : i32
    return %arg0, %arg1, %c0_i32 : i32, i32, i32
  }
  func.func @transform_1(%arg0: i32, %arg1: i32) -> (i32, i32, i32) {
    %c0_i32 = arith.constant 0 : i32
    %c0_i32_0 = arith.constant 0 : i32
    %c0_i32_1 = arith.constant 0 : i32
    %c0_i32_2 = arith.constant 0 : i32
    return %c0_i32, %c0_i32_0, %c0_i32_1 : i32, i32, i32
  }
  func.func @transform_2(%arg0: i32, %arg1: i32) -> (i32, i32) {
    %c0_i32 = arith.constant 0 : i32
    %c0_i32_0 = arith.constant 0 : i32
    %c0_i32_1 = arith.constant 0 : i32
    return %c0_i32, %c0_i32_0 : i32, i32
  }
  func.func @transform_3(%arg0: i32, %arg1: i32) -> (i32, i32, i32) {
    %c0_i32 = arith.constant 0 : i32
    %c0_i32_0 = arith.constant 0 : i32
    return %arg0, %arg1, %c0_i32 : i32, i32, i32
  }
}

module attributes {stable_mosaic.version = 11 : i64} {
  func.func @kernel(%arg0: i32, %arg1: i32, %arg2: memref<1x4x32xf32, #tpu.memory_space<vmem>>, %arg3: memref<9x32x32xbf16, #tpu.memory_space<vmem>>, %arg4: memref<1x32xf32, #tpu.memory_space<vmem>>, %arg5: memref<1x4x32xf32, #tpu.memory_space<vmem>>, %arg6: memref<10x32xf32, #tpu.memory_space<vmem>>) attributes {dimension_semantics = [#tpu.dimension_semantics<parallel>, #tpu.dimension_semantics<parallel>], iteration_bounds = array<i64: 2, 1>, scalar_prefetch = 0 : i64, scratch_operands = 1 : i64, tpu.core_type = #tpu.core_type<tc>, window_params = [{transform_indices = @transform_0, window_bounds = array<i64: 1, 4, 32>}, {pipeline_mode = #tpu.pipeline_mode<synchronous>, transform_indices = @transform_1, window_bounds = array<i64: 9, 32, 32>}, {pipeline_mode = #tpu.pipeline_mode<synchronous>, transform_indices = @transform_2, window_bounds = array<i64: 1, 32>}, {transform_indices = @transform_3, window_bounds = array<i64: 1, 4, 32>}]} {
    %c0 = arith.constant 0 : index
    %c0_0 = arith.constant 0 : index
    %c0_1 = arith.constant 0 : index
    %0 = vector.load %arg2[%c0, %c0_0, %c0_1] : memref<1x4x32xf32, #tpu.memory_space<vmem>>, vector<1x4x32xf32>
    %1 = vector.shape_cast %0 : vector<1x4x32xf32> to vector<4x32xf32>
    %cst = arith.constant 0.000000e+00 : f32
    %2 = vector.broadcast %cst : f32 to vector<4x32xf32>
    %3 = arith.maximumf %1, %2 : vector<4x32xf32>
    %cst_2 = arith.constant 0.000000e+00 : f32
    %4 = vector.broadcast %cst_2 : f32 to vector<3x32xf32>
    %c0_3 = arith.constant 0 : index
    %c0_4 = arith.constant 0 : index
    %5 = vector.load %arg6[%c0_3, %c0_4] : memref<10x32xf32, #tpu.memory_space<vmem>>, vector<3x32xf32>
    tpu.vector_store %arg6[%c0_3, %c0_4], %4 {strides = array<i32>} : memref<10x32xf32, #tpu.memory_space<vmem>>, vector<3x32xf32>,
    %cst_5 = arith.constant 0.000000e+00 : f32
    %6 = vector.broadcast %cst_5 : f32 to vector<3x32xf32>
    %c7 = arith.constant 7 : index
    %c0_6 = arith.constant 0 : index
    %7 = vector.load %arg6[%c7, %c0_6] : memref<10x32xf32, #tpu.memory_space<vmem>>, vector<3x32xf32>
    tpu.vector_store %arg6[%c7, %c0_6], %6 {strides = array<i32>} : memref<10x32xf32, #tpu.memory_space<vmem>>, vector<3x32xf32>,
    %c3 = arith.constant 3 : index
    %c0_7 = arith.constant 0 : index
    %8 = vector.load %arg6[%c3, %c0_7] : memref<10x32xf32, #tpu.memory_space<vmem>>, vector<4x32xf32>
    tpu.vector_store %arg6[%c3, %c0_7], %3 {strides = array<i32>} : memref<10x32xf32, #tpu.memory_space<vmem>>, vector<4x32xf32>,
    %c0_8 = arith.constant 0 : index
    %c0_9 = arith.constant 0 : index
    %9 = vector.load %arg4[%c0_8, %c0_9] : memref<1x32xf32, #tpu.memory_space<vmem>>, vector<1x32xf32>
    %cst_10 = arith.constant 0.000000e+00 : f32
    %10 = vector.broadcast %cst_10 : f32 to vector<4x32xf32>
    %c0_11 = arith.constant 0 : index
    %c0_12 = arith.constant 0 : index
    %11 = vector.load %arg6[%c0_11, %c0_12] : memref<10x32xf32, #tpu.memory_space<vmem>>, vector<4x32xf32>
    %12 = arith.truncf %11 : vector<4x32xf32> to vector<4x32xbf16>
    %c0_13 = arith.constant 0 : index
    %c0_14 = arith.constant 0 : index
    %c0_15 = arith.constant 0 : index
    %13 = vector.load %arg3[%c0_13, %c0_14, %c0_15] : memref<9x32x32xbf16, #tpu.memory_space<vmem>>, vector<1x32x32xbf16>
    %14 = vector.shape_cast %13 : vector<1x32x32xbf16> to vector<32x32xbf16>
    %cst_16 = arith.constant dense<0.000000e+00> : vector<4x32xf32>
    %15 = tpu.matmul %12, %14, %cst_16 {dimension_numbers = #tpu.dot_dimension_numbers<[1], [0], [0], [1], [0, 0, 1, 1], [], []>} : vector<4x32xbf16>, vector<32x32xbf16>, vector<4x32xf32> -> vector<4x32xf32>
    %16 = arith.addf %10, %15 : vector<4x32xf32>
    %c2 = arith.constant 2 : index
    %c0_17 = arith.constant 0 : index
    %17 = vector.load %arg6[%c2, %c0_17] : memref<10x32xf32, #tpu.memory_space<vmem>>, vector<4x32xf32>
    %18 = arith.truncf %17 : vector<4x32xf32> to vector<4x32xbf16>
    %c3_18 = arith.constant 3 : index
    %c0_19 = arith.constant 0 : index
    %c0_20 = arith.constant 0 : index
    %19 = vector.load %arg3[%c3_18, %c0_19, %c0_20] : memref<9x32x32xbf16, #tpu.memory_space<vmem>>, vector<1x32x32xbf16>
    %20 = vector.shape_cast %19 : vector<1x32x32xbf16> to vector<32x32xbf16>
    %cst_21 = arith.constant dense<0.000000e+00> : vector<4x32xf32>
    %21 = tpu.matmul %18, %20, %cst_21 {dimension_numbers = #tpu.dot_dimension_numbers<[1], [0], [0], [1], [0, 0, 1, 1], [], []>} : vector<4x32xbf16>, vector<32x32xbf16>, vector<4x32xf32> -> vector<4x32xf32>
    %22 = arith.addf %16, %21 : vector<4x32xf32>
    %c4 = arith.constant 4 : index
    %c0_22 = arith.constant 0 : index
    %23 = vector.load %arg6[%c4, %c0_22] : memref<10x32xf32, #tpu.memory_space<vmem>>, vector<4x32xf32>
    %24 = arith.truncf %23 : vector<4x32xf32> to vector<4x32xbf16>
    %c6 = arith.constant 6 : index
    %c0_23 = arith.constant 0 : index
    %c0_24 = arith.constant 0 : index
    %25 = vector.load %arg3[%c6, %c0_23, %c0_24] : memref<9x32x32xbf16, #tpu.memory_space<vmem>>, vector<1x32x32xbf16>
    %26 = vector.shape_cast %25 : vector<1x32x32xbf16> to vector<32x32xbf16>
    %cst_25 = arith.constant dense<0.000000e+00> : vector<4x32xf32>
    %27 = tpu.matmul %24, %26, %cst_25 {dimension_numbers = #tpu.dot_dimension_numbers<[1], [0], [0], [1], [0, 0, 1, 1], [], []>} : vector<4x32xbf16>, vector<32x32xbf16>, vector<4x32xf32> -> vector<4x32xf32>
    %28 = arith.addf %22, %27 : vector<4x32xf32>
    %cst_26 = arith.constant 0.000000e+00 : f32
    %29 = vector.broadcast %cst_26 : f32 to vector<4x32xf32>
    %c1 = arith.constant 1 : index
    %c0_27 = arith.constant 0 : index
    %30 = vector.load %arg6[%c1, %c0_27] : memref<10x32xf32, #tpu.memory_space<vmem>>, vector<4x32xf32>
    %31 = arith.truncf %30 : vector<4x32xf32> to vector<4x32xbf16>
    %c1_28 = arith.constant 1 : index
    %c0_29 = arith.constant 0 : index
    %c0_30 = arith.constant 0 : index
    %32 = vector.load %arg3[%c1_28, %c0_29, %c0_30] : memref<9x32x32xbf16, #tpu.memory_space<vmem>>, vector<1x32x32xbf16>
    %33 = vector.shape_cast %32 : vector<1x32x32xbf16> to vector<32x32xbf16>
    %cst_31 = arith.constant dense<0.000000e+00> : vector<4x32xf32>
    %34 = tpu.matmul %31, %33, %cst_31 {dimension_numbers = #tpu.dot_dimension_numbers<[1], [0], [0], [1], [0, 0, 1, 1], [], []>} : vector<4x32xbf16>, vector<32x32xbf16>, vector<4x32xf32> -> vector<4x32xf32>
    %35 = arith.addf %29, %34 : vector<4x32xf32>
    %c3_32 = arith.constant 3 : index
    %c0_33 = arith.constant 0 : index
    %36 = vector.load %arg6[%c3_32, %c0_33] : memref<10x32xf32, #tpu.memory_space<vmem>>, vector<4x32xf32>
    %37 = arith.truncf %36 : vector<4x32xf32> to vector<4x32xbf16>
    %c4_34 = arith.constant 4 : index
    %c0_35 = arith.constant 0 : index
    %c0_36 = arith.constant 0 : index
    %38 = vector.load %arg3[%c4_34, %c0_35, %c0_36] : memref<9x32x32xbf16, #tpu.memory_space<vmem>>, vector<1x32x32xbf16>
    %39 = vector.shape_cast %38 : vector<1x32x32xbf16> to vector<32x32xbf16>
    %cst_37 = arith.constant dense<0.000000e+00> : vector<4x32xf32>
    %40 = tpu.matmul %37, %39, %cst_37 {dimension_numbers = #tpu.dot_dimension_numbers<[1], [0], [0], [1], [0, 0, 1, 1], [], []>} : vector<4x32xbf16>, vector<32x32xbf16>, vector<4x32xf32> -> vector<4x32xf32>
    %41 = arith.addf %35, %40 : vector<4x32xf32>
    %c5 = arith.constant 5 : index
    %c0_38 = arith.constant 0 : index
    %42 = vector.load %arg6[%c5, %c0_38] : memref<10x32xf32, #tpu.memory_space<vmem>>, vector<4x32xf32>
    %43 = arith.truncf %42 : vector<4x32xf32> to vector<4x32xbf16>
    %c7_39 = arith.constant 7 : index
    %c0_40 = arith.constant 0 : index
    %c0_41 = arith.constant 0 : index
    %44 = vector.load %arg3[%c7_39, %c0_40, %c0_41] : memref<9x32x32xbf16, #tpu.memory_space<vmem>>, vector<1x32x32xbf16>
    %45 = vector.shape_cast %44 : vector<1x32x32xbf16> to vector<32x32xbf16>
    %cst_42 = arith.constant dense<0.000000e+00> : vector<4x32xf32>
    %46 = tpu.matmul %43, %45, %cst_42 {dimension_numbers = #tpu.dot_dimension_numbers<[1], [0], [0], [1], [0, 0, 1, 1], [], []>} : vector<4x32xbf16>, vector<32x32xbf16>, vector<4x32xf32> -> vector<4x32xf32>
    %47 = arith.addf %41, %46 : vector<4x32xf32>
    %cst_43 = arith.constant 0.000000e+00 : f32
    %48 = vector.broadcast %cst_43 : f32 to vector<4x32xf32>
    %c2_44 = arith.constant 2 : index
    %c0_45 = arith.constant 0 : index
    %49 = vector.load %arg6[%c2_44, %c0_45] : memref<10x32xf32, #tpu.memory_space<vmem>>, vector<4x32xf32>
    %50 = arith.truncf %49 : vector<4x32xf32> to vector<4x32xbf16>
    %c2_46 = arith.constant 2 : index
    %c0_47 = arith.constant 0 : index
    %c0_48 = arith.constant 0 : index
    %51 = vector.load %arg3[%c2_46, %c0_47, %c0_48] : memref<9x32x32xbf16, #tpu.memory_space<vmem>>, vector<1x32x32xbf16>
    %52 = vector.shape_cast %51 : vector<1x32x32xbf16> to vector<32x32xbf16>
    %cst_49 = arith.constant dense<0.000000e+00> : vector<4x32xf32>
    %53 = tpu.matmul %50, %52, %cst_49 {dimension_numbers = #tpu.dot_dimension_numbers<[1], [0], [0], [1], [0, 0, 1, 1], [], []>} : vector<4x32xbf16>, vector<32x32xbf16>, vector<4x32xf32> -> vector<4x32xf32>
    %54 = arith.addf %48, %53 : vector<4x32xf32>
    %c4_50 = arith.constant 4 : index
    %c0_51 = arith.constant 0 : index
    %55 = vector.load %arg6[%c4_50, %c0_51] : memref<10x32xf32, #tpu.memory_space<vmem>>, vector<4x32xf32>
    %56 = arith.truncf %55 : vector<4x32xf32> to vector<4x32xbf16>
    %c5_52 = arith.constant 5 : index
    %c0_53 = arith.constant 0 : index
    %c0_54 = arith.constant 0 : index
    %57 = vector.load %arg3[%c5_52, %c0_53, %c0_54] : memref<9x32x32xbf16, #tpu.memory_space<vmem>>, vector<1x32x32xbf16>
    %58 = vector.shape_cast %57 : vector<1x32x32xbf16> to vector<32x32xbf16>
    %cst_55 = arith.constant dense<0.000000e+00> : vector<4x32xf32>
    %59 = tpu.matmul %56, %58, %cst_55 {dimension_numbers = #tpu.dot_dimension_numbers<[1], [0], [0], [1], [0, 0, 1, 1], [], []>} : vector<4x32xbf16>, vector<32x32xbf16>, vector<4x32xf32> -> vector<4x32xf32>
    %60 = arith.addf %54, %59 : vector<4x32xf32>
    %c6_56 = arith.constant 6 : index
    %c0_57 = arith.constant 0 : index
    %61 = vector.load %arg6[%c6_56, %c0_57] : memref<10x32xf32, #tpu.memory_space<vmem>>, vector<4x32xf32>
    %62 = arith.truncf %61 : vector<4x32xf32> to vector<4x32xbf16>
    %c8 = arith.constant 8 : index
    %c0_58 = arith.constant 0 : index
    %c0_59 = arith.constant 0 : index
    %63 = vector.load %arg3[%c8, %c0_58, %c0_59] : memref<9x32x32xbf16, #tpu.memory_space<vmem>>, vector<1x32x32xbf16>
    %64 = vector.shape_cast %63 : vector<1x32x32xbf16> to vector<32x32xbf16>
    %cst_60 = arith.constant dense<0.000000e+00> : vector<4x32xf32>
    %65 = tpu.matmul %62, %64, %cst_60 {dimension_numbers = #tpu.dot_dimension_numbers<[1], [0], [0], [1], [0, 0, 1, 1], [], []>} : vector<4x32xbf16>, vector<32x32xbf16>, vector<4x32xf32> -> vector<4x32xf32>
    %66 = arith.addf %60, %65 : vector<4x32xf32>
    %67 = tpu.iota {dimensions = array<i32: 0>} : vector<4x1xi32>
    %c2_i32 = arith.constant 2 : i32
    %c0_i32 = arith.constant 0 : i32
    %68 = arith.cmpi eq, %c2_i32, %c0_i32 : i32
    %c1_i32 = arith.constant 1 : i32
    %69 = arith.select %68, %c1_i32, %c2_i32 : i32
    %70 = vector.broadcast %69 : i32 to vector<4x1xi32>
    %71 = arith.remsi %67, %70 : vector<4x1xi32>
    %c0_i32_61 = arith.constant 0 : i32
    %72 = vector.broadcast %c0_i32_61 : i32 to vector<4x1xi32>
    %73 = arith.cmpi ne, %71, %72 : vector<4x1xi32>
    %c0_i32_62 = arith.constant 0 : i32
    %74 = vector.broadcast %c0_i32_62 : i32 to vector<4x1xi32>
    %75 = arith.cmpi slt, %71, %74 : vector<4x1xi32>
    %c0_i32_63 = arith.constant 0 : i32
    %76 = arith.cmpi slt, %69, %c0_i32_63 : i32
    %77 = vector.broadcast %76 : i1 to vector<4x1xi1>
    %78 = vector.broadcast %77 : vector<4x1xi1> to vector<4x1xi1>
    %79 = arith.xori %75, %78 : vector<4x1xi1>
    %80 = arith.andi %79, %73 : vector<4x1xi1>
    %81 = vector.broadcast %69 : i32 to vector<4x1xi32>
    %82 = arith.addi %71, %81 : vector<4x1xi32>
    %83 = arith.select %80, %82, %71 : vector<4x1xi1>, vector<4x1xi32>
    %84 = vector.broadcast %9 : vector<1x32xf32> to vector<4x32xf32>
    %85 = arith.addf %47, %84 : vector<4x32xf32>
    %c0_i32_64 = arith.constant 0 : i32
    %86 = vector.broadcast %c0_i32_64 : i32 to vector<4x1xi32>
    %87 = arith.cmpi sgt, %83, %86 : vector<4x1xi32>
    %cst_65 = arith.constant 0.000000e+00 : f32
    %88 = vector.shape_cast %87 : vector<4x1xi1> to vector<4x1xi1>
    %89 = vector.broadcast %88 : vector<4x1xi1> to vector<4x32xi1>
    %90 = vector.broadcast %cst_65 : f32 to vector<4x32xf32>
    %91 = arith.select %89, %28, %90 : vector<4x32xi1>, vector<4x32xf32>
    %92 = arith.addf %85, %91 : vector<4x32xf32>
    %c1_i32_66 = arith.constant 1 : i32
    %93 = vector.broadcast %c1_i32_66 : i32 to vector<4x1xi32>
    %94 = arith.cmpi slt, %83, %93 : vector<4x1xi32>
    %cst_67 = arith.constant 0.000000e+00 : f32
    %95 = vector.shape_cast %94 : vector<4x1xi1> to vector<4x1xi1>
    %96 = vector.broadcast %95 : vector<4x1xi1> to vector<4x32xi1>
    %97 = vector.broadcast %cst_67 : f32 to vector<4x32xf32>
    %98 = arith.select %96, %66, %97 : vector<4x32xi1>, vector<4x32xf32>
    %99 = arith.addf %92, %98 : vector<4x32xf32>
    %c0_68 = arith.constant 0 : index
    %c0_69 = arith.constant 0 : index
    %c0_70 = arith.constant 0 : index
    %100 = vector.load %arg5[%c0_68, %c0_69, %c0_70] : memref<1x4x32xf32, #tpu.memory_space<vmem>>, vector<1x4x32xf32>
    %101 = vector.shape_cast %100 : vector<1x4x32xf32> to vector<4x32xf32>
    %102 = vector.shape_cast %99 : vector<4x32xf32> to vector<1x4x32xf32>
    tpu.vector_store %arg5[%c0_68, %c0_69, %c0_70], %102 {strides = array<i32>} : memref<1x4x32xf32, #tpu.memory_space<vmem>>, vector<1x4x32xf32>,
    return
  }
  func.func @transform_0(%arg0: i32, %arg1: i32) -> (i32, i32, i32) {
    %c0_i32 = arith.constant 0 : i32
    %c0_i32_0 = arith.constant 0 : i32
    return %arg0, %arg1, %c0_i32 : i32, i32, i32
  }
  func.func @transform_1(%arg0: i32, %arg1: i32) -> (i32, i32, i32) {
    %c0_i32 = arith.constant 0 : i32
    %c0_i32_0 = arith.constant 0 : i32
    %c0_i32_1 = arith.constant 0 : i32
    %c0_i32_2 = arith.constant 0 : i32
    return %c0_i32, %c0_i32_0, %c0_i32_1 : i32, i32, i32
  }
  func.func @transform_2(%arg0: i32, %arg1: i32) -> (i32, i32) {
    %c0_i32 = arith.constant 0 : i32
    %c0_i32_0 = arith.constant 0 : i32
    %c0_i32_1 = arith.constant 0 : i32
    return %c0_i32, %c0_i32_0 : i32, i32
  }
  func.func @transform_3(%arg0: i32, %arg1: i32) -> (i32, i32, i32) {
    %c0_i32 = arith.constant 0 : i32
    %c0_i32_0 = arith.constant 0 : i32
    return %arg0, %arg1, %c0_i32 : i32, i32, i32
  }
}

module attributes {stable_mosaic.version = 11 : i64} {
  func.func @kernel(%arg0: i32, %arg1: i32, %arg2: memref<1x16x32xf32, #tpu.memory_space<vmem>>, %arg3: memref<9x32x32xbf16, #tpu.memory_space<vmem>>, %arg4: memref<1x32xf32, #tpu.memory_space<vmem>>, %arg5: memref<1x16x32xf32, #tpu.memory_space<vmem>>, %arg6: memref<26x32xf32, #tpu.memory_space<vmem>>) attributes {dimension_semantics = [#tpu.dimension_semantics<parallel>, #tpu.dimension_semantics<parallel>], iteration_bounds = array<i64: 2, 1>, scalar_prefetch = 0 : i64, scratch_operands = 1 : i64, tpu.core_type = #tpu.core_type<tc>, window_params = [{transform_indices = @transform_0, window_bounds = array<i64: 1, 16, 32>}, {pipeline_mode = #tpu.pipeline_mode<synchronous>, transform_indices = @transform_1, window_bounds = array<i64: 9, 32, 32>}, {pipeline_mode = #tpu.pipeline_mode<synchronous>, transform_indices = @transform_2, window_bounds = array<i64: 1, 32>}, {transform_indices = @transform_3, window_bounds = array<i64: 1, 16, 32>}]} {
    %c0 = arith.constant 0 : index
    %c0_0 = arith.constant 0 : index
    %c0_1 = arith.constant 0 : index
    %0 = vector.load %arg2[%c0, %c0_0, %c0_1] : memref<1x16x32xf32, #tpu.memory_space<vmem>>, vector<1x16x32xf32>
    %1 = vector.shape_cast %0 : vector<1x16x32xf32> to vector<16x32xf32>
    %cst = arith.constant 0.000000e+00 : f32
    %2 = vector.broadcast %cst : f32 to vector<5x32xf32>
    %c0_2 = arith.constant 0 : index
    %c0_3 = arith.constant 0 : index
    %3 = vector.load %arg6[%c0_2, %c0_3] : memref<26x32xf32, #tpu.memory_space<vmem>>, vector<5x32xf32>
    tpu.vector_store %arg6[%c0_2, %c0_3], %2 {strides = array<i32>} : memref<26x32xf32, #tpu.memory_space<vmem>>, vector<5x32xf32>,
    %cst_4 = arith.constant 0.000000e+00 : f32
    %4 = vector.broadcast %cst_4 : f32 to vector<5x32xf32>
    %c21 = arith.constant 21 : index
    %c0_5 = arith.constant 0 : index
    %5 = vector.load %arg6[%c21, %c0_5] : memref<26x32xf32, #tpu.memory_space<vmem>>, vector<5x32xf32>
    tpu.vector_store %arg6[%c21, %c0_5], %4 {strides = array<i32>} : memref<26x32xf32, #tpu.memory_space<vmem>>, vector<5x32xf32>,
    %c5 = arith.constant 5 : index
    %c0_6 = arith.constant 0 : index
    %6 = vector.load %arg6[%c5, %c0_6] : memref<26x32xf32, #tpu.memory_space<vmem>>, vector<16x32xf32>
    tpu.vector_store %arg6[%c5, %c0_6], %1 {strides = array<i32>} : memref<26x32xf32, #tpu.memory_space<vmem>>, vector<16x32xf32>,
    %c0_7 = arith.constant 0 : index
    %c0_8 = arith.constant 0 : index
    %7 = vector.load %arg4[%c0_7, %c0_8] : memref<1x32xf32, #tpu.memory_space<vmem>>, vector<1x32xf32>
    %cst_9 = arith.constant 0.000000e+00 : f32
    %8 = vector.broadcast %cst_9 : f32 to vector<16x32xf32>
    %c0_10 = arith.constant 0 : index
    %c0_11 = arith.constant 0 : index
    %9 = vector.load %arg6[%c0_10, %c0_11] : memref<26x32xf32, #tpu.memory_space<vmem>>, vector<16x32xf32>
    %10 = arith.truncf %9 : vector<16x32xf32> to vector<16x32xbf16>
    %c0_12 = arith.constant 0 : index
    %c0_13 = arith.constant 0 : index
    %c0_14 = arith.constant 0 : index
    %11 = vector.load %arg3[%c0_12, %c0_13, %c0_14] : memref<9x32x32xbf16, #tpu.memory_space<vmem>>, vector<1x32x32xbf16>
    %12 = vector.shape_cast %11 : vector<1x32x32xbf16> to vector<32x32xbf16>
    %cst_15 = arith.constant dense<0.000000e+00> : vector<16x32xf32>
    %13 = tpu.matmul %10, %12, %cst_15 {dimension_numbers = #tpu.dot_dimension_numbers<[1], [0], [0], [1], [0, 0, 1, 1], [], []>} : vector<16x32xbf16>, vector<32x32xbf16>, vector<16x32xf32> -> vector<16x32xf32>
    %14 = arith.addf %8, %13 : vector<16x32xf32>
    %c4 = arith.constant 4 : index
    %c0_16 = arith.constant 0 : index
    %15 = vector.load %arg6[%c4, %c0_16] : memref<26x32xf32, #tpu.memory_space<vmem>>, vector<16x32xf32>
    %16 = arith.truncf %15 : vector<16x32xf32> to vector<16x32xbf16>
    %c3 = arith.constant 3 : index
    %c0_17 = arith.constant 0 : index
    %c0_18 = arith.constant 0 : index
    %17 = vector.load %arg3[%c3, %c0_17, %c0_18] : memref<9x32x32xbf16, #tpu.memory_space<vmem>>, vector<1x32x32xbf16>
    %18 = vector.shape_cast %17 : vector<1x32x32xbf16> to vector<32x32xbf16>
    %cst_19 = arith.constant dense<0.000000e+00> : vector<16x32xf32>
    %19 = tpu.matmul %16, %18, %cst_19 {dimension_numbers = #tpu.dot_dimension_numbers<[1], [0], [0], [1], [0, 0, 1, 1], [], []>} : vector<16x32xbf16>, vector<32x32xbf16>, vector<16x32xf32> -> vector<16x32xf32>
    %20 = arith.addf %14, %19 : vector<16x32xf32>
    %c8 = arith.constant 8 : index
    %c0_20 = arith.constant 0 : index
    %21 = vector.load %arg6[%c8, %c0_20] : memref<26x32xf32, #tpu.memory_space<vmem>>, vector<16x32xf32>
    %22 = arith.truncf %21 : vector<16x32xf32> to vector<16x32xbf16>
    %c6 = arith.constant 6 : index
    %c0_21 = arith.constant 0 : index
    %c0_22 = arith.constant 0 : index
    %23 = vector.load %arg3[%c6, %c0_21, %c0_22] : memref<9x32x32xbf16, #tpu.memory_space<vmem>>, vector<1x32x32xbf16>
    %24 = vector.shape_cast %23 : vector<1x32x32xbf16> to vector<32x32xbf16>
    %cst_23 = arith.constant dense<0.000000e+00> : vector<16x32xf32>
    %25 = tpu.matmul %22, %24, %cst_23 {dimension_numbers = #tpu.dot_dimension_numbers<[1], [0], [0], [1], [0, 0, 1, 1], [], []>} : vector<16x32xbf16>, vector<32x32xbf16>, vector<16x32xf32> -> vector<16x32xf32>
    %26 = arith.addf %20, %25 : vector<16x32xf32>
    %cst_24 = arith.constant 0.000000e+00 : f32
    %27 = vector.broadcast %cst_24 : f32 to vector<16x32xf32>
    %c1 = arith.constant 1 : index
    %c0_25 = arith.constant 0 : index
    %28 = vector.load %arg6[%c1, %c0_25] : memref<26x32xf32, #tpu.memory_space<vmem>>, vector<16x32xf32>
    %29 = arith.truncf %28 : vector<16x32xf32> to vector<16x32xbf16>
    %c1_26 = arith.constant 1 : index
    %c0_27 = arith.constant 0 : index
    %c0_28 = arith.constant 0 : index
    %30 = vector.load %arg3[%c1_26, %c0_27, %c0_28] : memref<9x32x32xbf16, #tpu.memory_space<vmem>>, vector<1x32x32xbf16>
    %31 = vector.shape_cast %30 : vector<1x32x32xbf16> to vector<32x32xbf16>
    %cst_29 = arith.constant dense<0.000000e+00> : vector<16x32xf32>
    %32 = tpu.matmul %29, %31, %cst_29 {dimension_numbers = #tpu.dot_dimension_numbers<[1], [0], [0], [1], [0, 0, 1, 1], [], []>} : vector<16x32xbf16>, vector<32x32xbf16>, vector<16x32xf32> -> vector<16x32xf32>
    %33 = arith.addf %27, %32 : vector<16x32xf32>
    %c5_30 = arith.constant 5 : index
    %c0_31 = arith.constant 0 : index
    %34 = vector.load %arg6[%c5_30, %c0_31] : memref<26x32xf32, #tpu.memory_space<vmem>>, vector<16x32xf32>
    %35 = arith.truncf %34 : vector<16x32xf32> to vector<16x32xbf16>
    %c4_32 = arith.constant 4 : index
    %c0_33 = arith.constant 0 : index
    %c0_34 = arith.constant 0 : index
    %36 = vector.load %arg3[%c4_32, %c0_33, %c0_34] : memref<9x32x32xbf16, #tpu.memory_space<vmem>>, vector<1x32x32xbf16>
    %37 = vector.shape_cast %36 : vector<1x32x32xbf16> to vector<32x32xbf16>
    %cst_35 = arith.constant dense<0.000000e+00> : vector<16x32xf32>
    %38 = tpu.matmul %35, %37, %cst_35 {dimension_numbers = #tpu.dot_dimension_numbers<[1], [0], [0], [1], [0, 0, 1, 1], [], []>} : vector<16x32xbf16>, vector<32x32xbf16>, vector<16x32xf32> -> vector<16x32xf32>
    %39 = arith.addf %33, %38 : vector<16x32xf32>
    %c9 = arith.constant 9 : index
    %c0_36 = arith.constant 0 : index
    %40 = vector.load %arg6[%c9, %c0_36] : memref<26x32xf32, #tpu.memory_space<vmem>>, vector<16x32xf32>
    %41 = arith.truncf %40 : vector<16x32xf32> to vector<16x32xbf16>
    %c7 = arith.constant 7 : index
    %c0_37 = arith.constant 0 : index
    %c0_38 = arith.constant 0 : index
    %42 = vector.load %arg3[%c7, %c0_37, %c0_38] : memref<9x32x32xbf16, #tpu.memory_space<vmem>>, vector<1x32x32xbf16>
    %43 = vector.shape_cast %42 : vector<1x32x32xbf16> to vector<32x32xbf16>
    %cst_39 = arith.constant dense<0.000000e+00> : vector<16x32xf32>
    %44 = tpu.matmul %41, %43, %cst_39 {dimension_numbers = #tpu.dot_dimension_numbers<[1], [0], [0], [1], [0, 0, 1, 1], [], []>} : vector<16x32xbf16>, vector<32x32xbf16>, vector<16x32xf32> -> vector<16x32xf32>
    %45 = arith.addf %39, %44 : vector<16x32xf32>
    %cst_40 = arith.constant 0.000000e+00 : f32
    %46 = vector.broadcast %cst_40 : f32 to vector<16x32xf32>
    %c2 = arith.constant 2 : index
    %c0_41 = arith.constant 0 : index
    %47 = vector.load %arg6[%c2, %c0_41] : memref<26x32xf32, #tpu.memory_space<vmem>>, vector<16x32xf32>
    %48 = arith.truncf %47 : vector<16x32xf32> to vector<16x32xbf16>
    %c2_42 = arith.constant 2 : index
    %c0_43 = arith.constant 0 : index
    %c0_44 = arith.constant 0 : index
    %49 = vector.load %arg3[%c2_42, %c0_43, %c0_44] : memref<9x32x32xbf16, #tpu.memory_space<vmem>>, vector<1x32x32xbf16>
    %50 = vector.shape_cast %49 : vector<1x32x32xbf16> to vector<32x32xbf16>
    %cst_45 = arith.constant dense<0.000000e+00> : vector<16x32xf32>
    %51 = tpu.matmul %48, %50, %cst_45 {dimension_numbers = #tpu.dot_dimension_numbers<[1], [0], [0], [1], [0, 0, 1, 1], [], []>} : vector<16x32xbf16>, vector<32x32xbf16>, vector<16x32xf32> -> vector<16x32xf32>
    %52 = arith.addf %46, %51 : vector<16x32xf32>
    %c6_46 = arith.constant 6 : index
    %c0_47 = arith.constant 0 : index
    %53 = vector.load %arg6[%c6_46, %c0_47] : memref<26x32xf32, #tpu.memory_space<vmem>>, vector<16x32xf32>
    %54 = arith.truncf %53 : vector<16x32xf32> to vector<16x32xbf16>
    %c5_48 = arith.constant 5 : index
    %c0_49 = arith.constant 0 : index
    %c0_50 = arith.constant 0 : index
    %55 = vector.load %arg3[%c5_48, %c0_49, %c0_50] : memref<9x32x32xbf16, #tpu.memory_space<vmem>>, vector<1x32x32xbf16>
    %56 = vector.shape_cast %55 : vector<1x32x32xbf16> to vector<32x32xbf16>
    %cst_51 = arith.constant dense<0.000000e+00> : vector<16x32xf32>
    %57 = tpu.matmul %54, %56, %cst_51 {dimension_numbers = #tpu.dot_dimension_numbers<[1], [0], [0], [1], [0, 0, 1, 1], [], []>} : vector<16x32xbf16>, vector<32x32xbf16>, vector<16x32xf32> -> vector<16x32xf32>
    %58 = arith.addf %52, %57 : vector<16x32xf32>
    %c10 = arith.constant 10 : index
    %c0_52 = arith.constant 0 : index
    %59 = vector.load %arg6[%c10, %c0_52] : memref<26x32xf32, #tpu.memory_space<vmem>>, vector<16x32xf32>
    %60 = arith.truncf %59 : vector<16x32xf32> to vector<16x32xbf16>
    %c8_53 = arith.constant 8 : index
    %c0_54 = arith.constant 0 : index
    %c0_55 = arith.constant 0 : index
    %61 = vector.load %arg3[%c8_53, %c0_54, %c0_55] : memref<9x32x32xbf16, #tpu.memory_space<vmem>>, vector<1x32x32xbf16>
    %62 = vector.shape_cast %61 : vector<1x32x32xbf16> to vector<32x32xbf16>
    %cst_56 = arith.constant dense<0.000000e+00> : vector<16x32xf32>
    %63 = tpu.matmul %60, %62, %cst_56 {dimension_numbers = #tpu.dot_dimension_numbers<[1], [0], [0], [1], [0, 0, 1, 1], [], []>} : vector<16x32xbf16>, vector<32x32xbf16>, vector<16x32xf32> -> vector<16x32xf32>
    %64 = arith.addf %58, %63 : vector<16x32xf32>
    %65 = tpu.iota {dimensions = array<i32: 0>} : vector<16x1xi32>
    %c4_i32 = arith.constant 4 : i32
    %c0_i32 = arith.constant 0 : i32
    %66 = arith.cmpi eq, %c4_i32, %c0_i32 : i32
    %c1_i32 = arith.constant 1 : i32
    %67 = arith.select %66, %c1_i32, %c4_i32 : i32
    %68 = vector.broadcast %67 : i32 to vector<16x1xi32>
    %69 = arith.remsi %65, %68 : vector<16x1xi32>
    %c0_i32_57 = arith.constant 0 : i32
    %70 = vector.broadcast %c0_i32_57 : i32 to vector<16x1xi32>
    %71 = arith.cmpi ne, %69, %70 : vector<16x1xi32>
    %c0_i32_58 = arith.constant 0 : i32
    %72 = vector.broadcast %c0_i32_58 : i32 to vector<16x1xi32>
    %73 = arith.cmpi slt, %69, %72 : vector<16x1xi32>
    %c0_i32_59 = arith.constant 0 : i32
    %74 = arith.cmpi slt, %67, %c0_i32_59 : i32
    %75 = vector.broadcast %74 : i1 to vector<16x1xi1>
    %76 = vector.broadcast %75 : vector<16x1xi1> to vector<16x1xi1>
    %77 = arith.xori %73, %76 : vector<16x1xi1>
    %78 = arith.andi %77, %71 : vector<16x1xi1>
    %79 = vector.broadcast %67 : i32 to vector<16x1xi32>
    %80 = arith.addi %69, %79 : vector<16x1xi32>
    %81 = arith.select %78, %80, %69 : vector<16x1xi1>, vector<16x1xi32>
    %82 = vector.broadcast %7 : vector<1x32xf32> to vector<16x32xf32>
    %83 = arith.addf %45, %82 : vector<16x32xf32>
    %c0_i32_60 = arith.constant 0 : i32
    %84 = vector.broadcast %c0_i32_60 : i32 to vector<16x1xi32>
    %85 = arith.cmpi sgt, %81, %84 : vector<16x1xi32>
    %cst_61 = arith.constant 0.000000e+00 : f32
    %86 = vector.shape_cast %85 : vector<16x1xi1> to vector<16x1xi1>
    %87 = vector.broadcast %86 : vector<16x1xi1> to vector<16x32xi1>
    %88 = vector.broadcast %cst_61 : f32 to vector<16x32xf32>
    %89 = arith.select %87, %26, %88 : vector<16x32xi1>, vector<16x32xf32>
    %90 = arith.addf %83, %89 : vector<16x32xf32>
    %c3_i32 = arith.constant 3 : i32
    %91 = vector.broadcast %c3_i32 : i32 to vector<16x1xi32>
    %92 = arith.cmpi slt, %81, %91 : vector<16x1xi32>
    %cst_62 = arith.constant 0.000000e+00 : f32
    %93 = vector.shape_cast %92 : vector<16x1xi1> to vector<16x1xi1>
    %94 = vector.broadcast %93 : vector<16x1xi1> to vector<16x32xi1>
    %95 = vector.broadcast %cst_62 : f32 to vector<16x32xf32>
    %96 = arith.select %94, %64, %95 : vector<16x32xi1>, vector<16x32xf32>
    %97 = arith.addf %90, %96 : vector<16x32xf32>
    %c0_63 = arith.constant 0 : index
    %c0_64 = arith.constant 0 : index
    %c0_65 = arith.constant 0 : index
    %98 = vector.load %arg5[%c0_63, %c0_64, %c0_65] : memref<1x16x32xf32, #tpu.memory_space<vmem>>, vector<1x16x32xf32>
    %99 = vector.shape_cast %98 : vector<1x16x32xf32> to vector<16x32xf32>
    %100 = vector.shape_cast %97 : vector<16x32xf32> to vector<1x16x32xf32>
    tpu.vector_store %arg5[%c0_63, %c0_64, %c0_65], %100 {strides = array<i32>} : memref<1x16x32xf32, #tpu.memory_space<vmem>>, vector<1x16x32xf32>,
    return
  }
  func.func @transform_0(%arg0: i32, %arg1: i32) -> (i32, i32, i32) {
    %c0_i32 = arith.constant 0 : i32
    %c0_i32_0 = arith.constant 0 : i32
    return %arg0, %arg1, %c0_i32 : i32, i32, i32
  }
  func.func @transform_1(%arg0: i32, %arg1: i32) -> (i32, i32, i32) {
    %c0_i32 = arith.constant 0 : i32
    %c0_i32_0 = arith.constant 0 : i32
    %c0_i32_1 = arith.constant 0 : i32
    %c0_i32_2 = arith.constant 0 : i32
    return %c0_i32, %c0_i32_0, %c0_i32_1 : i32, i32, i32
  }
  func.func @transform_2(%arg0: i32, %arg1: i32) -> (i32, i32) {
    %c0_i32 = arith.constant 0 : i32
    %c0_i32_0 = arith.constant 0 : i32
    %c0_i32_1 = arith.constant 0 : i32
    return %c0_i32, %c0_i32_0 : i32, i32
  }
  func.func @transform_3(%arg0: i32, %arg1: i32) -> (i32, i32, i32) {
    %c0_i32 = arith.constant 0 : i32
    %c0_i32_0 = arith.constant 0 : i32
    return %arg0, %arg1, %c0_i32 : i32, i32, i32
  }
}

</mosaic_0001>

<bundles_post_ra>
// kernel: fpn_forward.10
= control target key start
LH: loop header
LB: loop body
LE: loop exit
PB: predicated region body
PF: predicated region fallthrough
CT: control target
= control target key end

     0   :  { %s358_s12 = smov 0   ;;  %s381_s0 = inlined_call_operand.vmem [shape: f32[2,16,16], index: 0, kind: input, shape index: {}]   ;;  %s382_s1 = inlined_call_operand.vmem [shape: bf16[16,32], index: 1, kind: input, shape index: {}]   ;;  %s383_s2 = inlined_call_operand.vmem [shape: f32[1,32], index: 2, kind: input, shape index: {}]   ;;  %s384_s3 = inlined_call_operand.vmem [shape: f32[2,16,32], index: 3, kind: output, shape index: {}]  }
   0x1 LB: > { %s293_s13 = sadd.s32 4294967295, %s334_s12   ;;  %p297_p0 = scmp.ge.s32.totalorder %s334_s12, 1  ;;  %s334_s12 = sphi %s358_s12, %s13_s12  }
   0x2   : > { %p137_p1 = scmp.lt.s32.totalorder %s334_s12, 3 }
   0x4   : > { %p138_p2 = pnand %p297_p0, %p137_p1 }
   0x5   : > { %v327_v0 = vld [vmem:[%s382_s1] sm:$0xff] (!%p138_p2)   ;;  %v336_v1 = vmov (!%p138_p2), 0.0   ;;  %p161_p3 = scmp.lt.s32.totalorder (!%p138_p2), %s293_s13, 1  ;;  %vm337_vm0 = vmmov (!%p138_p2), 0   ;;  %vm190_vm1 = vcmask (!%p138_p2), 130048   ;;  %vm235_vm2 = vcmask (!%p138_p2), 261120  }
   0x6   : > { %141 = sbr.rel (%p138_p2) target bundleno = 236 (0xec), region = 32  ;;  %311 = vmatprep.subr.bf16.mxu0 (!%p138_p2), %v336_v1  ;;  %313 = vmatprep.mubr.msk.bf16.mxu0 (!%p138_p2), %vm337_vm0, %v336_v1  ;;  %v302_v5 = vld [vmem:[%s383_s2] ss:$0 sm:$0xff] (!%p138_p2) }
   0x7   : > { %312 = vmatpush3.bf16.msra.mxu0 (!%p138_p2), %v327_v0 }
   0xd   : > { %s386_s13 = smov (!%p161_p3, %s293_s13), 1 }
   0xe   : > { %s307_s16 = sshll.u32 %s386_s13, 4 }
   0xf   : > { %s165_s19 = scalar_lea.vmem %s381_s0, %s307_s16  ;;  %s170_s24 = scalar_lea.vmem %s384_s3, %s307_s16 }
  0x10   : > { %v172_v2 = vld [vmem:[%s165_s19] sm:$0xff]  ;;  %v173_v3 = vld [vmem:[%s165_s19 + $0x8] sm:$0xff] }
  0x11   : > { %v174_v4 = vpack.c.bf16 %v173_v3, %v172_v2 }
  0x13   : > { %314 = vmatmul.mubr.msk.bf16.vlgmr.msra.gmra.mrb[0].mxu0 %vm190_vm1, %v174_v4 }
  0xe6   : > { %v228_v6 = vpop.f32.mrb[0].mxu0 }
  0xe7   : > { %v229_v7 = vadd.f32 %v302_v5, %v228_v6  ;;  %v315_v8 = vpop.f32.mrb[1].mxu0 }
  0xe8   : > { %v231_v9 = vpop.f32.mrb[2].mxu0 }
  0xe9   : > { %236 = vst.msk [vmem:[%s170_s24] sm:$0xff] %vm235_vm2, %v229_v7  ;;  %v232_v10 = vadd.f32 %v302_v5, %v231_v9  ;;  %v316_v11 = vpop.f32.mrb[3].mxu0 }
  0xeb   : > { %237 = vst.msk [vmem:[%s170_s24 + $0x8] sm:$0xff] %vm235_vm2, %v232_v10 }
  0xec PF: > { %s13_s12 = sadd.s32 1, %s334_s12  }
  0xed   : > { %p10_p4 = scmp.ge.s32.totalorder %s13_s12, 4  }
  0xef   :  { %12 = sbr.rel (!%p10_p4) target bundleno = 1 (0x1), region = 62 }

// kernel: fpn_forward.12
= control target key start
LH: loop header
LB: loop body
LE: loop exit
PB: predicated region body
PF: predicated region fallthrough
CT: control target
= control target key end

     0   :  { %s792_s18 = smov 0   ;;  %s794_s19 = smov 0   ;;  %s880_s0 = inlined_call_operand.vmem [shape: f32[2,64,8], index: 0, kind: input, shape index: {}]   ;;  %s881_s1 = inlined_call_operand.vmem [shape: f32[2,16,32], index: 1, kind: input, shape index: {}]   ;;  %s882_s2 = inlined_call_operand.vmem [shape: bf16[8,32], index: 2, kind: input, shape index: {}]   ;;  %s883_s3 = inlined_call_operand.vmem [shape: f32[1,32], index: 3, kind: input, shape index: {}]   ;;  %s884_s4 = inlined_call_operand.vmem [shape: bf16[64,16], index: 4, kind: input, shape index: {}]   ;;  %s885_s5 = inlined_call_operand.vmem [shape: f32[2,64,32], index: 5, kind: output, shape index: {}]  }
   0x1   :  { %s796_s20 = smov 0  }
   0x2 LB: > { %s27_s21 = sadd.s32 1, %s756_s19  ;;  %p638_p0 = scmp.ge.s32.totalorder %s760_s20, 1  ;;  %s760_s20 = sphi %s796_s20, %s15_s20   ;;  %s756_s19 = sphi %s794_s19, %s887_s19   ;;  %s752_s18 = sphi %s792_s18, %s886_s18  }
   0x3   : > { %p29_p1 = scmp.ge.s32.totalorder %s27_s21, 2  ;;  %p225_p2 = scmp.lt.s32.totalorder %s760_s20, 3 }
   0x5   : > { %s889_s21 = smov (%p29_p1, %s27_s21), 0  ;;  %p226_p3 = pnand %p638_p0, %p225_p2 }
   0x6   : > { %v313_v0 = vld [vmem:[%s882_s2] sm:$0xf] (!%p226_p3)  ;;  %vm334_vm0 = vcmask (!%p226_p3), 1043456   ;;  %p271_p4 = scmp.lt.s32.totalorder (!%p226_p3), %s752_s18, 1  ;;  %vm434_vm1 = vcmask (!%p226_p3), 130048   ;;  %vm321_vm2 = vcmask (!%p226_p3), 64512  }
   0x7   : > { %229 = sbr.rel (%p226_p3) target bundleno = 251 (0xfb), region = 40  ;;  %v734_v1 = vld [vmem:[%s884_s4] sm:$0xff] (!%p226_p3)   ;;  %709 = vmatprep.subr.msk.bf16.mxu1 (!%p226_p3), %vm334_vm0, %v313_v0  ;;  %v336_v2 = vsel (!%p226_p3), %vm334_vm0, %v313_v0, 0  ;;  %v735_v15 = vld [vmem:[%s884_s4 + $0x8] sm:$0xff] (!%p226_p3)   ;;  %v736_v18 = vld [vmem:[%s884_s4 + $0x10] sm:$0xff] (!%p226_p3)   ;;  %vm520_vm3 = vcmask (!%p226_p3), 261120  }
   0x8   : > { %674 = vmatpush3.bf16.msra.mxu1 (!%p226_p3), %v336_v2  ;;  %685 = vmatprep.mubr.msk.bf16.mxu0 (!%p226_p3), %vm434_vm1, %v734_v1  ;;  %v737_v20 = vld [vmem:[%s884_s4 + $0x18] sm:$0xff] (!%p226_p3)   ;;  %v645_v21 = vld [vmem:[%s883_s3] ss:$0 sm:$0xff] (!%p226_p3) }
   0xe   : > { %s891_s18 = smov (!%p271_p4, %s752_s18), 1 }
   0xf   : > { %s660_s26 = sshll.u32 %s891_s18, 6  ;;  %s661_s27 = sshll.u32 %s891_s18, 4 }
  0x10   : > { %s278_s30 = scalar_lea.vmem %s880_s0, %s660_s26  ;;  %s288_s8 = scalar_lea.vmem %s881_s1, %s661_s27 }
  0x11   : > { %v301_v3 = vld [vmem:[%s278_s30] sm:$0xff]  ;;  %v302_v4 = vld [vmem:[%s278_s30 + $0x8] sm:$0xff]  ;;  %v303_v5 = vld [vmem:[%s278_s30 + $0x10] sm:$0xff]  ;;  %s853_s23 = scalar_lea.vmem %s885_s5, %s660_s26 }
  0x12   : > { %v309_v6 = vpack.c.bf16 %v302_v4, %v301_v3  ;;  %v411_v7 = vld [vmem:[%s288_s8] sm:$0xff]  ;;  %v412_v8 = vld [vmem:[%s288_s8 + $0x8] sm:$0xff]  ;;  %v304_v9 = vld [vmem:[%s278_s30 + $0x18] sm:$0xff] }
  0x13   : > { %v413_v10 = vpack.c.bf16 %v412_v8, %v411_v7  ;;  %v310_v11 = vpack.c.bf16 %v304_v9, %v303_v5  ;;  %v305_v12 = vld [vmem:[%s278_s30 + $0x20] sm:$0xff]  ;;  %v306_v13 = vld [vmem:[%s278_s30 + $0x28] sm:$0xff]  ;;  %v307_v16 = vld [vmem:[%s278_s30 + $0x30] sm:$0xff] }
  0x14   : > { %675 = vmatprep.mubr.msk.bf16.mxu1 %vm321_vm2, %v309_v6  ;;  %v311_v14 = vpack.c.bf16 %v306_v13, %v305_v12  ;;  %v308_v17 = vld [vmem:[%s278_s30 + $0x38] sm:$0xff] }
  0x15   : > { %683 = vmatprep.subr.bf16.mxu0 %v413_v10  ;;  %676 = vmatmul.mubr.msk.bf16.vlgmr.msra.gmra.mrb[0].mxu1 %vm321_vm2, %v310_v11  ;;  %v312_v19 = vpack.c.bf16 %v308_v17, %v307_v16 }
  0x16   : > { %684 = vmatpush3.bf16.msra.mxu0 %v413_v10  ;;  %679 = vmatprep.mubr.msk.bf16.mxu1 %vm321_vm2, %v311_v14 }
  0x19   : > { %686 = vmatmul.mubr.msk.bf16.vlgmr.msra.gmra.mrb[0].mxu0 %vm434_vm1, %v735_v15 }
  0x1a   : > { %689 = vmatprep.mubr.msk.bf16.mxu0 %vm434_vm1, %v736_v18 }
  0x1d   : > { %680 = vmatmul.mubr.msk.bf16.gmra.mrb[4].mxu1 %vm321_vm2, %v312_v19 }
  0x21   : > { %690 = vmatmul.mubr.msk.bf16.gmra.mrb[4].mxu0 %vm434_vm1, %v737_v20 }
  0xe8   : > { %v677_v22 = vpop.f32.mrb[0].mxu1 }
  0xe9   : > { %v381_v23 = vadd.f32 %v677_v22, %v645_v21  ;;  %v372_v24 = vpop.f32.mrb[1].mxu1 }
  0xea   : > { %v373_v25 = vadd.f32 %v645_v21, %v372_v24  ;;  %v678_v26 = vpop.f32.mrb[2].mxu1 }
  0xeb   : > { %v384_v27 = vadd.f32 %v678_v26, %v645_v21  ;;  %v375_v28 = vpop.f32.mrb[3].mxu1 }
  0xec   : > { %v376_v29 = vadd.f32 %v645_v21, %v375_v28  ;;  %v687_v30 = vpop.f32.mrb[0].mxu0 }
  0xed   : > { %v514_v31 = vadd.f32 %v687_v30, %v381_v23  ;;  %v481_v32 = vpop.f32.mrb[1].mxu0 }
  0xee   : > { %v512_v33 = vadd.f32 %v481_v32, %v373_v25  ;;  %v688_v34 = vpop.f32.mrb[2].mxu0 }
  0xef   : > { %523 = vst.msk [vmem:[%s853_s23 + $0x10] sm:$0xff] %vm520_vm3, %v514_v31  ;;  %v515_v35 = vadd.f32 %v688_v34, %v384_v27  ;;  %v484_v36 = vpop.f32.mrb[3].mxu0 }
  0xf0   : > { %521 = vst.msk [vmem:[%s853_s23] sm:$0xff] %vm520_vm3, %v512_v33  ;;  %v513_v37 = vadd.f32 %v484_v36, %v376_v29  ;;  %v681_v38 = vpop.f32.mrb[4].mxu1 }
  0xf1   : > { %524 = vst.msk [vmem:[%s853_s23 + $0x18] sm:$0xff] %vm520_vm3, %v515_v35  ;;  %v397_v39 = vadd.f32 %v681_v38, %v645_v21  ;;  %v388_v40 = vpop.f32.mrb[5].mxu1 }
  0xf2   : > { %522 = vst.msk [vmem:[%s853_s23 + $0x8] sm:$0xff] %vm520_vm3, %v513_v37  ;;  %v389_v41 = vadd.f32 %v645_v21, %v388_v40  ;;  %v682_v42 = vpop.f32.mrb[6].mxu1 }
  0xf3   : > { %v400_v43 = vadd.f32 %v682_v42, %v645_v21  ;;  %v391_v44 = vpop.f32.mrb[7].mxu1 }
  0xf4   : > { %v392_v45 = vadd.f32 %v645_v21, %v391_v44  ;;  %v691_v46 = vpop.f32.mrb[4].mxu0 }
  0xf5   : > { %v518_v47 = vadd.f32 %v691_v46, %v397_v39  ;;  %v497_v48 = vpop.f32.mrb[5].mxu0 }
  0xf6   : > { %v516_v49 = vadd.f32 %v497_v48, %v389_v41  ;;  %v692_v50 = vpop.f32.mrb[6].mxu0 }
  0xf7   : > { %527 = vst.msk [vmem:[%s853_s23 + $0x30] sm:$0xff] %vm520_vm3, %v518_v47  ;;  %v519_v51 = vadd.f32 %v692_v50, %v400_v43  ;;  %v500_v52 = vpop.f32.mrb[7].mxu0 }
  0xf8   : > { %525 = vst.msk [vmem:[%s853_s23 + $0x20] sm:$0xff] %vm520_vm3, %v516_v49  ;;  %v517_v53 = vadd.f32 %v500_v52, %v392_v45 }
  0xf9   : > { %528 = vst.msk [vmem:[%s853_s23 + $0x38] sm:$0xff] %vm520_vm3, %v519_v51 }
  0xfa   : > { %526 = vst.msk [vmem:[%s853_s23 + $0x28] sm:$0xff] %vm520_vm3, %v517_v53 }
  0xfb PF: > { %s15_s20 = sadd.s32 1, %s760_s20   ;;  %s886_s18 = smov %s756_s19 }
  0xfc   : > { %p12_p5 = scmp.ge.s32.totalorder %s15_s20, 4   ;;  %s887_s19 = smov %s889_s21 }
  0xfe   :  { %14 = sbr.rel (!%p12_p5) target bundleno = 2 (0x2), region = 73 }

// kernel: fpn_forward.14
= control target key start
LH: loop header
LB: loop body
LE: loop exit
PB: predicated region body
PF: predicated region fallthrough
CT: control target
= control target key end

     0   :  { %s1032_s18 = smov 0   ;;  %s1034_s19 = smov 0   ;;  %s1213_s0 = inlined_call_operand.vmem [shape: f32[2,256,4], index: 0, kind: input, shape index: {}]   ;;  %s1214_s1 = inlined_call_operand.vmem [shape: f32[2,64,32], index: 1, kind: input, shape index: {}]   ;;  %s1215_s2 = inlined_call_operand.vmem [shape: bf16[4,32], index: 2, kind: input, shape index: {}]   ;;  %s1216_s3 = inlined_call_operand.vmem [shape: f32[1,32], index: 3, kind: input, shape index: {}]   ;;  %s1217_s4 = inlined_call_operand.vmem [shape: bf16[128,32], index: 4, kind: input, shape index: {}]   ;;  %s1218_s5 = inlined_call_operand.vmem [shape: f32[2,256,32], index: 5, kind: output, shape index: {}]  }
   0x1   :  { %s1036_s20 = smov 0   ;;  %s1038_s21 = smov 0  }
   0x2   :  { %s1040_s22 = smov 0  }
   0x3 LB: > { %s24_s23 = sadd.s32 1, %s992_s20  ;;  %s27_s24 = sadd.s32 1, %s996_s21  ;;  %s1000_s22 = sphi %s1040_s22, %s15_s22   ;;  %s996_s21 = sphi %s1038_s21, %s1222_s21   ;;  %s992_s20 = sphi %s1036_s20, %s1221_s20   ;;  %s988_s19 = sphi %s1034_s19, %s1220_s19   ;;  %s984_s18 = sphi %s1032_s18, %s1219_s18  }
   0x4   : > { %p25_p0 = scmp.ge.s32.totalorder %s24_s23, 2  ;;  %p787_p1 = scmp.ge.s32.totalorder %s1000_s22, 1 }
   0x5   : > { %p225_p2 = scmp.lt.s32.totalorder %s1000_s22, 5 }
   0x6   : > { %s1224_s23 = smov (%p25_p0, %s24_s23), 0  ;;  %s1226_s24 = smov (!%p25_p0, %s27_s24), %s996_s21 }
   0x7   : > { %p226_p3 = pnand %p787_p1, %p225_p2  ;;  %p29_p4 = scmp.ge.s32.totalorder %s1226_s24, 2 }
   0x8   : > { %v325_v0 = vld [vmem:[%s1215_s2] sm:$0x3] (!%p226_p3)  ;;  %vm358_vm0 = vcmask (!%p226_p3), 1041408   ;;  %s788_s27 = sshll.u32 (!%p226_p3), %s984_s18, 4  ;;  %p271_p5 = scmp.lt.s32.totalorder (!%p226_p3), %s988_s19, 1  ;;  %vm521_vm1 = vcmask (!%p226_p3), 261120  }
   0x9   : > { %s1228_s24 = smov (%p29_p4, %s1226_s24), 0  ;;  %229 = sbr.rel (%p226_p3) target bundleno = 277 (0x115), region = 40 }
   0xa   : > { %913 = vmatprep.subr.msk.bf16.mxu1 (!%p226_p3), %vm358_vm0, %v325_v0  ;;  %v360_v1 = vsel (!%p226_p3), %vm358_vm0, %v325_v0, 0  ;;  %p273_p6 = scmp.lt.s32.totalorder (!%p226_p3), %s788_s27, 31  ;;  %s791_s28 = sshll.u32 (!%p226_p3), %s984_s18, 2  ;;  %v954_v2 = vld [vmem:[%s1217_s4] sm:$0xff] (!%p226_p3)   ;;  %vm333_vm2 = vcmask (!%p226_p3), 31744   ;;  %v955_v24 = vld [vmem:[%s1217_s4 + $0x8] sm:$0xff] (!%p226_p3)  }
   0xb   : > { %844 = vmatpush3.bf16.msra.mxu1 (!%p226_p3), %v360_v1  ;;  %865 = vmatprep.mubr.msk.bf16.mxu0 (!%p226_p3), %vm521_vm1, %v954_v2  ;;  %p283_p7 = scmp.lt.s32.totalorder (!%p226_p3), %s791_s28, 7  ;;  %v956_v25 = vld [vmem:[%s1217_s4 + $0x10] sm:$0xff] (!%p226_p3)   ;;  %v957_v32 = vld [vmem:[%s1217_s4 + $0x18] sm:$0xff] (!%p226_p3)   ;;  %v958_v33 = vld [vmem:[%s1217_s4 + $0x20] sm:$0xff] (!%p226_p3)  }
   0xc   : > { %v959_v37 = vld [vmem:[%s1217_s4 + $0x28] sm:$0xff] (!%p226_p3)   ;;  %v960_v38 = vld [vmem:[%s1217_s4 + $0x30] sm:$0xff] (!%p226_p3)   ;;  %v961_v39 = vld [vmem:[%s1217_s4 + $0x38] sm:$0xff] (!%p226_p3)  }
   0xd   : > { %v1141_v44 = vld [vmem:[%s1216_s3] ss:$0 sm:$0xff] (!%p226_p3) }
  0x10   : > { %s1230_s19 = smov (!%p271_p5, %s988_s19), 1  ;;  %s1232_s27 = smov (!%p273_p6, %s788_s27), 31 }
  0x11   : > { %s789_s6 = sshll.u32 %s1230_s19, 5  ;;  %s792_s9 = sshll.u32 %s1230_s19, 3 }
  0x12   : > { %s1073_s7 = sadd.s32 %s789_s6, %s1232_s27  ;;  %s1234_s28 = smov (!%p283_p7, %s791_s28), 7 }
  0x13   : > { %s790_s8 = sshll.u32 %s1073_s7, 3  ;;  %s286_s13 = sadd.s32 %s792_s9, %s1234_s28 }
  0x14   : > { %s1081_s12 = scalar_lea.vmem %s1213_s0, %s790_s8  ;;  %s793_s14 = sshll.u32 %s286_s13, 3 }
  0x15   : > { %v301_v3 = vld [vmem:[%s1081_s12] sm:$0xff]  ;;  %v302_v4 = vld [vmem:[%s1081_s12 + $0x8] sm:$0xff]  ;;  %v303_v5 = vld [vmem:[%s1081_s12 + $0x10] sm:$0xff]  ;;  %s288_s17 = scalar_lea.vmem %s1214_s1, %s793_s14  ;;  %s1150_s18 = scalar_lea.vmem %s1218_s5, %s790_s8 }
  0x16   : > { %v317_v6 = vpack.c.bf16 %v302_v4, %v301_v3  ;;  %v304_v7 = vld [vmem:[%s1081_s12 + $0x18] sm:$0xff]  ;;  %v305_v8 = vld [vmem:[%s1081_s12 + $0x20] sm:$0xff]  ;;  %v306_v9 = vld [vmem:[%s1081_s12 + $0x28] sm:$0xff] }
  0x17   : > { %v318_v10 = vpack.c.bf16 %v304_v7, %v303_v5  ;;  %v319_v11 = vpack.c.bf16 %v306_v9, %v305_v8  ;;  %v307_v12 = vld [vmem:[%s1081_s12 + $0x30] sm:$0xff]  ;;  %v308_v13 = vld [vmem:[%s1081_s12 + $0x38] sm:$0xff]  ;;  %v309_v14 = vld [vmem:[%s1081_s12 + $0x40] sm:$0xff] }
  0x18   : > { %845 = vmatprep.mubr.msk.bf16.mxu1 %vm333_vm2, %v317_v6  ;;  %v475_v15 = vld [vmem:[%s288_s17] sm:$0xff]  ;;  %v476_v16 = vld [vmem:[%s288_s17 + $0x8] sm:$0xff]  ;;  %v477_v17 = vld [vmem:[%s288_s17 + $0x10] sm:$0xff]  ;;  %v320_v22 = vpack.c.bf16 %v308_v13, %v307_v12 }
  0x19   : > { %846 = vmatmul.mubr.msk.bf16.vlgmr.msra.gmra.mrb[0].mxu1 %vm333_vm2, %v318_v10  ;;  %v479_v18 = vpack.c.bf16 %v476_v16, %v475_v15  ;;  %v478_v19 = vld [vmem:[%s288_s17 + $0x18] sm:$0xff]  ;;  %v310_v20 = vld [vmem:[%s1081_s12 + $0x48] sm:$0xff]  ;;  %v311_v26 = vld [vmem:[%s1081_s12 + $0x50] sm:$0xff] }
  0x1a   : > { %849 = vmatprep.mubr.msk.bf16.mxu1 %vm333_vm2, %v319_v11  ;;  %v480_v21 = vpack.c.bf16 %v478_v19, %v477_v17  ;;  %v321_v23 = vpack.c.bf16 %v310_v20, %v309_v14  ;;  %v312_v27 = vld [vmem:[%s1081_s12 + $0x58] sm:$0xff]  ;;  %v313_v28 = vld [vmem:[%s1081_s12 + $0x60] sm:$0xff]  ;;  %v314_v29 = vld [vmem:[%s1081_s12 + $0x68] sm:$0xff] }
  0x1b   : > { %861 = vmatprep.subr.bf16.mxu0 %v479_v18  ;;  %v322_v30 = vpack.c.bf16 %v312_v27, %v311_v26  ;;  %v323_v31 = vpack.c.bf16 %v314_v29, %v313_v28  ;;  %v315_v34 = vld [vmem:[%s1081_s12 + $0x70] sm:$0xff]  ;;  %v316_v35 = vld [vmem:[%s1081_s12 + $0x78] sm:$0xff] }
  0x1c   : > { %862 = vmatpush3.bf16.msra.mxu0 %v479_v18  ;;  %v324_v36 = vpack.c.bf16 %v316_v35, %v315_v34 }
  0x1d   : > { %863 = vmatprep.subr.bf16.mxu0 %v480_v21 }
  0x20   : > { %864 = vmatpush3.bf16.msra.mxu0 %v480_v21 }
  0x21   : > { %850 = vmatmul.mubr.msk.bf16.gmra.mrb[4].mxu1 %vm333_vm2, %v320_v22 }
  0x22   : > { %853 = vmatprep.mubr.msk.bf16.mxu1 %vm333_vm2, %v321_v23 }
  0x23   : > { %866 = vmatmul.mubr.msk.bf16.vlgmr.msra.gmra.mrb[0].mxu0 %vm521_vm1, %v955_v24 }
  0x24   : > { %869 = vmatprep.mubr.msk.bf16.mxu0 %vm521_vm1, %v956_v25 }
  0x29   : > { %854 = vmatmul.mubr.msk.bf16.gmra.mrb[8].mxu1 %vm333_vm2, %v322_v30 }
  0x2a   : > { %857 = vmatprep.mubr.msk.bf16.mxu1 %vm333_vm2, %v323_v31 }
  0x2b   : > { %870 = vmatmul.mubr.msk.bf16.gmra.mrb[4].mxu0 %vm521_vm1, %v957_v32 }
  0x2c   : > { %873 = vmatprep.mubr.msk.bf16.mxu0 %vm521_vm1, %v958_v33 }
  0x31   : > { %858 = vmatmul.mubr.msk.bf16.gmra.mrb[12].mxu1 %vm333_vm2, %v324_v36 }
  0x33   : > { %874 = vmatmul.mubr.msk.bf16.gmra.mrb[8].mxu0 %vm521_vm1, %v959_v37 }
  0x34   : > { %877 = vmatprep.mubr.msk.bf16.mxu0 %vm521_vm1, %v960_v38 }
  0x3b   : > { %878 = vmatmul.mubr.msk.bf16.gmra.mrb[12].mxu0 %vm521_vm1, %v961_v39 }
  0xec   : > { %v847_v40 = vpop.f32.mrb[0].mxu1 }
  0xed   : > { %v396_v41 = vpop.f32.mrb[1].mxu1  ;;  %v405_v46 = vadd.f32 %v847_v40, %v1141_v44 }
  0xee   : > { %v848_v42 = vpop.f32.mrb[2].mxu1  ;;  %v397_v48 = vadd.f32 %v1141_v44, %v396_v41 }
  0xef   : > { %v399_v43 = vpop.f32.mrb[3].mxu1  ;;  %v408_v52 = vadd.f32 %v848_v42, %v1141_v44 }
  0xf0   : > { %v400_v55 = vadd.f32 %v1141_v44, %v399_v43 }
  0xf4   : > { %v851_v45 = vpop.f32.mrb[4].mxu1 }
  0xf5   : > { %v412_v47 = vpop.f32.mrb[5].mxu1  ;;  %v421_v62 = vadd.f32 %v851_v45, %v1141_v44 }
  0xf6   : > { %v852_v49 = vpop.f32.mrb[6].mxu1  ;;  %v867_v51 = vpop.f32.mrb[0].mxu0  ;;  %v413_v0 = vadd.f32 %v1141_v44, %v412_v47 }
  0xf7   : > { %v415_v50 = vpop.f32.mrb[7].mxu1  ;;  %v645_v53 = vadd.f32 %v867_v51, %v405_v46  ;;  %v580_v54 = vpop.f32.mrb[1].mxu0  ;;  %v424_v4 = vadd.f32 %v852_v49, %v1141_v44 }
  0xf8   : > { %v643_v56 = vadd.f32 %v580_v54, %v397_v48  ;;  %v868_v57 = vpop.f32.mrb[2].mxu0  ;;  %v416_v7 = vadd.f32 %v1141_v44, %v415_v50 }
  0xf9   : > { %661 = vst.msk [vmem:[%s1150_s18 + $0x10] sm:$0xff] %vm521_vm1, %v645_v53  ;;  %v646_v58 = vadd.f32 %v868_v57, %v408_v52  ;;  %v583_v59 = vpop.f32.mrb[3].mxu0 }
  0xfa   : > { %659 = vst.msk [vmem:[%s1150_s18] sm:$0xff] %vm521_vm1, %v643_v56  ;;  %v644_v60 = vadd.f32 %v583_v59, %v400_v55 }
  0xfb   : > { %662 = vst.msk [vmem:[%s1150_s18 + $0x18] sm:$0xff] %vm521_vm1, %v646_v58 }
  0xfc   : > { %v855_v61 = vpop.f32.mrb[8].mxu1  ;;  %660 = vst.msk [vmem:[%s1150_s18 + $0x8] sm:$0xff] %vm521_vm1, %v644_v60 }
  0xfd   : > { %v428_v63 = vpop.f32.mrb[9].mxu1  ;;  %v437_v14 = vadd.f32 %v855_v61, %v1141_v44 }
  0xfe   : > { %v856_v1 = vpop.f32.mrb[10].mxu1  ;;  %v871_v3 = vpop.f32.mrb[4].mxu0  ;;  %v429_v16 = vadd.f32 %v1141_v44, %v428_v63 }
  0xff   : > { %v431_v2 = vpop.f32.mrb[11].mxu1  ;;  %v649_v5 = vadd.f32 %v871_v3, %v421_v62  ;;  %v596_v6 = vpop.f32.mrb[5].mxu0  ;;  %v440_v20 = vadd.f32 %v856_v1, %v1141_v44 }
 0x100   : > { %v647_v8 = vadd.f32 %v596_v6, %v413_v0  ;;  %v872_v9 = vpop.f32.mrb[6].mxu0  ;;  %v432_v23 = vadd.f32 %v1141_v44, %v431_v2 }
 0x101   : > { %665 = vst.msk [vmem:[%s1150_s18 + $0x30] sm:$0xff] %vm521_vm1, %v649_v5  ;;  %v650_v10 = vadd.f32 %v872_v9, %v424_v4  ;;  %v599_v11 = vpop.f32.mrb[7].mxu0 }
 0x102   : > { %663 = vst.msk [vmem:[%s1150_s18 + $0x20] sm:$0xff] %vm521_vm1, %v647_v8  ;;  %v648_v12 = vadd.f32 %v599_v11, %v416_v7 }
 0x103   : > { %666 = vst.msk [vmem:[%s1150_s18 + $0x38] sm:$0xff] %vm521_vm1, %v650_v10 }
 0x104   : > { %v859_v13 = vpop.f32.mrb[12].mxu1  ;;  %664 = vst.msk [vmem:[%s1150_s18 + $0x28] sm:$0xff] %vm521_vm1, %v648_v12 }
 0x105   : > { %v444_v15 = vpop.f32.mrb[13].mxu1  ;;  %v453_v29 = vadd.f32 %v859_v13, %v1141_v44 }
 0x106   : > { %v860_v17 = vpop.f32.mrb[14].mxu1  ;;  %v875_v19 = vpop.f32.mrb[8].mxu0  ;;  %v445_v30 = vadd.f32 %v1141_v44, %v444_v15 }
 0x107   : > { %v447_v18 = vpop.f32.mrb[15].mxu1  ;;  %v653_v21 = vadd.f32 %v875_v19, %v437_v14  ;;  %v612_v22 = vpop.f32.mrb[9].mxu0  ;;  %v456_v32 = vadd.f32 %v860_v17, %v1141_v44 }
 0x108   : > { %v651_v24 = vadd.f32 %v612_v22, %v429_v16  ;;  %v876_v25 = vpop.f32.mrb[10].mxu0  ;;  %v448_v35 = vadd.f32 %v1141_v44, %v447_v18 }
 0x109   : > { %669 = vst.msk [vmem:[%s1150_s18 + $0x50] sm:$0xff] %vm521_vm1, %v653_v21  ;;  %v654_v26 = vadd.f32 %v876_v25, %v440_v20  ;;  %v615_v27 = vpop.f32.mrb[11].mxu0 }
 0x10a   : > { %667 = vst.msk [vmem:[%s1150_s18 + $0x40] sm:$0xff] %vm521_vm1, %v651_v24  ;;  %v652_v28 = vadd.f32 %v615_v27, %v432_v23 }
 0x10b   : > { %670 = vst.msk [vmem:[%s1150_s18 + $0x58] sm:$0xff] %vm521_vm1, %v654_v26 }
 0x10c   : > { %668 = vst.msk [vmem:[%s1150_s18 + $0x48] sm:$0xff] %vm521_vm1, %v652_v28 }
 0x10e   : > { %v879_v31 = vpop.f32.mrb[12].mxu0 }
 0x10f   : > { %v657_v33 = vadd.f32 %v879_v31, %v453_v29  ;;  %v628_v34 = vpop.f32.mrb[13].mxu0 }
 0x110   : > { %v655_v36 = vadd.f32 %v628_v34, %v445_v30  ;;  %v880_v37 = vpop.f32.mrb[14].mxu0 }
 0x111   : > { %673 = vst.msk [vmem:[%s1150_s18 + $0x70] sm:$0xff] %vm521_vm1, %v657_v33  ;;  %v658_v38 = vadd.f32 %v880_v37, %v456_v32  ;;  %v631_v39 = vpop.f32.mrb[15].mxu0 }
 0x112   : > { %671 = vst.msk [vmem:[%s1150_s18 + $0x60] sm:$0xff] %vm521_vm1, %v655_v36  ;;  %v656_v40 = vadd.f32 %v631_v39, %v448_v35 }
 0x113   : > { %674 = vst.msk [vmem:[%s1150_s18 + $0x78] sm:$0xff] %vm521_vm1, %v658_v38 }
 0x114   : > { %672 = vst.msk [vmem:[%s1150_s18 + $0x68] sm:$0xff] %vm521_vm1, %v656_v40 }
 0x115 PF: > { %s15_s22 = sadd.s32 1, %s1000_s22   ;;  %s1219_s18 = smov %s992_s20 }
 0x116   : > { %p12_p8 = scmp.ge.s32.totalorder %s15_s22, 6   ;;  %s1220_s19 = smov %s996_s21 }
 0x117   : > { %s1221_s20 = smov %s1224_s23  ;;  %s1222_s21 = smov %s1228_s24 }
 0x118   :  { %14 = sbr.rel (!%p12_p8) target bundleno = 3 (0x3), region = 73 }

// kernel: fpn_forward.13
= control target key start
LH: loop header
LB: loop body
LE: loop exit
PB: predicated region body
PF: predicated region fallthrough
CT: control target
= control target key end

     0   :  { %8 = vsyncpa [#allocation4], 0  ;;  %s2352_s0 = inlined_call_operand.vmem [shape: f32[2,64,32], index: 0, kind: input, shape index: {}]   ;;  %s2353_s1 = inlined_call_operand.vmem [shape: bf16[9,32,32], index: 1, kind: input, shape index: {}]   ;;  %s2354_s2 = inlined_call_operand.vmem [shape: f32[1,32], index: 2, kind: input, shape index: {}]   ;;  %s2355_s3 = inlined_call_operand.hbm [shape: f32[2,64,32], index: 3, kind: output, shape index: {}]  }
   0x1   :  { %10 = vsyncpa [#allocation4 + $0x1], 0  ;;  %s1978_s12 = smov 0   ;;  %s1980_s13 = smov 0  }
   0x2   :  { %s1982_s14 = smov 0   ;;  %s1984_s15 = smov 0  }
   0x3   :  { %s1986_s16 = smov 0   ;;  %s1988_s17 = smov 0  }
   0x4 LB: > { %s1482_s18 = sadd.s32 4294967295, %s1952_s17   ;;  %s1483_s19 = sadd.s32 4294967294, %s1952_s17   ;;  %s1952_s17 = sphi %s1988_s17, %s16_s17   ;;  %s1948_s16 = sphi %s1986_s16, %s2394_s16   ;;  %s1944_s15 = sphi %s1984_s15, %s2393_s15   ;;  %s1940_s14 = sphi %s1982_s14, %s2392_s14   ;;  %s1936_s13 = sphi %s1980_s13, %s2391_s13   ;;  %s1932_s12 = sphi %s1978_s12, %s2390_s12  }
   0x5   : > { %s28_s20 = sadd.s32 1, %s1948_s16  ;;  %s107_s21 = sadd.s32 1, %s1940_s14 }
   0x6   : > { %p30_p0 = scmp.ge.s32.totalorder %s28_s20, 2  ;;  %p117_p1 = scmp.ne.s32.totalorder %s1940_s14, %s1936_s13 }
   0x7   : > { %p118_p2 = scmp.eq.s32.totalorder %s1482_s18, 1  ;;  %p123_p3 = scmp.ne.s32.totalorder %s1936_s13, %s1932_s12 }
   0x8   : > { %s2396_s20 = smov (%p30_p0, %s28_s20), 0  ;;  %p124_p5 = scmp.eq.s32.totalorder %s1483_s19, 1 }
   0x9   : > { %p2018_p4 = por %p118_p2, %p117_p1  ;;  %s102_s23 = ssub.s32 %s1948_s16, %s2396_s20 }
   0xa   : > { %p1486_p6 = scmp.ge.s32.totalorder %s1952_s17, 1  ;;  %p105_p7 = scmp.eq.s32.totalorder %s102_s23, 0 }
   0xb   : > { %p2025_p8 = por %p124_p5, %p123_p3  ;;  %p161_p9 = scmp.lt.s32.totalorder %s1952_s17, 3 }
   0xc   : > { %s2031_s25 = scalar_select %p105_p7, %s1940_s14, %s107_s21  }
   0xd   : > { %p162_p10 = pnand %p1486_p6, %p161_p9 }
   0xe   : > { %v1856_v0 = vld [vmem:[%s2353_s1 + $0x30] sm:$0xff] (!%p162_p10)   ;;  %p190_p11 = scmp.lt.s32.totalorder (!%p162_p10), %s1944_s15, 1  ;;  %v1857_v1 = vld [vmem:[%s2353_s1] sm:$0xff] (!%p162_p10)   ;;  %vm209_vm0 = vcmask (!%p162_p10), 261120   ;;  %v1858_v2 = vld [vmem:[%s2353_s1 + $0x38] sm:$0xff] (!%p162_p10)   ;;  %vm211_vm1 = vcmask (!%p162_p10), 253952  }
   0xf   : > { %165 = sbr.rel (%p162_p10) target bundleno = 342 (0x156), region = 32  ;;  %1638 = vmatprep.subr.bf16.mxu1 (!%p162_p10), %v1856_v0  ;;  %1650 = vmatprep.subr.bf16.mxu0 (!%p162_p10), %v1857_v1  ;;  %v1859_v3 = vld [vmem:[%s2353_s1 + $0x8] sm:$0xff] (!%p162_p10)   ;;  %v1954_v4 = vmov (!%p162_p10), 0.0   ;;  %v1860_v5 = vld [vmem:[%s2353_s1 + $0x60] sm:$0xff] (!%p162_p10)   ;;  %v1862_v29 = vld [vmem:[%s2353_s1 + $0x50] sm:$0xff] (!%p162_p10)   ;;  %s1955_s27 = smov (!%p162_p10), [#allocation3]  }
  0x10   : > { %1639 = vmatpush3.bf16.msra.mxu1 (!%p162_p10), %v1856_v0  ;;  %1651 = vmatpush3.bf16.msra.mxu0 (!%p162_p10), %v1857_v1  ;;  %210 = vst.msk [vmem:[#allocation2] sm:$0xff] (!%p162_p10), %vm209_vm0, %v1954_v4  ;;  %213 = vst.msk [vmem:[#allocation2 + $0x49] sm:$0xff] (!%p162_p10), %vm209_vm0, %v1954_v4  ;;  %v1861_v26 = vld [vmem:[%s2353_s1 + $0x68] sm:$0xff] (!%p162_p10)   ;;  %v1863_v30 = vld [vmem:[%s2353_s1 + $0x40] sm:$0xff] (!%p162_p10)   ;;  %s1878_s28 = sshll.u32 (!%p162_p10), %s1955_s27, 4  ;;  %s1879_s28 = int_to_ptr.vmem [resolvable:$false] %s1878_s28 }
  0x11   : > { %1640 = vmatprep.subr.bf16.mxu1 (!%p162_p10), %v1858_v2  ;;  %1652 = vmatprep.subr.bf16.mxu0 (!%p162_p10), %v1859_v3  ;;  %212 = vst.msk [vmem:[#allocation2 + $0x8] sm:$0x1] (!%p162_p10), %vm211_vm1, %v1954_v4  ;;  %214 = vst.msk [vmem:[#allocation2 + $0x51] sm:$0x1] (!%p162_p10), %vm211_vm1, %v1954_v4  ;;  %v1864_v34 = vld [vmem:[%s2353_s1 + $0x58] sm:$0xff] (!%p162_p10)   ;;  %v1867_v38 = vld [vmem:[%s2353_s1 + $0x20] sm:$0xff] (!%p162_p10)  }
  0x12   : > { %v1865_v43 = vld [vmem:[%s2353_s1 + $0x48] sm:$0xff] (!%p162_p10)   ;;  %v1866_v49 = vld [vmem:[%s2353_s1 + $0x10] sm:$0xff] (!%p162_p10)   ;;  %v1868_v57 = vld [vmem:[%s2353_s1 + $0x18] sm:$0xff] (!%p162_p10)   ;;  %s1880_s29 = scalar_lea.vmem (!%p162_p10), %s1879_s28, 2048 }
  0x13   : > { %v1869_v59 = vld [vmem:[%s2353_s1 + $0x28] sm:$0xff] (!%p162_p10)  }
  0x14   : > { %1641 = vmatpush3.bf16.msra.mxu1 (!%p162_p10), %v1858_v2  ;;  %1653 = vmatpush3.bf16.msra.mxu0 (!%p162_p10), %v1859_v3 }
  0x15   : > { %1746 = vmatprep.subr.bf16.mxu1 (!%p162_p10), %v1857_v1  ;;  %1662 = vmatprep.subr.bf16.mxu0 (!%p162_p10), %v1860_v5 }
  0x16   : > { %s191_s5 = scalar_select %p190_p11, %s1944_s15, 1 }
  0x17   : > { %v224_v14 = vld [vmem:[#allocation2] sm:$0xff] }
  0x18   : > { %s1582_s8 = sshll.u32 %s191_s5, 6  ;;  %v542_v0 = vld [vmem:[#allocation2 + $0x1] sm:$0xff] }
  0x19   : > { %s197_s11 = scalar_lea.vmem %s2352_s0, %s1582_s8  ;;  %s186_s8 = sand.u32 1, %s1936_s13  }
  0x1a   : > { %v201_v6 = vld [vmem:[%s197_s11] sm:$0xff]  ;;  %v202_v7 = vld [vmem:[%s197_s11 + $0x8] sm:$0xff]  ;;  %v203_v8 = vld [vmem:[%s197_s11 + $0x10] sm:$0xff]  ;;  %s1487_s9 = sshll.u32 %s186_s8, 6  ;;  %s2306_s23 = scalar_lea.sflag [#allocation4], %s186_s8 }
  0x1b   : > { %v204_v9 = vld [vmem:[%s197_s11 + $0x18] sm:$0xff]  ;;  %215 = vst.msk [vmem:[#allocation2 + $0x9] sm:$0xff] %vm209_vm0, %v201_v6  ;;  %216 = vst.msk [vmem:[#allocation2 + $0x11] sm:$0xff] %vm209_vm0, %v202_v7  ;;  %v205_v10 = vld [vmem:[%s197_s11 + $0x20] sm:$0xff]  ;;  %s2223_s10 = scalar_lea.vmem [#allocation3], %s1487_s9 }
  0x1c   : > { %217 = vst.msk [vmem:[#allocation2 + $0x19] sm:$0xff] %vm209_vm0, %v203_v8  ;;  %v206_v11 = vld [vmem:[%s197_s11 + $0x28] sm:$0xff]  ;;  %218 = vst.msk [vmem:[#allocation2 + $0x21] sm:$0xff] %vm209_vm0, %v204_v9  ;;  %v207_v12 = vld [vmem:[%s197_s11 + $0x30] sm:$0xff]  ;;  %s1403_s18 = sshll.u32 %s2223_s10, 4  ;;  %s2296_s18 = int_to_ptr.vmem [resolvable:$true] %s1403_s18 }
  0x1d   : > { %219 = vst.msk [vmem:[#allocation2 + $0x29] sm:$0xff] %vm209_vm0, %v205_v10  ;;  %220 = vst.msk [vmem:[#allocation2 + $0x31] sm:$0xff] %vm209_vm0, %v206_v11  ;;  %v208_v13 = vld [vmem:[%s197_s11 + $0x38] sm:$0xff]  ;;  %s1583_s11 = sshll.u32 %s1944_s15, 10  ;;  %s1874_s26 = scalar_lea.vmem %s2296_s18, 1024 }
  0x1e   : > { %221 = vst.msk [vmem:[#allocation2 + $0x39] sm:$0xff] %vm209_vm0, %v207_v12  ;;  %222 = vst.msk [vmem:[#allocation2 + $0x41] sm:$0xff] %vm209_vm0, %v208_v13  ;;  %v1872_v11 = vld [vmem:[%s2353_s1 + $0x78] sm:$0xff]   ;;  %v1873_v13 = vld [vmem:[%s2353_s1 + $0x88] sm:$0xff]   ;;  %s2294_s21 = scalar_lea.hbm %s2355_s3, %s1583_s11  ;;  %p1875_p12 = scmp.ne.s32.totalorder %s2296_s18, %s1874_s26 }
  0x1f   : > { %p1881_p1 = scmp.lt.s32.totalorder %s2296_s18, %s1879_s28  ;;  %p1882_p2 = scmp.lt.s32.totalorder %s1880_s29, %s1874_s26 }
  0x20   : > { %p1876_p13 = pnand %p1875_p12, %p2018_p4 }
  0x21   : > { %p1883_p3 = por %p1882_p2, %p1881_p1 }
  0x22   : > { %v225_v15 = vld [vmem:[#allocation2 + $0x8] sm:$0xff]  ;;  %v226_v16 = vld [vmem:[#allocation2 + $0x10] sm:$0xff]  ;;  %p1877_p0 = pneg %p1876_p13 }
  0x23   : > { %v227_v17 = vld [vmem:[#allocation2 + $0x18] sm:$0xff]  ;;  %v228_v18 = vld [vmem:[#allocation2 + $0x20] sm:$0xff]  ;;  %v241_v20 = vpack.c.bf16 %v226_v16, %v225_v15  ;;  %v232_v21 = vpack.c.bf16 %v225_v15, %v224_v14  ;;  %v543_v36 = vld [vmem:[#allocation2 + $0x9] sm:$0xff] }
  0x24   : > { %v233_v19 = vpack.c.bf16 %v227_v17, %v226_v16  ;;  %v229_v22 = vld [vmem:[#allocation2 + $0x28] sm:$0xff]  ;;  %v230_v23 = vld [vmem:[#allocation2 + $0x30] sm:$0xff]  ;;  %v242_v24 = vpack.c.bf16 %v228_v18, %v227_v17  ;;  %v545_v45 = vld [vmem:[#allocation2 + $0x19] sm:$0xff]  ;;  %v550_v6 = vpack.c.bf16 %v543_v36, %v542_v0  ;;  %p1884_p5 = pnand %p1883_p3, %p1877_p0 }
  0x25   : > { %v243_v25 = vpack.c.bf16 %v230_v23, %v229_v22  ;;  %1642 = vmatprep.mubr.msk.bf16.mxu1 %vm209_vm0, %v241_v20  ;;  %1654 = vmatprep.mubr.msk.bf16.mxu0 %vm209_vm0, %v232_v21  ;;  %v231_v27 = vld [vmem:[#allocation2 + $0x38] sm:$0xff]  ;;  %v240_v28 = vld [vmem:[#allocation2 + $0x40] sm:$0xff]  ;;  %v437_v32 = vpack.c.bf16 %v229_v22, %v228_v18  ;;  %v435_v35 = vld [vmem:[#allocation2 + $0x48] sm:$0xff] }
  0x26   : > { %1643 = vmatmul.mubr.msk.bf16.vlgmr.msra.gmra.mrb[0].mxu1 %vm209_vm0, %v242_v24  ;;  %1655 = vmatmul.mubr.msk.bf16.vlgmr.msra.gmra.mrb[0].mxu0 %vm209_vm0, %v233_v19  ;;  %v244_v31 = vpack.c.bf16 %v240_v28, %v231_v27  ;;  %v235_v33 = vpack.c.bf16 %v231_v27, %v230_v23  ;;  %v544_v37 = vld [vmem:[#allocation2 + $0x11] sm:$0xff]  ;;  %v439_v41 = vpack.c.bf16 %v435_v35, %v240_v28  ;;  %v546_v46 = vld [vmem:[#allocation2 + $0x21] sm:$0xff]  ;;  %v547_v50 = vld [vmem:[#allocation2 + $0x29] sm:$0xff] }
  0x27   : > { %1748 = vmatpush3.bf16.msra.mxu1 %v1857_v1  ;;  %1663 = vmatpush3.bf16.msra.mxu0 %v1860_v5  ;;  %v862_v39 = vld [vmem:[#allocation2 + $0xa] sm:$0xff]  ;;  %v863_v40 = vld [vmem:[#allocation2 + $0x12] sm:$0xff]  ;;  %v560_v42 = vpack.c.bf16 %v544_v37, %v543_v36  ;;  %v864_v47 = vld [vmem:[#allocation2 + $0x1a] sm:$0xff]  ;;  %v561_v52 = vpack.c.bf16 %v546_v46, %v545_v45  ;;  %v551_v8 = vpack.c.bf16 %v545_v45, %v544_v37 }
  0x28   : > { %1646 = vmatprep.mubr.msk.bf16.mxu1 %vm209_vm0, %v243_v25  ;;  %1664 = vmatprep.subr.bf16.mxu0 %v1861_v26  ;;  %v879_v44 = vpack.c.bf16 %v863_v40, %v862_v39  ;;  %v865_v48 = vld [vmem:[#allocation2 + $0x22] sm:$0xff]  ;;  %v548_v51 = vld [vmem:[#allocation2 + $0x31] sm:$0xff]  ;;  %v549_v60 = vld [vmem:[#allocation2 + $0x39] sm:$0xff]  ;;  %v870_v9 = vpack.c.bf16 %v864_v47, %v863_v40  ;;  %v552_v10 = vpack.c.bf16 %v547_v50, %v546_v46 }
  0x29   : > { %1747 = vmatprep.subr.bf16.mxu1 %v1859_v3  ;;  %1666 = vmatprep.mubr.msk.bf16.mxu0 %vm209_vm0, %v233_v19  ;;  %v880_v53 = vpack.c.bf16 %v865_v48, %v864_v47  ;;  %v866_v54 = vld [vmem:[#allocation2 + $0x2a] sm:$0xff]  ;;  %v867_v55 = vld [vmem:[#allocation2 + $0x32] sm:$0xff]  ;;  %v562_v56 = vpack.c.bf16 %v548_v51, %v547_v50  ;;  %v559_v61 = vld [vmem:[#allocation2 + $0x41] sm:$0xff]  ;;  %v553_v14 = vpack.c.bf16 %v549_v60, %v548_v51 }
  0x2a   : > { %v881_v58 = vpack.c.bf16 %v867_v55, %v866_v54  ;;  %v868_v62 = vld [vmem:[#allocation2 + $0x3a] sm:$0xff]  ;;  %v878_v63 = vld [vmem:[#allocation2 + $0x42] sm:$0xff]  ;;  %v1870_v1 = vld [vmem:[%s2353_s1 + $0x70] sm:$0xff]   ;;  %v563_v4 = vpack.c.bf16 %v559_v61, %v549_v60  ;;  %v871_v12 = vpack.c.bf16 %v866_v54, %v865_v48 }
  0x2b   : > { %1665 = vmatpush3.bf16.msra.mxu0 %v1861_v26  ;;  %1749 = vmatpush3.bf16.msra.mxu1 %v1859_v3  ;;  %v861_v2 = vld [vmem:[#allocation2 + $0x2] sm:$0xff]  ;;  %v882_v5 = vpack.c.bf16 %v878_v63, %v868_v62  ;;  %v872_v15 = vpack.c.bf16 %v868_v62, %v867_v55  ;;  %v1073_v17 = vld [vmem:[#allocation2 + $0x4a] sm:$0xff] }
  0x2c   : > { %1710 = vmatprep.subr.bf16.mxu0 %v1862_v29  ;;  %1674 = vmatprep.subr.bf16.mxu1 %v1863_v30  ;;  %v1871_v3 = vld [vmem:[%s2353_s1 + $0x80] sm:$0xff]   ;;  %v869_v7 = vpack.c.bf16 %v862_v39, %v861_v2  ;;  %v754_v16 = vld [vmem:[#allocation2 + $0x49] sm:$0xff]  ;;  %v1077_v19 = vpack.c.bf16 %v1073_v17, %v878_v63 }
  0x2d   : > { %v758_v18 = vpack.c.bf16 %v754_v16, %v559_v61 }
  0x2e   : > { %1647 = vmatmul.mubr.msk.bf16.gmra.mrb[4].mxu1 %vm209_vm0, %v244_v31 }
  0x2f   : > { %1658 = vmatprep.mubr.msk.bf16.mxu1 %vm209_vm0, %v437_v32 }
  0x32   : > { %1667 = vmatmul.mubr.msk.bf16.vlgmr.msra.gmra.mrb[0].mxu0 %vm209_vm0, %v437_v32 }
  0x33   : > { %1711 = vmatpush3.bf16.msra.mxu0 %v1862_v29  ;;  %1670 = vmatprep.mubr.msk.bf16.mxu0 %vm209_vm0, %v235_v33 }
  0x34   : > { %1712 = vmatprep.subr.bf16.mxu0 %v1864_v34 }
  0x37   : > { %1713 = vmatpush3.bf16.msra.mxu0 %v1864_v34 }
  0x38   : > { %1722 = vmatprep.subr.bf16.mxu0 %v1867_v38 }
  0x3a   : > { %1659 = vmatmul.mubr.msk.bf16.vlgmr.msra.gmra.mrb[4].mxu1 %vm209_vm0, %v235_v33  ;;  %1671 = vmatmul.mubr.msk.bf16.gmra.mrb[4].mxu0 %vm209_vm0, %v439_v41 }
  0x3b   : > { %1675 = vmatpush3.bf16.msra.mxu1 %v1863_v30  ;;  %1678 = vmatprep.mubr.msk.bf16.mxu1 %vm209_vm0, %v560_v42 }
  0x3c   : > { %1676 = vmatprep.subr.bf16.mxu1 %v1865_v43  ;;  %1714 = vmatprep.mubr.msk.bf16.mxu0 %vm209_vm0, %v879_v44  ;;  %v1180_v44 = vlaneseq }
  0x3e   : > { %v1181_v45 = vshrl.u32 %v1180_v44, 7 }
  0x3f   : > { %1677 = vmatpush3.bf16.msra.mxu1 %v1865_v43 }
  0x40   : > { %1686 = vmatprep.subr.bf16.mxu1 %v1866_v49  ;;  %v1183_v46 = vadd.s32 16, %v1181_v45  ;;  %v1184_v47 = vadd.s32 24, %v1181_v45  ;;  %v1182_v48 = vadd.s32 8, %v1181_v45  ;;  %v1193_v50 = vand.u32 7, %v1181_v45 }
  0x41   : > { %v2150_v54 = vadd.s32 32, %v1181_v45  ;;  %v2152_v55 = vadd.s32 56, %v1181_v45 }
  0x42   : > { %1679 = vmatmul.mubr.msk.bf16.vlgmr.msra.gmra.mrb[8].mxu1 %vm209_vm0, %v561_v52  ;;  %1715 = vmatmul.mubr.msk.bf16.vlgmr.msra.gmra.mrb[8].mxu0 %vm209_vm0, %v880_v53  ;;  %v1214_v51 = vand.u32 7, %v1184_v47  ;;  %v1200_v52 = vand.u32 7, %v1182_v48  ;;  %v1187_v53 = vadd.s32 48, %v1181_v45  ;;  %vm2166_vm3 = vcmp.gt.s32.totalorder %v1193_v50, 0 }
  0x43   : > { %1687 = vmatpush3.bf16.msra.mxu1 %v1866_v49  ;;  %1723 = vmatpush3.bf16.msra.mxu0 %v1867_v38  ;;  %v1207_v49 = vand.u32 7, %v1183_v46  ;;  %v1221_v63 = vand.u32 7, %v2150_v54  ;;  %v1242_v2 = vand.u32 7, %v2152_v55  ;;  %vm2191_vm7 = vcmp.lt.s32.totalorder %v1193_v50, 7 }
  0x44   : > { %1682 = vmatprep.mubr.msk.bf16.mxu1 %vm209_vm0, %v562_v56  ;;  %1688 = vmatprep.subr.bf16.mxu1 %v1868_v57  ;;  %v2154_v56 = vadd.s32 40, %v1181_v45  ;;  %vm2170_vm4 = vcmp.gt.s32.totalorder %v1214_v51, 0  ;;  %vm2174_vm5 = vcmp.gt.s32.totalorder %v1200_v52, 0  ;;  %v1235_v62 = vand.u32 7, %v1187_v53 }
  0x45   : > { %1718 = vmatprep.mubr.msk.bf16.mxu0 %vm209_vm0, %v881_v58  ;;  %1724 = vmatprep.subr.bf16.mxu0 %v1869_v59  ;;  %vm2162_vm2 = vcmp.gt.s32.totalorder %v1207_v49, 0  ;;  %vm2184_vm6 = vcmp.lt.s32.totalorder %v1207_v49, 7  ;;  %vm2195_vm8 = vcmp.lt.s32.totalorder %v1214_v51, 7  ;;  %vm2202_vm9 = vcmp.lt.s32.totalorder %v1200_v52, 7 }
  0x46   : > { %vm2219_vm10 = vcmp.gt.s32.totalorder %v1235_v62, 0  ;;  %vm2229_vm11 = vcmp.gt.s32.totalorder %v1221_v63, 0  ;;  %vm2235_vm12 = vcmp.gt.s32.totalorder %v1242_v2, 0  ;;  %vm2246_vm14 = vcmp.lt.s32.totalorder %v1235_v62, 7 }
  0x47   : > { %1689 = vmatpush3.bf16.msra.mxu1 %v1868_v57  ;;  %1725 = vmatpush3.bf16.msra.mxu0 %v1869_v59  ;;  %v2159_v57 = vld [vmem:[%s2354_s2] ss:$0 sm:$0xff]  ;;  %vm2256_vm15 = vcmp.lt.s32.totalorder %v1221_v63, 7  ;;  %vm2260_vm1 = vcmp.lt.s32.totalorder %v1242_v2, 7 }
  0x48   : > { %1698 = vmatprep.subr.bf16.mxu1 %v1870_v1  ;;  %1734 = vmatprep.subr.bf16.mxu0 %v1871_v3 }
  0x4a   : > { %1683 = vmatmul.mubr.msk.bf16.gmra.mrb[12].mxu1 %vm209_vm0, %v563_v4  ;;  %1719 = vmatmul.mubr.msk.bf16.gmra.mrb[12].mxu0 %vm209_vm0, %v882_v5 }
  0x4b   : > { %1690 = vmatprep.mubr.msk.bf16.mxu1 %vm209_vm0, %v550_v6  ;;  %1726 = vmatprep.mubr.msk.bf16.mxu0 %vm209_vm0, %v869_v7 }
  0x52   : > { %1691 = vmatmul.mubr.msk.bf16.vlgmr.msra.gmra.mrb[8].mxu1 %vm209_vm0, %v551_v8  ;;  %1727 = vmatmul.mubr.msk.bf16.vlgmr.msra.gmra.mrb[8].mxu0 %vm209_vm0, %v870_v9 }
  0x53   : > { %1699 = vmatpush3.bf16.msra.mxu1 %v1870_v1  ;;  %1735 = vmatpush3.bf16.msra.mxu0 %v1871_v3  ;;  %v1228_v3 = vand.u32 7, %v2154_v56 }
  0x54   : > { %1694 = vmatprep.mubr.msk.bf16.mxu1 %vm209_vm0, %v552_v10  ;;  %1700 = vmatprep.subr.bf16.mxu1 %v1872_v11 }
  0x55   : > { %1730 = vmatprep.mubr.msk.bf16.mxu0 %vm209_vm0, %v871_v12  ;;  %1736 = vmatprep.subr.bf16.mxu0 %v1873_v13  ;;  %vm2239_vm13 = vcmp.gt.s32.totalorder %v1228_v3, 0 }
  0x57   : > { %1701 = vmatpush3.bf16.msra.mxu1 %v1872_v11  ;;  %1737 = vmatpush3.bf16.msra.mxu0 %v1873_v13 }
  0x5a   : > { %1695 = vmatmul.mubr.msk.bf16.gmra.mrb[12].mxu1 %vm209_vm0, %v553_v14  ;;  %1731 = vmatmul.mubr.msk.bf16.gmra.mrb[12].mxu0 %vm209_vm0, %v872_v15 }
  0x5b   : > { %1702 = vmatprep.mubr.msk.bf16.mxu1 %vm209_vm0, %v551_v8  ;;  %1738 = vmatprep.mubr.msk.bf16.mxu0 %vm209_vm0, %v870_v9 }
  0x62   : > { %1703 = vmatmul.mubr.msk.bf16.vlgmr.msra.gmra.mrb[8].mxu1 %vm209_vm0, %v552_v10  ;;  %1739 = vmatmul.mubr.msk.bf16.vlgmr.msra.gmra.mrb[8].mxu0 %vm209_vm0, %v871_v12 }
  0x63   : > { %1706 = vmatprep.mubr.msk.bf16.mxu1 %vm209_vm0, %v553_v14  ;;  %1742 = vmatprep.mubr.msk.bf16.mxu0 %vm209_vm0, %v872_v15 }
  0x6a   : > { %1707 = vmatmul.mubr.msk.bf16.gmra.mrb[12].mxu1 %vm209_vm0, %v758_v18  ;;  %1743 = vmatmul.mubr.msk.bf16.gmra.mrb[12].mxu0 %vm209_vm0, %v1077_v19 }
  0xf9   : > { %v1644_v20 = vpop.f32.mrb[0].mxu1 }
  0xfa   : > { %v308_v21 = vpop.f32.mrb[1].mxu1 }
  0xfb   : > { %v1645_v22 = vpop.f32.mrb[2].mxu1 }
  0xfc   : > { %v311_v23 = vpop.f32.mrb[3].mxu1 }
 0x105   : > { %v1668_v24 = vpop.f32.mrb[0].mxu0 }
 0x106   : > { %v1750_v25 = vadd.f32 %v1668_v24, %v1644_v20  ;;  %v503_v26 = vpop.f32.mrb[1].mxu0 }
 0x107   : > { %v1751_v27 = vadd.f32 %v503_v26, %v308_v21  ;;  %v1669_v28 = vpop.f32.mrb[2].mxu0 }
 0x108   : > { %v2138_v29 = vadd.f32 %v1669_v28, %v1645_v22  ;;  %v506_v30 = vpop.f32.mrb[3].mxu0  ;;  %v1325_v8 = vsel %vm2162_vm2, %v1750_v25, 0.0  ;;  %vm2268_vm2 = vcmp.lt.s32.totalorder %v1228_v3, 7 }
 0x109   : > { %v2140_v31 = vadd.f32 %v506_v30, %v311_v23  ;;  %v1323_v14 = vsel %vm2166_vm3, %v1751_v27, 0.0 }
 0x10a   : > { %v1326_v20 = vsel %vm2170_vm4, %v2138_v29, 0.0 }
 0x10b   : > { %v1324_v24 = vsel %vm2174_vm5, %v2140_v31, 0.0 }
 0x10d   : > { %v1660_v32 = vpop.f32.mrb[4].mxu1  ;;  %v1672_v33 = vpop.f32.mrb[4].mxu0 }
 0x10e   : > { %v2142_v34 = vadd.f32 %v1672_v33, %v1660_v32  ;;  %v413_v35 = vpop.f32.mrb[5].mxu1  ;;  %v519_v36 = vpop.f32.mrb[5].mxu0 }
 0x10f   : > { %v2144_v37 = vadd.f32 %v519_v36, %v413_v35  ;;  %v1661_v38 = vpop.f32.mrb[6].mxu1  ;;  %v1673_v39 = vpop.f32.mrb[6].mxu0 }
 0x110   : > { %v2146_v40 = vadd.f32 %v1673_v39, %v1661_v38  ;;  %v416_v41 = vpop.f32.mrb[7].mxu1  ;;  %v522_v42 = vpop.f32.mrb[7].mxu0  ;;  %v1329_v48 = vsel %vm2219_vm10, %v2142_v34, 0.0 }
 0x111   : > { %v2148_v43 = vadd.f32 %v522_v42, %v416_v41  ;;  %v1327_v34 = vsel %vm2229_vm11, %v2144_v37, 0.0 }
 0x112   : > { %v1330_v60 = vsel %vm2235_vm12, %v2146_v40, 0.0 }
 0x113   : > { %v1328_v63 = vsel %vm2239_vm13, %v2148_v43, 0.0 }
 0x135   : > { %v1704_v0 = vpop.f32.mrb[8].mxu1  ;;  %v1740_v1 = vpop.f32.mrb[8].mxu0 }
 0x136   : > { %v1293_v4 = vadd.f32 %v1704_v0, %v2159_v57  ;;  %v822_v6 = vpop.f32.mrb[9].mxu1  ;;  %v1141_v7 = vpop.f32.mrb[9].mxu0  ;;  %v1365_v21 = vsel %vm2184_vm6, %v1740_v1, 0.0 }
 0x137   : > { %v1291_v9 = vadd.f32 %v2159_v57, %v822_v6  ;;  %v1705_v11 = vpop.f32.mrb[10].mxu1  ;;  %v1741_v12 = vpop.f32.mrb[10].mxu0  ;;  %v1363_v26 = vsel %vm2191_vm7, %v1141_v7, 0.0 }
 0x138   : > { %v1333_v15 = vadd.f32 %v1325_v8, %v1293_v4  ;;  %v1294_v16 = vadd.f32 %v1705_v11, %v2159_v57  ;;  %v825_v17 = vpop.f32.mrb[11].mxu1  ;;  %v1144_v18 = vpop.f32.mrb[11].mxu0  ;;  %v1366_v30 = vsel %vm2195_vm8, %v1741_v12, 0.0 }
 0x139   : > { %v1331_v22 = vadd.f32 %v1323_v14, %v1291_v9  ;;  %v1292_v23 = vadd.f32 %v2159_v57, %v825_v17  ;;  %v1364_v33 = vsel %vm2202_vm9, %v1144_v18, 0.0 }
 0x13a   : > { %v1373_v25 = vadd.f32 %v1365_v21, %v1333_v15  ;;  %v1334_v27 = vadd.f32 %v1326_v20, %v1294_v16 }
 0x13b   : > { %v1371_v28 = vadd.f32 %v1363_v26, %v1331_v22  ;;  %v1332_v29 = vadd.f32 %v1324_v24, %v1292_v23 }
 0x13c   : > { %1381 = vst.msk [vmem:[%s2223_s10 + $0x10] sm:$0xff] %vm209_vm0, %v1373_v25  ;;  %v1374_v31 = vadd.f32 %v1366_v30, %v1334_v27 }
 0x13d   : > { %1379 = vst.msk [vmem:[%s2223_s10] sm:$0xff] %vm209_vm0, %v1371_v28  ;;  %v1372_v36 = vadd.f32 %v1364_v33, %v1332_v29  ;;  %v1708_v38 = vpop.f32.mrb[12].mxu1  ;;  %v1744_v39 = vpop.f32.mrb[12].mxu0 }
 0x13e   : > { %1382 = vst.msk [vmem:[%s2223_s10 + $0x18] sm:$0xff] %vm209_vm0, %v1374_v31  ;;  %v1297_v44 = vadd.f32 %v1708_v38, %v2159_v57  ;;  %v838_v46 = vpop.f32.mrb[13].mxu1  ;;  %v1157_v47 = vpop.f32.mrb[13].mxu0  ;;  %v1369_v61 = vsel %vm2246_vm14, %v1744_v39, 0.0 }
 0x13f   : > { %1380 = vst.msk [vmem:[%s2223_s10 + $0x8] sm:$0xff] %vm209_vm0, %v1372_v36  ;;  %v1295_v49 = vadd.f32 %v2159_v57, %v838_v46  ;;  %v1709_v51 = vpop.f32.mrb[14].mxu1  ;;  %v1745_v52 = vpop.f32.mrb[14].mxu0  ;;  %v1367_v40 = vsel %vm2256_vm15, %v1157_v47, 0.0 }
 0x140   : > { %v1337_v54 = vadd.f32 %v1329_v48, %v1297_v44  ;;  %v1298_v55 = vadd.f32 %v1709_v51, %v2159_v57  ;;  %v841_v56 = vpop.f32.mrb[15].mxu1  ;;  %v1160_v58 = vpop.f32.mrb[15].mxu0  ;;  %v1370_v3 = vsel %vm2260_vm1, %v1745_v52, 0.0 }
 0x141   : > { %v1335_v62 = vadd.f32 %v1327_v34, %v1295_v49  ;;  %v1296_v37 = vadd.f32 %v2159_v57, %v841_v56  ;;  %v1368_v5 = vsel %vm2268_vm2, %v1160_v58, 0.0 }
 0x142   : > { %v1377_v0 = vadd.f32 %v1369_v61, %v1337_v54  ;;  %v1338_v1 = vadd.f32 %v1330_v60, %v1298_v55 }
 0x143   : > { %v1375_v2 = vadd.f32 %v1367_v40, %v1335_v62  ;;  %v1336_v57 = vadd.f32 %v1328_v63, %v1296_v37 }
 0x144   : > { %1385 = vst.msk [vmem:[%s2223_s10 + $0x30] sm:$0xff] %vm209_vm0, %v1377_v0  ;;  %v1378_v4 = vadd.f32 %v1370_v3, %v1338_v1 }
 0x145   : > { %1383 = vst.msk [vmem:[%s2223_s10 + $0x20] sm:$0xff] %vm209_vm0, %v1375_v2  ;;  %v1376_v43 = vadd.f32 %v1368_v5, %v1336_v57 }
 0x146   : > { %1386 = vst.msk [vmem:[%s2223_s10 + $0x38] sm:$0xff] %vm209_vm0, %v1378_v4 }
 0x147   : > { %1384 = vst.msk [vmem:[%s2223_s10 + $0x28] sm:$0xff] %vm209_vm0, %v1376_v43 }
 0x148   : > { %1887 = shalt.err (!%p1884_p5)
}
 0x149   : > { %s1888_s30 = scalar_lea.hbm %s2294_s21, 1024  ;;  %s1892_s6 = scalar_lea.hbm %s2355_s3, 2048 }
 0x14a   : > { %p1889_p6 = scmp.ne.s32.totalorder %s2294_s21, %s1888_s30  ;;  %p1893_p10 = scmp.lt.u32.totalorder %s2294_s21, %s2355_s3 }
 0x14b   : > { %p1894_p11 = scmp.lt.u32.totalorder %s1892_s6, %s1888_s30  ;;  %p1896_p13 = scmp.lt.u32.totalorder %s1888_s30, %s2294_s21 }
 0x14c   : > { %p1890_p7 = pnand %p1889_p6, %p2018_p4 }
 0x14d   : > { %p1895_p12 = por %p1894_p11, %p1893_p10 }
 0x14e   : > { %p1891_p9 = pneg %p1890_p7 }
 0x14f   : > { %p1897_p0 = por %p1896_p13, %p1895_p12 }
 0x151   : > { %p1898_p1 = pnand %p1897_p0, %p1891_p9 }
 0x153   : > { %1901 = shalt.err (!%p1898_p1)
}
 0x154   : > { %s1956_s9 = smov 128   ;;  %s1957_s10 = smov 8  }
 0x155   : > { %1798 = dma.vmem_to_hbm [thread:$0]  (%p2018_p4), %s2296_s18, 1024, %s2294_s21, %s2306_s23, %s1956_s9, %s1956_s9, %s1957_s10  }
 0x156 PF: > { %p1804_p2 = scmp.ge.s32.totalorder %s1952_s17, 2  ;;  %s1418_s11 = sand.u32 1, %s1932_s12  }
 0x157   : > { %s1419_s15 = scalar_lea.sflag [#allocation4], %s1418_s11 }
 0x158   : > { %p1801_p3 = pnand %p1804_p2, %p2025_p8 }
 0x15a   : > { %1927 = dma.done.wait (!%p1801_p3), %s1419_s15, 1024  }
 0x15b   : > { %1929 = vsyncadd (!%p1801_p3), %s1419_s15, 4294966272  ;;  %s16_s17 = sadd.s32 1, %s1952_s17   ;;  %s2390_s12 = smov %s1936_s13 }
 0x15c   : > { %p13_p5 = scmp.ge.s32.totalorder %s16_s17, 4   ;;  %s2391_s13 = smov %s1940_s14 }
 0x15d   : > { %s2392_s14 = smov %s2031_s25  ;;  %s2393_s15 = smov %s1948_s16 }
 0x15e   : > { %s2394_s16 = smov %s2396_s20  ;;  %15 = sbr.rel (!%p13_p5) target bundleno = 4 (0x4), region = 75 }
 0x165   :  { %1424 = vsyncpa [#allocation4], 1 }
 0x166   :  { %1426 = vsyncpa [#allocation4 + $0x1], 1 }

// kernel: fpn_forward.8
= control target key start
LH: loop header
LB: loop body
LE: loop exit
PB: predicated region body
PF: predicated region fallthrough
CT: control target
= control target key end

     0   :  { %s1089_s12 = smov 0   ;;  %s1091_s13 = smov 0   ;;  %s1199_s0 = inlined_call_operand.vmem [shape: f32[2,16,16], index: 0, kind: input, shape index: {}]   ;;  %s1200_s1 = inlined_call_operand.vmem [shape: bf16[9,16,32], index: 1, kind: input, shape index: {}]   ;;  %s1201_s2 = inlined_call_operand.vmem [shape: f32[1,32], index: 2, kind: input, shape index: {}]   ;;  %s1202_s3 = inlined_call_operand.vmem [shape: f32[2,16,32], index: 3, kind: output, shape index: {}]  }
   0x1   :  { %s1093_s14 = smov 0  }
   0x2 LB: > { %s25_s15 = sadd.s32 1, %s1061_s13  ;;  %p878_p0 = scmp.ge.s32.totalorder %s1065_s14, 1  ;;  %s1065_s14 = sphi %s1093_s14, %s13_s14   ;;  %s1061_s13 = sphi %s1091_s13, %s1204_s13   ;;  %s1057_s12 = sphi %s1089_s12, %s1203_s12  }
   0x3   : > { %p27_p1 = scmp.ge.s32.totalorder %s25_s15, 2  ;;  %p158_p2 = scmp.lt.s32.totalorder %s1065_s14, 3 }
   0x5   : > { %s1206_s15 = smov (%p27_p1, %s25_s15), 0  ;;  %p159_p3 = pnand %p878_p0, %p158_p2 }
   0x6   : > { %v1034_v0 = vld [vmem:[%s1200_s1] sm:$0xff] (!%p159_p3)   ;;  %v1067_v1 = vmov (!%p159_p3), 0.0   ;;  %v1035_v2 = vld [vmem:[%s1200_s1 + $0x18] sm:$0xff] (!%p159_p3)   ;;  %vm1068_vm0 = vmmov (!%p159_p3), 0   ;;  %p191_p4 = scmp.lt.s32.totalorder (!%p159_p3), %s1057_s12, 1  ;;  %vm213_vm1 = vcmask (!%p159_p3), 126976   ;;  %v729_v43 = vlaneseq (!%p159_p3) }
   0x7   : > { %162 = sbr.rel (%p159_p3) target bundleno = 291 (0x123), region = 32  ;;  %946 = vmatprep.subr.bf16.mxu0 (!%p159_p3), %v1067_v1  ;;  %940 = vmatprep.subr.bf16.mxu1 (!%p159_p3), %v1067_v1  ;;  %214 = vst.msk [vmem:[#allocation2] sm:$0x1f] (!%p159_p3), %vm213_vm1, %v1067_v1  ;;  %215 = vst.msk [vmem:[#allocation2 + $0x15] sm:$0x1f] (!%p159_p3), %vm213_vm1, %v1067_v1  ;;  %vm216_vm2 = vcmask (!%p159_p3), 130048  }
   0x8   : > { %947 = vmatpush3.bf16.msra.mxu0 (!%p159_p3), %v1034_v0  ;;  %942 = vmatprep.mubr.msk.bf16.mxu1 (!%p159_p3), %vm1068_vm0, %v1067_v1  ;;  %v1037_v5 = vld [vmem:[%s1200_s1 + $0x20] sm:$0xff] (!%p159_p3)   ;;  %v1036_v11 = vld [vmem:[%s1200_s1 + $0x30] sm:$0xff] (!%p159_p3)   ;;  %v1039_v16 = vld [vmem:[%s1200_s1 + $0x8] sm:$0xff] (!%p159_p3)   ;;  %v730_v48 = vshrl.u32 (!%p159_p3), %v729_v43, 7  ;;  %vm784_vm7 = vcmask (!%p159_p3), 261120  }
   0x9   : > { %941 = vmatpush3.bf16.msra.mxu1 (!%p159_p3), %v1035_v2  ;;  %948 = vmatprep.mubr.msk.bf16.mxu0 (!%p159_p3), %vm1068_vm0, %v1067_v1  ;;  %v1038_v21 = vld [vmem:[%s1200_s1 + $0x28] sm:$0xff] (!%p159_p3)   ;;  %v1041_v23 = vld [vmem:[%s1200_s1 + $0x38] sm:$0xff] (!%p159_p3)   ;;  %v1040_v28 = vld [vmem:[%s1200_s1 + $0x10] sm:$0xff] (!%p159_p3)  }
   0xa   : > { %952 = vmatprep.subr.bf16.mxu0 (!%p159_p3), %v1067_v1  ;;  %958 = vmatprep.subr.bf16.mxu1 (!%p159_p3), %v1067_v1  ;;  %v1042_v33 = vld [vmem:[%s1200_s1 + $0x40] sm:$0xff] (!%p159_p3)   ;;  %v731_v56 = vadd.s32 (!%p159_p3), 8, %v730_v48  ;;  %v736_v59 = vand.u32 (!%p159_p3), 3, %v730_v48 }
   0xb   : > { %v917_v61 = vld [vmem:[%s1201_s2] ss:$0 sm:$0xff] (!%p159_p3) }
   0xc   : > { %v743_v60 = vand.u32 (!%p159_p3), 3, %v731_v56  ;;  %vm764_vm3 = vcmp.gt.s32.totalorder (!%p159_p3), %v736_v59, 0  ;;  %vm774_vm5 = vcmp.lt.s32.totalorder (!%p159_p3), %v736_v59, 3 }
   0xe   : > { %s1208_s12 = smov (!%p191_p4, %s1057_s12), 1  ;;  %vm765_vm4 = vcmp.gt.s32.totalorder %v743_v60, 0  ;;  %vm775_vm6 = vcmp.lt.s32.totalorder %v743_v60, 3 }
   0xf   : > { %s920_s20 = sshll.u32 %s1208_s12, 4 }
  0x10   : > { %s198_s23 = scalar_lea.vmem %s1199_s0, %s920_s20  ;;  %s208_s19 = scalar_lea.vmem %s1202_s3, %s920_s20 }
  0x11   : > { %v211_v3 = vld [vmem:[%s198_s23] sm:$0xff]  ;;  %v212_v4 = vld [vmem:[%s198_s23 + $0x8] sm:$0xff] }
  0x12   : > { %217 = vst.msk [vmem:[#allocation2 + $0x5] sm:$0xff] %vm216_vm2, %v211_v3  ;;  %218 = vst.msk [vmem:[#allocation2 + $0xd] sm:$0xff] %vm216_vm2, %v212_v4 }
  0x19   : > { %v225_v6 = vld [vmem:[#allocation2 + $0x4] sm:$0xff]  ;;  %v226_v7 = vld [vmem:[#allocation2 + $0xc] sm:$0xff] }
  0x1a   : > { %v220_v8 = vld [vmem:[#allocation2] sm:$0xff]  ;;  %v227_v9 = vpack.c.bf16 %v226_v7, %v225_v6  ;;  %v221_v10 = vld [vmem:[#allocation2 + $0x8] sm:$0xff]  ;;  %v332_v17 = vld [vmem:[#allocation2 + $0x10] sm:$0xff] }
  0x1b   : > { %v222_v12 = vpack.c.bf16 %v221_v10, %v220_v8  ;;  %v395_v13 = vld [vmem:[#allocation2 + $0x5] sm:$0xff]  ;;  %v396_v14 = vld [vmem:[#allocation2 + $0xd] sm:$0xff]  ;;  %v333_v18 = vpack.c.bf16 %v332_v17, %v221_v10 }
  0x1c   : > { %943 = vmatmul.mubr.msk.bf16.vlgmr.msra.gmra.mrb[0].mxu1 %vm216_vm2, %v227_v9  ;;  %v397_v15 = vpack.c.bf16 %v396_v14, %v395_v13  ;;  %v389_v19 = vld [vmem:[#allocation2 + $0x1] sm:$0xff]  ;;  %v390_v20 = vld [vmem:[#allocation2 + $0x9] sm:$0xff]  ;;  %v502_v27 = vld [vmem:[#allocation2 + $0x11] sm:$0xff] }
  0x1d   : > { %949 = vmatmul.mubr.msk.bf16.vlgmr.msra.gmra.mrb[0].mxu0 %vm216_vm2, %v222_v12  ;;  %959 = vmatpush3.bf16.msra.mxu1 %v1037_v5  ;;  %v391_v22 = vpack.c.bf16 %v390_v20, %v389_v19  ;;  %v565_v24 = vld [vmem:[#allocation2 + $0x6] sm:$0xff]  ;;  %v566_v25 = vld [vmem:[#allocation2 + $0xe] sm:$0xff]  ;;  %v503_v29 = vpack.c.bf16 %v502_v27, %v390_v20 }
  0x1e   : > { %953 = vmatpush3.bf16.msra.mxu0 %v1036_v11  ;;  %960 = vmatprep.mubr.msk.bf16.mxu1 %vm1068_vm0, %v1067_v1  ;;  %v567_v26 = vpack.c.bf16 %v566_v25, %v565_v24  ;;  %v559_v30 = vld [vmem:[#allocation2 + $0x2] sm:$0xff]  ;;  %v560_v31 = vld [vmem:[#allocation2 + $0xa] sm:$0xff]  ;;  %v672_v34 = vld [vmem:[#allocation2 + $0x12] sm:$0xff] }
  0x1f   : > { %954 = vmatprep.mubr.msk.bf16.mxu0 %vm1068_vm0, %v1067_v1  ;;  %976 = vmatprep.subr.bf16.mxu0 %v1067_v1  ;;  %v561_v32 = vpack.c.bf16 %v560_v31, %v559_v30  ;;  %v673_v35 = vpack.c.bf16 %v672_v34, %v560_v31 }
  0x20   : > { %964 = vmatprep.subr.bf16.mxu1 %v1067_v1 }
  0x24   : > { %961 = vmatmul.mubr.msk.bf16.vlgmr.msra.gmra.mrb[4].mxu1 %vm216_vm2, %v397_v15 }
  0x25   : > { %965 = vmatpush3.bf16.msra.mxu1 %v1039_v16  ;;  %966 = vmatprep.mubr.msk.bf16.mxu1 %vm1068_vm0, %v1067_v1 }
  0x26   : > { %970 = vmatprep.subr.bf16.mxu1 %v1067_v1 }
  0x29   : > { %955 = vmatmul.mubr.msk.bf16.vlgmr.msra.gmra.mrb[0].mxu0 %vm216_vm2, %v333_v18 }
  0x2a   : > { %977 = vmatpush3.bf16.msra.mxu0 %v1038_v21  ;;  %978 = vmatprep.mubr.msk.bf16.mxu0 %vm1068_vm0, %v1067_v1 }
  0x2b   : > { %982 = vmatprep.subr.bf16.mxu0 %v1067_v1 }
  0x2c   : > { %967 = vmatmul.mubr.msk.bf16.vlgmr.msra.gmra.mrb[8].mxu1 %vm216_vm2, %v391_v22 }
  0x2d   : > { %971 = vmatpush3.bf16.msra.mxu1 %v1041_v23  ;;  %972 = vmatprep.mubr.msk.bf16.mxu1 %vm1068_vm0, %v1067_v1 }
  0x31   : > { %979 = vmatmul.mubr.msk.bf16.vlgmr.msra.gmra.mrb[4].mxu0 %vm216_vm2, %v567_v26 }
  0x32   : > { %983 = vmatpush3.bf16.msra.mxu0 %v1040_v28  ;;  %984 = vmatprep.mubr.msk.bf16.mxu0 %vm1068_vm0, %v1067_v1 }
  0x33   : > { %988 = vmatprep.subr.bf16.mxu0 %v1067_v1 }
  0x34   : > { %973 = vmatmul.mubr.msk.bf16.vlgmr.msra.gmra.mrb[12].mxu1 %vm216_vm2, %v503_v29 }
  0x3d   : > { %985 = vmatmul.mubr.msk.bf16.vlgmr.msra.gmra.mrb[4].mxu0 %vm216_vm2, %v561_v32 }
  0x3e   : > { %989 = vmatpush3.bf16.msra.mxu0 %v1042_v33  ;;  %990 = vmatprep.mubr.msk.bf16.mxu0 %vm1068_vm0, %v1067_v1 }
  0x49   : > { %991 = vmatmul.mubr.msk.bf16.vlgmr.msra.gmra.mrb[4].mxu0 %vm216_vm2, %v673_v35 }
  0xef   : > { %v274_v36 = vpop.f32.mrb[0].mxu1 }
  0xf0   : > { %v944_v37 = vpop.f32.mrb[1].mxu1 }
  0xf1   : > { %v277_v38 = vpop.f32.mrb[2].mxu1 }
  0xf2   : > { %v945_v39 = vpop.f32.mrb[3].mxu1 }
  0xf7   : > { %v444_v40 = vpop.f32.mrb[4].mxu1 }
  0xf8   : > { %v962_v41 = vpop.f32.mrb[5].mxu1 }
  0xf9   : > { %v447_v42 = vpop.f32.mrb[6].mxu1 }
  0xfa   : > { %v963_v44 = vpop.f32.mrb[7].mxu1 }
  0xfc   : > { %v380_v45 = vpop.f32.mrb[0].mxu0 }
  0xfd   : > { %v994_v46 = vadd.f32 %v380_v45, %v274_v36  ;;  %v956_v47 = vpop.f32.mrb[1].mxu0 }
  0xfe   : > { %v383_v49 = vpop.f32.mrb[2].mxu0 }
  0xff   : > { %v995_v50 = vadd.f32 %v383_v49, %v277_v38  ;;  %v957_v51 = vpop.f32.mrb[3].mxu0  ;;  %v494_v52 = vpop.f32.mrb[8].mxu1  ;;  %v770_v5 = vsel %vm764_vm3, %v994_v46, 0.0 }
 0x100   : > { %v495_v53 = vadd.f32 %v494_v52, %v444_v40  ;;  %v968_v54 = vpop.f32.mrb[9].mxu1 }
 0x101   : > { %v497_v55 = vpop.f32.mrb[10].mxu1  ;;  %v771_v8 = vsel %vm765_vm4, %v995_v50, 0.0 }
 0x102   : > { %v498_v57 = vadd.f32 %v497_v55, %v447_v42  ;;  %v969_v58 = vpop.f32.mrb[11].mxu1 }
 0x107   : > { %v550_v62 = vpop.f32.mrb[12].mxu1 }
 0x108   : > { %v557_v63 = vadd.f32 %v550_v62, %v495_v53  ;;  %v974_v0 = vpop.f32.mrb[13].mxu1 }
 0x109   : > { %v553_v1 = vpop.f32.mrb[14].mxu1 }
 0x10a   : > { %v762_v2 = vadd.f32 %v917_v61, %v557_v63  ;;  %v558_v3 = vadd.f32 %v553_v1, %v498_v57  ;;  %v975_v4 = vpop.f32.mrb[15].mxu1 }
 0x10c   : > { %v763_v6 = vadd.f32 %v917_v61, %v558_v3  ;;  %v772_v7 = vadd.f32 %v770_v5, %v762_v2 }
 0x10e   : > { %v773_v9 = vadd.f32 %v771_v8, %v763_v6 }
 0x11c   : > { %v720_v10 = vpop.f32.mrb[4].mxu0 }
 0x11d   : > { %v780_v11 = vsel %vm774_vm5, %v720_v10, 0.0  ;;  %v992_v12 = vpop.f32.mrb[5].mxu0 }
 0x11e   : > { %v782_v13 = vadd.f32 %v780_v11, %v772_v7  ;;  %v723_v14 = vpop.f32.mrb[6].mxu0 }
 0x11f   : > { %v781_v15 = vsel %vm775_vm6, %v723_v14, 0.0  ;;  %v993_v16 = vpop.f32.mrb[7].mxu0 }
 0x120   : > { %785 = vst.msk [vmem:[%s208_s19] sm:$0xff] %vm784_vm7, %v782_v13  ;;  %v783_v17 = vadd.f32 %v781_v15, %v773_v9 }
 0x122   : > { %786 = vst.msk [vmem:[%s208_s19 + $0x8] sm:$0xff] %vm784_vm7, %v783_v17 }
 0x123 PF: > { %s13_s14 = sadd.s32 1, %s1065_s14   ;;  %s1203_s12 = smov %s1061_s13 }
 0x124   : > { %p10_p5 = scmp.ge.s32.totalorder %s13_s14, 4   ;;  %s1204_s13 = smov %s1206_s15 }
 0x126   :  { %12 = sbr.rel (!%p10_p5) target bundleno = 2 (0x2), region = 70 }

// kernel: fpn_forward.15
= control target key start
LH: loop header
LB: loop body
LE: loop exit
PB: predicated region body
PF: predicated region fallthrough
CT: control target
= control target key end

     0   :  { %s3732_s0 = inlined_call_operand.vmem [shape: f32[2,256,32], index: 0, kind: input, shape index: {}, may-alias: {0,1,2}]   ;;  %s3733_s1 = inlined_call_operand.vmem [shape: f32[2,256,32], index: 1, kind: input, shape index: {}, may-alias: {0,1,2}]   ;;  %s3734_s2 = inlined_call_operand.vmem [shape: f32[2,256,32], index: 2, kind: input, shape index: {}, may-alias: {0,1,2}]   ;;  %s3735_s3 = inlined_call_operand.vmem [shape: bf16[9,32,32], index: 3, kind: input, shape index: {}]   ;;  %s3736_s4 = inlined_call_operand.vmem [shape: f32[1,32], index: 4, kind: input, shape index: {}]   ;;  %s3737_s5 = inlined_call_operand.hbm [shape: f32[2,256,32], index: 5, kind: output, shape index: {}]  }
   0x1   :  { %3738 = sst [smem:[#allocation6_spill]] %s3732_s0 }
   0x2   :  { %10 = vsyncpa [#allocation4], 0 }
   0x3   :  { %12 = vsyncpa [#allocation4 + $0x1], 0  ;;  %s3115_s18 = smov 0   ;;  %s3117_s19 = smov 0  }
   0x4   :  { %s3119_s20 = smov 0   ;;  %s3121_s21 = smov 0  }
   0x5   :  { %s3123_s22 = smov 0   ;;  %s3125_s23 = smov 0  }
   0x6   :  { %s3127_s24 = smov 0   ;;  %s3129_s25 = smov 0  }
   0x7 LB: > { %s2364_s26 = sadd.s32 4294967295, %s3079_s25   ;;  %s2365_s27 = sadd.s32 4294967294, %s3079_s25   ;;  %s3079_s25 = sphi %s3129_s25, %s18_s25   ;;  %s3075_s24 = sphi %s3127_s24, %s3777_s24   ;;  %s3071_s23 = sphi %s3125_s23, %s3776_s23   ;;  %s3067_s22 = sphi %s3123_s22, %s3775_s22   ;;  %s3063_s21 = sphi %s3121_s21, %s3774_s21   ;;  %s3059_s20 = sphi %s3119_s20, %s3773_s20   ;;  %s3055_s19 = sphi %s3117_s19, %s3772_s19   ;;  %s3051_s18 = sphi %s3115_s18, %s3771_s18  }
   0x8   : > { %s27_s28 = sadd.s32 1, %s3071_s23  ;;  %s30_s29 = sadd.s32 1, %s3075_s24 }
   0x9   : > { %p28_p0 = scmp.ge.s32.totalorder %s27_s28, 2  ;;  %p191_p1 = scmp.ne.s32.totalorder %s3059_s20, %s3055_s19 }
   0xa   : > { %p192_p2 = scmp.eq.s32.totalorder %s2364_s26, 3  ;;  %p197_p5 = scmp.ne.s32.totalorder %s3055_s19, %s3051_s18 }
   0xb   : > { %s3779_s28 = smov (%p28_p0, %s27_s28), 0  ;;  %s3781_s29 = smov (!%p28_p0, %s30_s29), %s3075_s24 }
   0xc   : > { %s177_s30 = ssub.s32 %s3071_s23, %s3779_s28  ;;  %p3166_p3 = por %p192_p2, %p191_p1 }
   0xd   : > { %p32_p4 = scmp.ge.s32.totalorder %s3781_s29, 2  ;;  %p198_p6 = scmp.eq.s32.totalorder %s2365_s27, 3 }
   0xe   : > { %p2374_p7 = scmp.ge.s32.totalorder %s3079_s25, 1  ;;  %p277_p9 = scmp.lt.s32.totalorder %s3079_s25, 5 }
   0xf   : > { %s3783_s29 = smov (%p32_p4, %s3781_s29), 0  ;;  %p3175_p8 = por %p198_p6, %p197_p5 }
  0x10   : > { %s176_s8 = ssub.s32 %s3075_s24, %s3783_s29  ;;  %s181_s9 = sadd.s32 1, %s3059_s20 }
  0x11   : > { %s178_s10 = sor.u32 %s177_s30, %s176_s8  ;;  %p278_p10 = pnand %p2374_p7, %p277_p9 }
  0x12   : > { %p179_p11 = scmp.eq.s32.totalorder %s178_s10, 0  ;;  %v2967_v0 = vld [vmem:[%s3735_s3 + $0x30] sm:$0xff] (!%p278_p10)   ;;  %s3190_s14 = sshll.u32 (!%p278_p10), %s3063_s21, 4  ;;  %v3195_v1 = vld [vmem:[%s3735_s3] sm:$0xff] (!%p278_p10)   ;;  %v2969_v2 = vld [vmem:[%s3735_s3 + $0x38] sm:$0xff] (!%p278_p10)   ;;  %vm399_vm0 = vcmask (!%p278_p10), 261120  }
  0x13   : > { %281 = sbr.rel (%p278_p10) target bundleno = 425 (0x1a9), region = 40  ;;  %p336_p12 = scmp.lt.s32.totalorder (!%p278_p10), %s3067_s22, 1  ;;  %2613 = vmatprep.subr.bf16.mxu1 (!%p278_p10), %v2967_v0  ;;  %2633 = vmatprep.subr.bf16.mxu0 (!%p278_p10), %v3195_v1  ;;  %v3206_v3 = vld [vmem:[%s3735_s3 + $0x8] sm:$0xff] (!%p278_p10)   ;;  %vm402_vm1 = vcmask (!%p278_p10), 253952   ;;  %v3081_v4 = vmov (!%p278_p10), 0.0   ;;  %v3222_v5 = vld [vmem:[%s3735_s3 + $0x60] sm:$0xff] (!%p278_p10)  }
  0x14   : > { %s3184_s11 = scalar_select %p179_p11, %s3059_s20, %s181_s9  }
  0x15   : > { %p338_p13 = scmp.lt.s32.totalorder (!%p278_p10), %s3190_s14, 31  ;;  %2614 = vmatpush3.bf16.msra.mxu1 (!%p278_p10), %v2967_v0  ;;  %2634 = vmatpush3.bf16.msra.mxu0 (!%p278_p10), %v3195_v1  ;;  %s2379_s12 = sshll.u32 (!%p278_p10), %s3063_s21, 3  ;;  %401 = vst.msk [vmem:[#allocation2 + $0x8] sm:$0xff] (!%p278_p10), %vm399_vm0, %v3081_v4  ;;  %400 = vst.msk [vmem:[#allocation2] sm:$0xff] (!%p278_p10), %vm399_vm0, %v3081_v4  ;;  %v2972_v44 = vld [vmem:[%s3735_s3 + $0x68] sm:$0xff] (!%p278_p10)   ;;  %v2973_v45 = vld [vmem:[%s3735_s3 + $0x50] sm:$0xff] (!%p278_p10)  }
  0x16   : > { %2615 = vmatprep.subr.bf16.mxu1 (!%p278_p10), %v2969_v2  ;;  %2635 = vmatprep.subr.bf16.mxu0 (!%p278_p10), %v3206_v3  ;;  %403 = vst.msk [vmem:[#allocation2 + $0x10] sm:$0x1] (!%p278_p10), %vm402_vm1, %v3081_v4  ;;  %406 = vst.msk [vmem:[#allocation2 + $0xa1] sm:$0x1] (!%p278_p10), %vm402_vm1, %v3081_v4  ;;  %s2380_s17 = sadd.s32 (!%p278_p10), 4294967295, %s2379_s12  ;;  %s3741_s0 = sld [smem:[#allocation6_spill]] (!%p278_p10) }
  0x17   : > { %404 = vst.msk [vmem:[#allocation2 + $0x91] sm:$0xff] (!%p278_p10), %vm399_vm0, %v3081_v4  ;;  %405 = vst.msk [vmem:[#allocation2 + $0x99] sm:$0xff] (!%p278_p10), %vm399_vm0, %v3081_v4  ;;  %p347_p0 = scmp.gt.s32.totalorder (!%p278_p10), %s2380_s17, 0  ;;  %p427_p1 = scmp.gt.s32.totalorder (!%p278_p10), %s3063_s21, 0  ;;  %v2974_v46 = vld [vmem:[%s3735_s3 + $0x40] sm:$0xff] (!%p278_p10)   ;;  %v2975_v59 = vld [vmem:[%s3735_s3 + $0x58] sm:$0xff] (!%p278_p10)  }
  0x18   : > { %s2522_s15 = sadd.s32 (!%p278_p10), 8, %s2379_s12  ;;  %p433_p5 = scmp.lt.s32.totalorder (!%p278_p10), %s3063_s21, 1  ;;  %v2978_v62 = vld [vmem:[%s3735_s3 + $0x20] sm:$0xff] (!%p278_p10)   ;;  %v2976_v0 = vld [vmem:[%s3735_s3 + $0x48] sm:$0xff] (!%p278_p10)  }
  0x19   : > { %2616 = vmatpush3.bf16.msra.mxu1 (!%p278_p10), %v2969_v2  ;;  %2636 = vmatpush3.bf16.msra.mxu0 (!%p278_p10), %v3206_v3  ;;  %p365_p4 = scmp.lt.s32.totalorder (!%p278_p10), %s2522_s15, 15 }
  0x1a   : > { %s337_s8 = scalar_select %p336_p12, %s3067_s22, 1  ;;  %2793 = vmatprep.subr.bf16.mxu1 %v3195_v1  ;;  %2653 = vmatprep.subr.bf16.mxu0 %v3222_v5 }
  0x1b   : > { %s339_s9 = scalar_select %p338_p13, %s3190_s14, 31 }
  0x1c   : > { %s3212_s10 = sshll.u32 %s337_s8, 5  ;;  %s3785_s17 = smov (!%p347_p0, %s2380_s17), 0 }
  0x1d   : > { %s341_s16 = sadd.s32 %s3212_s10, %s339_s9  ;;  %s2381_s9 = sshll.u32 %s3785_s17, 1 }
  0x1e   : > { %s2378_s26 = sshll.u32 %s341_s16, 3  ;;  %p3254_p2 = scmp.lt.s32.totalorder %s2381_s9, 31 }
  0x1f   : > { %s3231_s8 = scalar_lea.vmem %s3741_s0, %s2378_s26  ;;  %s3789_s15 = smov (!%p365_p4, %s2522_s15), 15 }
  0x20   : > { %v383_v6 = vld [vmem:[%s3231_s8] sm:$0xff]  ;;  %v384_v7 = vld [vmem:[%s3231_s8 + $0x8] sm:$0xff]  ;;  %v385_v8 = vld [vmem:[%s3231_s8 + $0x10] sm:$0xff]  ;;  %s428_s16 = scalar_select %p427_p1, 1, 0 }
  0x21   : > { %407 = vst.msk [vmem:[#allocation2 + $0x11] sm:$0xff] %vm399_vm0, %v383_v6  ;;  %408 = vst.msk [vmem:[#allocation2 + $0x19] sm:$0xff] %vm399_vm0, %v384_v7  ;;  %v386_v9 = vld [vmem:[%s3231_s8 + $0x18] sm:$0xff]  ;;  %v387_v10 = vld [vmem:[%s3231_s8 + $0x20] sm:$0xff]  ;;  %s3787_s9 = smov (!%p3254_p2, %s2381_s9), 31  ;;  %s2385_s0 = sshll.u32 %s3789_s15, 1 }
  0x22   : > { %409 = vst.msk [vmem:[#allocation2 + $0x21] sm:$0xff] %vm399_vm0, %v385_v8  ;;  %v388_v11 = vld [vmem:[%s3231_s8 + $0x28] sm:$0xff]  ;;  %410 = vst.msk [vmem:[#allocation2 + $0x29] sm:$0xff] %vm399_vm0, %v386_v9  ;;  %v389_v12 = vld [vmem:[%s3231_s8 + $0x30] sm:$0xff]  ;;  %s429_s12 = scvt.s32.f32 %s428_s16  ;;  %s355_s17 = sadd.s32 %s3212_s10, %s3787_s9 }
  0x23   : > { %411 = vst.msk [vmem:[#allocation2 + $0x31] sm:$0xff] %vm399_vm0, %v387_v10  ;;  %412 = vst.msk [vmem:[#allocation2 + $0x39] sm:$0xff] %vm399_vm0, %v388_v11  ;;  %v390_v13 = vld [vmem:[%s3231_s8 + $0x38] sm:$0xff]  ;;  %v391_v14 = vld [vmem:[%s3231_s8 + $0x40] sm:$0xff]  ;;  %s2383_s26 = sshll.u32 %s355_s17, 3  ;;  %p370_p6 = scmp.lt.s32.totalorder %s2385_s0, 31 }
  0x24   : > { %413 = vst.msk [vmem:[#allocation2 + $0x41] sm:$0xff] %vm399_vm0, %v389_v12  ;;  %414 = vst.msk [vmem:[#allocation2 + $0x49] sm:$0xff] %vm399_vm0, %v390_v13  ;;  %v392_v15 = vld [vmem:[%s3231_s8 + $0x48] sm:$0xff]  ;;  %v393_v16 = vld [vmem:[%s3231_s8 + $0x50] sm:$0xff]  ;;  %v430_v22 = vstv %s429_s12  ;;  %s357_s13 = scalar_lea.vmem %s3733_s1, %s2383_s26  ;;  %s332_s15 = sand.u32 1, %s3055_s19  }
  0x25   : > { %415 = vst.msk [vmem:[#allocation2 + $0x51] sm:$0xff] %vm399_vm0, %v391_v14  ;;  %v394_v17 = vld [vmem:[%s3231_s8 + $0x58] sm:$0xff]  ;;  %416 = vst.msk [vmem:[#allocation2 + $0x59] sm:$0xff] %vm399_vm0, %v392_v15  ;;  %v395_v18 = vld [vmem:[%s3231_s8 + $0x60] sm:$0xff]  ;;  %s3791_s0 = smov (!%p370_p6, %s2385_s0), 31  ;;  %s2375_s27 = sshll.u32 %s332_s15, 7 }
  0x26   : > { %417 = vst.msk [vmem:[#allocation2 + $0x61] sm:$0xff] %vm399_vm0, %v393_v16  ;;  %418 = vst.msk [vmem:[#allocation2 + $0x69] sm:$0xff] %vm399_vm0, %v394_v17  ;;  %v396_v19 = vld [vmem:[%s3231_s8 + $0x68] sm:$0xff]  ;;  %v397_v20 = vld [vmem:[%s3231_s8 + $0x70] sm:$0xff]  ;;  %s373_s21 = sadd.s32 %s3212_s10, %s3791_s0  ;;  %s3543_s30 = scalar_lea.vmem [#allocation3], %s2375_s27 }
  0x27   : > { %419 = vst.msk [vmem:[#allocation2 + $0x71] sm:$0xff] %vm399_vm0, %v395_v18  ;;  %420 = vst.msk [vmem:[#allocation2 + $0x79] sm:$0xff] %vm399_vm0, %v396_v19  ;;  %v398_v21 = vld [vmem:[%s3231_s8 + $0x78] sm:$0xff]  ;;  %v424_v23 = vld [vmem:[%s357_s13 + $0x8] sm:$0xff]  ;;  %s434_s8 = scalar_select %p433_p5, 1, 0 }
  0x28   : > { %421 = vst.msk [vmem:[#allocation2 + $0x81] sm:$0xff] %vm399_vm0, %v397_v20  ;;  %422 = vst.msk [vmem:[#allocation2 + $0x89] sm:$0xff] %vm399_vm0, %v398_v21  ;;  %v423_v24 = vld [vmem:[%s357_s13] sm:$0xff]  ;;  %v432_v25 = vmul.f32 %v430_v22, %v424_v23  ;;  %v447_v29 = vld [vmem:[#allocation2 + $0x18] sm:$0xff]  ;;  %s2387_s16 = sshll.u32 %s373_s21, 3  ;;  %s2513_s13 = sshll.u32 %s3067_s22, 5 }
  0x29   : > { %v431_v26 = vmul.f32 %v430_v22, %v423_v24  ;;  %s435_s9 = scvt.s32.f32 %s434_s8  ;;  %v448_v27 = vld [vmem:[#allocation2 + $0x20] sm:$0xff]  ;;  %v449_v28 = vld [vmem:[#allocation2 + $0x28] sm:$0xff]  ;;  %s375_s26 = scalar_lea.vmem %s3734_s2, %s2387_s16  ;;  %v1365_v6 = vld [vmem:[#allocation2 + $0x12] sm:$0xff] }
  0x2a   : > { %440 = vst.msk [vmem:[#allocation2 + $0x9] sm:$0xff] %vm399_vm0, %v432_v25  ;;  %v450_v30 = vld [vmem:[#allocation2 + $0x30] sm:$0xff]  ;;  %v451_v31 = vld [vmem:[#allocation2 + $0x38] sm:$0xff]  ;;  %v462_v36 = vpack.c.bf16 %v449_v28, %v448_v27  ;;  %v425_v39 = vld [vmem:[%s375_s26] sm:$0xff]  ;;  %s3637_s22 = sadd.s32 %s2513_s13, %s3190_s14  ;;  %s2246_s8 = sshll.u32 %s3543_s30, 4  ;;  %s3670_s8 = int_to_ptr.vmem [resolvable:$true] %s2246_s8 }
  0x2b   : > { %439 = vst.msk [vmem:[#allocation2 + $0x1] sm:$0xff] %vm399_vm0, %v431_v26  ;;  %v436_v32 = vstv %s435_s9  ;;  %v426_v40 = vld [vmem:[%s375_s26 + $0x8] sm:$0xff]  ;;  %v463_v41 = vpack.c.bf16 %v451_v31, %v450_v30  ;;  %v452_v47 = vld [vmem:[#allocation2 + $0x40] sm:$0xff]  ;;  %v909_v15 = vld [vmem:[#allocation2 + $0x31] sm:$0xff]  ;;  %s2514_s14 = sshll.u32 %s3637_s22, 7  ;;  %s3680_s12 = scalar_lea.sflag [#allocation4], %s332_s15 }
  0x2c   : > { %v437_v42 = vmul.f32 %v436_v32, %v425_v39  ;;  %v438_v43 = vmul.f32 %v436_v32, %v426_v40  ;;  %v453_v48 = vld [vmem:[#allocation2 + $0x48] sm:$0xff]  ;;  %v454_v49 = vld [vmem:[#allocation2 + $0x50] sm:$0xff]  ;;  %v455_v50 = vld [vmem:[#allocation2 + $0x58] sm:$0xff]  ;;  %s3665_s16 = scalar_lea.hbm %s3737_s5, %s2514_s14  ;;  %s2985_s17 = scalar_lea.vmem %s3670_s8, 2048 }
  0x2d   : > { %v464_v51 = vpack.c.bf16 %v453_v48, %v452_v47  ;;  %v465_v52 = vpack.c.bf16 %v455_v50, %v454_v49  ;;  %v456_v53 = vld [vmem:[#allocation2 + $0x60] sm:$0xff]  ;;  %v457_v54 = vld [vmem:[#allocation2 + $0x68] sm:$0xff]  ;;  %v1369_v17 = vld [vmem:[#allocation2 + $0x32] sm:$0xff]  ;;  %p2986_p7 = scmp.ne.s32.totalorder %s3670_s8, %s2985_s17  ;;  %s3082_s26 = smov [#allocation3]  }
  0x2e   : > { %441 = vst.msk [vmem:[#allocation2 + $0x91] sm:$0xff] %vm399_vm0, %v437_v42  ;;  %442 = vst.msk [vmem:[#allocation2 + $0x99] sm:$0xff] %vm399_vm0, %v438_v43  ;;  %v458_v55 = vld [vmem:[#allocation2 + $0x70] sm:$0xff]  ;;  %v459_v56 = vld [vmem:[#allocation2 + $0x78] sm:$0xff]  ;;  %v466_v57 = vpack.c.bf16 %v457_v54, %v456_v53  ;;  %s2989_s0 = sshll.u32 %s3082_s26, 4  ;;  %s2990_s0 = int_to_ptr.vmem [resolvable:$false] %s2989_s0 }
  0x2f   : > { %v467_v58 = vpack.c.bf16 %v459_v56, %v458_v55  ;;  %v472_v60 = vld [vmem:[#allocation2 + $0x80] sm:$0xff]  ;;  %v473_v61 = vld [vmem:[#allocation2 + $0x88] sm:$0xff]  ;;  %v2979_v24 = vld [vmem:[%s3735_s3 + $0x18] sm:$0xff]   ;;  %p2987_p9 = pnand %p2986_p7, %p3166_p3  ;;  %s2991_s10 = scalar_lea.vmem %s2990_s0, 4096 }
  0x30   : > { %v474_v63 = vpack.c.bf16 %v473_v61, %v472_v60  ;;  %v906_v4 = vld [vmem:[#allocation2 + $0x19] sm:$0xff]  ;;  %v907_v11 = vld [vmem:[#allocation2 + $0x21] sm:$0xff]  ;;  %v908_v12 = vld [vmem:[#allocation2 + $0x29] sm:$0xff]  ;;  %p2992_p11 = scmp.lt.s32.totalorder %s3670_s8, %s2990_s0  ;;  %p2993_p12 = scmp.lt.s32.totalorder %s2991_s10, %s2985_s17 }
  0x31   : > { %v446_v33 = vld [vmem:[#allocation2 + $0x10] sm:$0xff]  ;;  %v1366_v7 = vld [vmem:[#allocation2 + $0x1a] sm:$0xff]  ;;  %v1367_v13 = vld [vmem:[#allocation2 + $0x22] sm:$0xff]  ;;  %v3351_v19 = vpack.c.bf16 %v908_v12, %v907_v11  ;;  %p2988_p10 = pneg %p2987_p9 }
  0x32   : > { %v444_v34 = vld [vmem:[#allocation2] sm:$0xff]  ;;  %v445_v35 = vld [vmem:[#allocation2 + $0x8] sm:$0xff]  ;;  %v461_v37 = vpack.c.bf16 %v447_v29, %v446_v33  ;;  %v3343_v10 = vpack.c.bf16 %v1366_v7, %v1365_v6  ;;  %v913_v29 = vld [vmem:[#allocation2 + $0x51] sm:$0xff]  ;;  %p2994_p13 = por %p2993_p12, %p2992_p11 }
  0x33   : > { %v460_v38 = vpack.c.bf16 %v445_v35, %v444_v34  ;;  %v1368_v14 = vld [vmem:[#allocation2 + $0x2a] sm:$0xff]  ;;  %v910_v16 = vld [vmem:[#allocation2 + $0x39] sm:$0xff]  ;;  %v911_v23 = vld [vmem:[#allocation2 + $0x41] sm:$0xff] }
  0x34   : > { %2617 = vmatprep.mubr.msk.bf16.mxu1 %vm399_vm0, %v461_v37  ;;  %v1370_v18 = vld [vmem:[#allocation2 + $0x3a] sm:$0xff]  ;;  %v3353_v20 = vpack.c.bf16 %v1368_v14, %v1367_v13  ;;  %v3355_v21 = vpack.c.bf16 %v910_v16, %v909_v15  ;;  %v2980_v25 = vld [vmem:[%s3735_s3 + $0x28] sm:$0xff]   ;;  %v1373_v31 = vld [vmem:[#allocation2 + $0x52] sm:$0xff]  ;;  %p2995_p0 = pnand %p2994_p13, %p2988_p10 }
  0x35   : > { %2637 = vmatprep.mubr.msk.bf16.mxu0 %vm399_vm0, %v460_v38  ;;  %2618 = vmatmul.mubr.msk.bf16.vlgmr.msra.gmra.mrb[0].mxu1 %vm399_vm0, %v462_v36  ;;  %v739_v2 = vld [vmem:[#allocation2 + $0x90] sm:$0xff]  ;;  %v3357_v22 = vpack.c.bf16 %v1370_v18, %v1369_v17  ;;  %v1371_v27 = vld [vmem:[#allocation2 + $0x42] sm:$0xff]  ;;  %v914_v30 = vld [vmem:[#allocation2 + $0x59] sm:$0xff] }
  0x36   : > { %2638 = vmatmul.mubr.msk.bf16.vlgmr.msra.gmra.mrb[0].mxu0 %vm399_vm0, %v461_v37  ;;  %2795 = vmatpush3.bf16.msra.mxu1 %v3195_v1  ;;  %v905_v1 = vld [vmem:[#allocation2 + $0x11] sm:$0xff]  ;;  %v912_v26 = vld [vmem:[#allocation2 + $0x49] sm:$0xff]  ;;  %v1374_v32 = vld [vmem:[#allocation2 + $0x5a] sm:$0xff]  ;;  %v3383_v37 = vpack.c.bf16 %v914_v30, %v913_v29 }
  0x37   : > { %2654 = vmatpush3.bf16.msra.mxu0 %v3222_v5  ;;  %2621 = vmatprep.mubr.msk.bf16.mxu1 %vm399_vm0, %v463_v41  ;;  %v2977_v5 = vld [vmem:[%s3735_s3 + $0x10] sm:$0xff]   ;;  %v3341_v9 = vpack.c.bf16 %v906_v4, %v905_v1  ;;  %v2982_v34 = vld [vmem:[%s3735_s3 + $0x80] sm:$0xff]   ;;  %v3379_v35 = vpack.c.bf16 %v912_v26, %v911_v23  ;;  %v3385_v38 = vpack.c.bf16 %v1374_v32, %v1373_v31 }
  0x38   : > { %2641 = vmatprep.mubr.msk.bf16.mxu0 %vm399_vm0, %v462_v36  ;;  %2655 = vmatprep.subr.bf16.mxu0 %v2972_v44  ;;  %v1372_v28 = vld [vmem:[#allocation2 + $0x4a] sm:$0xff]  ;;  %v915_v39 = vld [vmem:[#allocation2 + $0x61] sm:$0xff] }
  0x39   : > { %2794 = vmatprep.subr.bf16.mxu1 %v3206_v3  ;;  %v2981_v33 = vld [vmem:[%s3735_s3 + $0x70] sm:$0xff]   ;;  %v1392_v53 = vld [vmem:[#allocation2 + $0x82] sm:$0xff]  ;;  %v1660_v4 = vld [vmem:[#allocation2 + $0x9a] sm:$0xff] }
  0x3a   : > { %2796 = vmatpush3.bf16.msra.mxu1 %v3206_v3  ;;  %v740_v3 = vld [vmem:[#allocation2 + $0x98] sm:$0xff]  ;;  %v916_v40 = vld [vmem:[#allocation2 + $0x69] sm:$0xff]  ;;  %v903_v55 = vld [vmem:[#allocation2 + $0x1] sm:$0xff] }
  0x3b   : > { %2656 = vmatpush3.bf16.msra.mxu0 %v2972_v44  ;;  %2673 = vmatprep.subr.bf16.mxu1 %v2974_v46  ;;  %v748_v8 = vpack.c.bf16 %v740_v3, %v739_v2  ;;  %v1376_v42 = vld [vmem:[#allocation2 + $0x6a] sm:$0xff]  ;;  %v918_v44 = vld [vmem:[#allocation2 + $0x79] sm:$0xff]  ;;  %v925_v47 = vpack.c.bf16 %v916_v40, %v915_v39 }
  0x3c   : > { %2733 = vmatprep.subr.bf16.mxu0 %v2973_v45  ;;  %v917_v43 = vld [vmem:[#allocation2 + $0x71] sm:$0xff]  ;;  %v904_v56 = vld [vmem:[#allocation2 + $0x9] sm:$0xff]  ;;  %v1200_v2 = vld [vmem:[#allocation2 + $0x99] sm:$0xff] }
  0x3d   : > { %2622 = vmatmul.mubr.msk.bf16.gmra.mrb[4].mxu1 %vm399_vm0, %v464_v51  ;;  %v926_v49 = vpack.c.bf16 %v918_v44, %v917_v43  ;;  %v1393_v54 = vld [vmem:[#allocation2 + $0x8a] sm:$0xff]  ;;  %v919_v61 = vpack.c.bf16 %v904_v56, %v903_v55  ;;  %v1659_v3 = vld [vmem:[#allocation2 + $0x92] sm:$0xff]  ;;  %v1823_v55 = vlaneseq }
  0x3e   : > { %2642 = vmatmul.mubr.msk.bf16.gmra.mrb[4].mxu0 %vm399_vm0, %v463_v41  ;;  %2625 = vmatprep.mubr.msk.bf16.mxu1 %vm399_vm0, %v465_v52  ;;  %v1394_v60 = vpack.c.bf16 %v1393_v54, %v1392_v53  ;;  %v1199_v1 = vld [vmem:[#allocation2 + $0x91] sm:$0xff]  ;;  %v1668_v6 = vpack.c.bf16 %v1660_v4, %v1659_v3 }
  0x3f   : > { %2657 = vmatprep.mubr.msk.bf16.mxu0 %vm399_vm0, %v462_v36  ;;  %v3381_v36 = vpack.c.bf16 %v1372_v28, %v1371_v27  ;;  %v3489_v56 = vshrl.u32 %v1823_v55, 7 }
  0x45   : > { %2626 = vmatmul.mubr.msk.bf16.gmra.mrb[8].mxu1 %vm399_vm0, %v466_v57 }
  0x46   : > { %2658 = vmatmul.mubr.msk.bf16.vlgmr.msra.gmra.mrb[0].mxu0 %vm399_vm0, %v463_v41  ;;  %2629 = vmatprep.mubr.msk.bf16.mxu1 %vm399_vm0, %v467_v58  ;;  %v1375_v41 = vld [vmem:[#allocation2 + $0x62] sm:$0xff] }
  0x47   : > { %2734 = vmatpush3.bf16.msra.mxu0 %v2973_v45  ;;  %2661 = vmatprep.mubr.msk.bf16.mxu0 %vm399_vm0, %v464_v51  ;;  %v1377_v45 = vld [vmem:[#allocation2 + $0x72] sm:$0xff]  ;;  %v1385_v48 = vpack.c.bf16 %v1376_v42, %v1375_v41 }
  0x48   : > { %2735 = vmatprep.subr.bf16.mxu0 %v2975_v59 }
  0x4b   : > { %2736 = vmatpush3.bf16.msra.mxu0 %v2975_v59 }
  0x4c   : > { %2753 = vmatprep.subr.bf16.mxu0 %v2978_v62 }
  0x4d   : > { %2630 = vmatmul.mubr.msk.bf16.gmra.mrb[12].mxu1 %vm399_vm0, %v474_v63 }
  0x4e   : > { %2662 = vmatmul.mubr.msk.bf16.gmra.mrb[4].mxu0 %vm399_vm0, %v465_v52  ;;  %2645 = vmatprep.mubr.msk.bf16.mxu1 %vm399_vm0, %v464_v51  ;;  %v932_v51 = vld [vmem:[#allocation2 + $0x81] sm:$0xff] }
  0x4f   : > { %2665 = vmatprep.mubr.msk.bf16.mxu0 %vm399_vm0, %v466_v57 }
  0x55   : > { %2646 = vmatmul.mubr.msk.bf16.vlgmr.msra.gmra.mrb[8].mxu1 %vm399_vm0, %v465_v52  ;;  %v933_v52 = vld [vmem:[#allocation2 + $0x89] sm:$0xff] }
  0x56   : > { %2666 = vmatmul.mubr.msk.bf16.gmra.mrb[8].mxu0 %vm399_vm0, %v467_v58  ;;  %2674 = vmatpush3.bf16.msra.mxu1 %v2974_v46  ;;  %v1378_v46 = vld [vmem:[#allocation2 + $0x7a] sm:$0xff]  ;;  %v934_v59 = vpack.c.bf16 %v933_v52, %v932_v51 }
  0x57   : > { %2649 = vmatprep.mubr.msk.bf16.mxu1 %vm399_vm0, %v466_v57  ;;  %2669 = vmatprep.mubr.msk.bf16.mxu0 %vm399_vm0, %v474_v63  ;;  %v1386_v50 = vpack.c.bf16 %v1378_v46, %v1377_v45  ;;  %v1363_v57 = vld [vmem:[#allocation2 + $0x2] sm:$0xff]  ;;  %v2983_v63 = vld [vmem:[%s3735_s3 + $0x78] sm:$0xff]  }
  0x58   : > { %2675 = vmatprep.subr.bf16.mxu1 %v2976_v0 }
  0x5a   : > { %2676 = vmatpush3.bf16.msra.mxu1 %v2976_v0  ;;  %v2984_v0 = vld [vmem:[%s3735_s3 + $0x88] sm:$0xff]  }
  0x5b   : > { %2693 = vmatprep.subr.bf16.mxu1 %v2977_v5 }
  0x5d   : > { %2650 = vmatmul.mubr.msk.bf16.gmra.mrb[12].mxu1 %vm399_vm0, %v467_v58  ;;  %v1364_v58 = vld [vmem:[#allocation2 + $0xa] sm:$0xff] }
  0x5e   : > { %2670 = vmatmul.mubr.msk.bf16.gmra.mrb[12].mxu0 %vm399_vm0, %v748_v8  ;;  %2677 = vmatprep.mubr.msk.bf16.mxu1 %vm399_vm0, %v3341_v9 }
  0x5f   : > { %2737 = vmatprep.mubr.msk.bf16.mxu0 %vm399_vm0, %v3343_v10 }
  0x65   : > { %2678 = vmatmul.mubr.msk.bf16.vlgmr.msra.gmra.mrb[16].mxu1 %vm399_vm0, %v3351_v19 }
  0x66   : > { %2738 = vmatmul.mubr.msk.bf16.vlgmr.msra.gmra.mrb[16].mxu0 %vm399_vm0, %v3353_v20  ;;  %2694 = vmatpush3.bf16.msra.mxu1 %v2977_v5  ;;  %v1208_v5 = vpack.c.bf16 %v1200_v2, %v1199_v1  ;;  %v1835_v2 = vadd.s32 88, %v3489_v56 }
  0x67   : > { %2754 = vmatpush3.bf16.msra.mxu0 %v2978_v62  ;;  %2681 = vmatprep.mubr.msk.bf16.mxu1 %vm399_vm0, %v3355_v21  ;;  %v1379_v62 = vpack.c.bf16 %v1364_v58, %v1363_v57  ;;  %v1826_v57 = vadd.s32 16, %v3489_v56  ;;  %v1827_v58 = vadd.s32 24, %v3489_v56 }
  0x68   : > { %2741 = vmatprep.mubr.msk.bf16.mxu0 %vm399_vm0, %v3357_v22  ;;  %2695 = vmatprep.subr.bf16.mxu1 %v2979_v24 }
  0x69   : > { %2755 = vmatprep.subr.bf16.mxu0 %v2980_v25  ;;  %v1865_v1 = vand.u32 15, %v1827_v58 }
  0x6a   : > { %2696 = vmatpush3.bf16.msra.mxu1 %v2979_v24 }
  0x6b   : > { %2756 = vmatpush3.bf16.msra.mxu0 %v2980_v25  ;;  %2713 = vmatprep.subr.bf16.mxu1 %v2981_v33  ;;  %vm3518_vm4 = vcmp.lt.s32.totalorder %v1865_v1, 15 }
  0x6c   : > { %2773 = vmatprep.subr.bf16.mxu0 %v2982_v34 }
  0x6d   : > { %2682 = vmatmul.mubr.msk.bf16.gmra.mrb[20].mxu1 %vm399_vm0, %v3379_v35 }
  0x6e   : > { %2742 = vmatmul.mubr.msk.bf16.gmra.mrb[20].mxu0 %vm399_vm0, %v3381_v36  ;;  %2685 = vmatprep.mubr.msk.bf16.mxu1 %vm399_vm0, %v3383_v37 }
  0x6f   : > { %2745 = vmatprep.mubr.msk.bf16.mxu0 %vm399_vm0, %v3385_v38 }
  0x75   : > { %2686 = vmatmul.mubr.msk.bf16.gmra.mrb[24].mxu1 %vm399_vm0, %v925_v47 }
  0x76   : > { %2746 = vmatmul.mubr.msk.bf16.gmra.mrb[24].mxu0 %vm399_vm0, %v1385_v48  ;;  %2689 = vmatprep.mubr.msk.bf16.mxu1 %vm399_vm0, %v926_v49 }
  0x77   : > { %2749 = vmatprep.mubr.msk.bf16.mxu0 %vm399_vm0, %v1386_v50 }
  0x7d   : > { %2690 = vmatmul.mubr.msk.bf16.gmra.mrb[28].mxu1 %vm399_vm0, %v934_v59 }
  0x7e   : > { %2750 = vmatmul.mubr.msk.bf16.gmra.mrb[28].mxu0 %vm399_vm0, %v1394_v60  ;;  %2697 = vmatprep.mubr.msk.bf16.mxu1 %vm399_vm0, %v919_v61  ;;  %v1825_v61 = vadd.s32 8, %v3489_v56 }
  0x7f   : > { %2757 = vmatprep.mubr.msk.bf16.mxu0 %vm399_vm0, %v1379_v62  ;;  %v1830_v62 = vadd.s32 48, %v3489_v56 }
  0x85   : > { %2698 = vmatmul.mubr.msk.bf16.vlgmr.msra.gmra.mrb[16].mxu1 %vm399_vm0, %v3341_v9 }
  0x86   : > { %2758 = vmatmul.mubr.msk.bf16.vlgmr.msra.gmra.mrb[16].mxu0 %vm399_vm0, %v3343_v10  ;;  %2714 = vmatpush3.bf16.msra.mxu1 %v2981_v33 }
  0x87   : > { %2774 = vmatpush3.bf16.msra.mxu0 %v2982_v34  ;;  %2701 = vmatprep.mubr.msk.bf16.mxu1 %vm399_vm0, %v3351_v19 }
  0x88   : > { %2761 = vmatprep.mubr.msk.bf16.mxu0 %vm399_vm0, %v3353_v20  ;;  %2715 = vmatprep.subr.bf16.mxu1 %v2983_v63 }
  0x89   : > { %2775 = vmatprep.subr.bf16.mxu0 %v2984_v0 }
  0x8a   : > { %2716 = vmatpush3.bf16.msra.mxu1 %v2983_v63  ;;  %v1828_v63 = vadd.s32 32, %v3489_v56 }
  0x8b   : > { %2776 = vmatpush3.bf16.msra.mxu0 %v2984_v0  ;;  %v3500_v0 = vld [vmem:[%s3736_s4] ss:$0 sm:$0xff] }
  0x8d   : > { %2702 = vmatmul.mubr.msk.bf16.gmra.mrb[20].mxu1 %vm399_vm0, %v3355_v21 }
  0x8e   : > { %2762 = vmatmul.mubr.msk.bf16.gmra.mrb[20].mxu0 %vm399_vm0, %v3357_v22  ;;  %2705 = vmatprep.mubr.msk.bf16.mxu1 %vm399_vm0, %v3379_v35 }
  0x8f   : > { %2765 = vmatprep.mubr.msk.bf16.mxu0 %vm399_vm0, %v3381_v36 }
  0x95   : > { %2706 = vmatmul.mubr.msk.bf16.gmra.mrb[24].mxu1 %vm399_vm0, %v3383_v37 }
  0x96   : > { %2766 = vmatmul.mubr.msk.bf16.gmra.mrb[24].mxu0 %vm399_vm0, %v3385_v38  ;;  %2709 = vmatprep.mubr.msk.bf16.mxu1 %vm399_vm0, %v925_v47 }
  0x97   : > { %2769 = vmatprep.mubr.msk.bf16.mxu0 %vm399_vm0, %v1385_v48 }
  0x9d   : > { %2710 = vmatmul.mubr.msk.bf16.gmra.mrb[28].mxu1 %vm399_vm0, %v926_v49 }
  0x9e   : > { %2770 = vmatmul.mubr.msk.bf16.gmra.mrb[28].mxu0 %vm399_vm0, %v1386_v50  ;;  %2717 = vmatprep.mubr.msk.bf16.mxu1 %vm399_vm0, %v3351_v19 }
  0x9f   : > { %2777 = vmatprep.mubr.msk.bf16.mxu0 %vm399_vm0, %v3353_v20 }
  0xa5   : > { %2718 = vmatmul.mubr.msk.bf16.vlgmr.msra.gmra.mrb[16].mxu1 %vm399_vm0, %v3355_v21 }
  0xa6   : > { %2778 = vmatmul.mubr.msk.bf16.vlgmr.msra.gmra.mrb[16].mxu0 %vm399_vm0, %v3357_v22  ;;  %2721 = vmatprep.mubr.msk.bf16.mxu1 %vm399_vm0, %v3379_v35 }
  0xa7   : > { %2781 = vmatprep.mubr.msk.bf16.mxu0 %vm399_vm0, %v3381_v36 }
  0xad   : > { %2722 = vmatmul.mubr.msk.bf16.gmra.mrb[20].mxu1 %vm399_vm0, %v3383_v37 }
  0xae   : > { %2782 = vmatmul.mubr.msk.bf16.gmra.mrb[20].mxu0 %vm399_vm0, %v3385_v38  ;;  %2725 = vmatprep.mubr.msk.bf16.mxu1 %vm399_vm0, %v925_v47 }
  0xaf   : > { %2785 = vmatprep.mubr.msk.bf16.mxu0 %vm399_vm0, %v1385_v48 }
  0xb5   : > { %2726 = vmatmul.mubr.msk.bf16.gmra.mrb[24].mxu1 %vm399_vm0, %v926_v49 }
  0xb6   : > { %2786 = vmatmul.mubr.msk.bf16.gmra.mrb[24].mxu0 %vm399_vm0, %v1386_v50  ;;  %2729 = vmatprep.mubr.msk.bf16.mxu1 %vm399_vm0, %v934_v59  ;;  %v1858_v59 = vand.u32 15, %v1826_v57 }
  0xb7   : > { %2789 = vmatprep.mubr.msk.bf16.mxu0 %vm399_vm0, %v1394_v60  ;;  %v1844_v60 = vand.u32 15, %v3489_v56 }
  0xb8   : > { %vm3503_vm2 = vcmp.gt.s32.totalorder %v1858_v59, 0 }
  0xb9   : > { %vm3507_vm3 = vcmp.gt.s32.totalorder %v1844_v60, 0 }
  0xbd   : > { %2730 = vmatmul.mubr.msk.bf16.gmra.mrb[28].mxu1 %vm399_vm0, %v1208_v5 }
  0xbe   : > { %2790 = vmatmul.mubr.msk.bf16.gmra.mrb[28].mxu0 %vm399_vm0, %v1668_v6  ;;  %v1851_v6 = vand.u32 15, %v1825_v61 }
  0xc0   : > { %vm3528_vm5 = vcmp.lt.s32.totalorder %v1851_v6, 15 }
 0x108   : > { %v2619_v7 = vpop.f32.mrb[0].mxu1 }
 0x109   : > { %v550_v8 = vpop.f32.mrb[1].mxu1 }
 0x10a   : > { %v2620_v9 = vpop.f32.mrb[2].mxu1 }
 0x10b   : > { %v553_v10 = vpop.f32.mrb[3].mxu1 }
 0x110   : > { %v2623_v11 = vpop.f32.mrb[4].mxu1 }
 0x111   : > { %v566_v12 = vpop.f32.mrb[5].mxu1 }
 0x112   : > { %v2624_v13 = vpop.f32.mrb[6].mxu1 }
 0x113   : > { %v569_v14 = vpop.f32.mrb[7].mxu1 }
 0x119   : > { %v2659_v15 = vpop.f32.mrb[0].mxu0 }
 0x11a   : > { %v3457_v16 = vadd.f32 %v2659_v15, %v2619_v7  ;;  %v824_v17 = vpop.f32.mrb[1].mxu0  ;;  %v1886_v7 = vand.u32 15, %v1830_v62 }
 0x11b   : > { %v3459_v18 = vadd.f32 %v824_v17, %v550_v8  ;;  %v2660_v19 = vpop.f32.mrb[2].mxu0 }
 0x11c   : > { %v3461_v20 = vadd.f32 %v2660_v19, %v2620_v9  ;;  %v827_v21 = vpop.f32.mrb[3].mxu0  ;;  %vm3539_vm6 = vcmp.gt.s32.totalorder %v1886_v7, 0 }
 0x11d   : > { %v3463_v22 = vadd.f32 %v827_v21, %v553_v10  ;;  %v2102_v19 = vsel %vm3507_vm3, %v3459_v18, 0.0 }
 0x121   : > { %v2663_v23 = vpop.f32.mrb[4].mxu0 }
 0x122   : > { %v3465_v24 = vadd.f32 %v2663_v23, %v2623_v11  ;;  %v840_v25 = vpop.f32.mrb[5].mxu0  ;;  %v2104_v11 = vsel %vm3503_vm2, %v3457_v16, 0.0  ;;  %v1831_v16 = vadd.s32 56, %v3489_v56 }
 0x123   : > { %v3467_v26 = vadd.f32 %v840_v25, %v566_v12  ;;  %v2664_v27 = vpop.f32.mrb[6].mxu0  ;;  %v1872_v12 = vand.u32 15, %v1828_v63 }
 0x124   : > { %v3469_v28 = vadd.f32 %v2664_v27, %v2624_v13  ;;  %v843_v29 = vpop.f32.mrb[7].mxu0  ;;  %v2108_v60 = vsel %vm3539_vm6, %v3465_v24, 0.0 }
 0x125   : > { %v3471_v30 = vadd.f32 %v843_v29, %v569_v14  ;;  %vm3549_vm7 = vcmp.gt.s32.totalorder %v1872_v12, 0  ;;  %v1836_v12 = vadd.s32 96, %v3489_v56 }
 0x126   : > { %v2106_v3 = vsel %vm3549_vm7, %v3467_v26, 0.0  ;;  %v1833_v26 = vadd.s32 72, %v3489_v56 }
 0x128   : > { %v2647_v31 = vpop.f32.mrb[8].mxu1 }
 0x129   : > { %v2667_v32 = vpop.f32.mrb[8].mxu0  ;;  %v694_v34 = vpop.f32.mrb[9].mxu1 }
 0x12a   : > { %v3473_v33 = vadd.f32 %v2667_v32, %v2647_v31  ;;  %v856_v35 = vpop.f32.mrb[9].mxu0  ;;  %v2648_v37 = vpop.f32.mrb[10].mxu1 }
 0x12b   : > { %v3475_v36 = vadd.f32 %v856_v35, %v694_v34  ;;  %v2668_v38 = vpop.f32.mrb[10].mxu0  ;;  %v697_v40 = vpop.f32.mrb[11].mxu1  ;;  %v1829_v34 = vadd.s32 40, %v3489_v56  ;;  %v1834_v35 = vadd.s32 80, %v3489_v56 }
 0x12c   : > { %v3477_v39 = vadd.f32 %v2668_v38, %v2648_v37  ;;  %v859_v41 = vpop.f32.mrb[11].mxu0  ;;  %v1832_v38 = vadd.s32 64, %v3489_v56 }
 0x12d   : > { %v3479_v42 = vadd.f32 %v859_v41, %v697_v40  ;;  %v1914_v55 = vand.u32 15, %v1834_v35 }
 0x12e   : > { %v1900_v61 = vand.u32 15, %v1832_v38  ;;  %v1928_v38 = vand.u32 15, %v1836_v12 }
 0x12f   : > { %vm3585_vm10 = vcmp.gt.s32.totalorder %v1914_v55, 0  ;;  %v1837_v55 = vadd.s32 104, %v3489_v56 }
 0x130   : > { %v2651_v43 = vpop.f32.mrb[12].mxu1  ;;  %vm3593_vm11 = vcmp.gt.s32.totalorder %v1900_v61, 0  ;;  %vm3639_vm15 = vcmp.gt.s32.totalorder %v1928_v38, 0 }
 0x131   : > { %v2671_v44 = vpop.f32.mrb[12].mxu0  ;;  %v710_v46 = vpop.f32.mrb[13].mxu1 }
 0x132   : > { %v3481_v45 = vadd.f32 %v2671_v44, %v2651_v43  ;;  %v872_v47 = vpop.f32.mrb[13].mxu0  ;;  %v2652_v49 = vpop.f32.mrb[14].mxu1 }
 0x133   : > { %v3483_v48 = vadd.f32 %v872_v47, %v710_v46  ;;  %v2672_v50 = vpop.f32.mrb[14].mxu0  ;;  %v713_v52 = vpop.f32.mrb[15].mxu1  ;;  %v1893_v47 = vand.u32 15, %v1831_v16 }
 0x134   : > { %v3485_v51 = vadd.f32 %v2672_v50, %v2652_v49  ;;  %v875_v53 = vpop.f32.mrb[15].mxu0 }
 0x135   : > { %v3487_v54 = vadd.f32 %v875_v53, %v713_v52  ;;  %v1879_v53 = vand.u32 15, %v1829_v34  ;;  %vm3569_vm8 = vcmp.lt.s32.totalorder %v1893_v47, 15 }
 0x137   : > { %vm3574_vm9 = vcmp.lt.s32.totalorder %v1879_v53, 15 }
 0x178   : > { %v2719_v4 = vpop.f32.mrb[16].mxu1 }
 0x179   : > { %v2779_v5 = vpop.f32.mrb[16].mxu0  ;;  %v2040_v8 = vadd.f32 %v2719_v4, %v3500_v0  ;;  %v1284_v9 = vpop.f32.mrb[17].mxu1 }
 0x17a   : > { %v1744_v10 = vpop.f32.mrb[17].mxu0  ;;  %v2038_v13 = vadd.f32 %v3500_v0, %v1284_v9  ;;  %v2720_v14 = vpop.f32.mrb[18].mxu1 }
 0x17b   : > { %v2780_v15 = vpop.f32.mrb[18].mxu0  ;;  %v2120_v21 = vadd.f32 %v2104_v11, %v2040_v8  ;;  %v2041_v23 = vadd.f32 %v2720_v14, %v3500_v0  ;;  %v1287_v25 = vpop.f32.mrb[19].mxu1  ;;  %v1838_v11 = vadd.s32 112, %v3489_v56 }
 0x17c   : > { %v1747_v27 = vpop.f32.mrb[19].mxu0  ;;  %v2118_v29 = vadd.f32 %v2102_v19, %v2038_v13  ;;  %v2039_v31 = vadd.f32 %v3500_v0, %v1287_v25  ;;  %v2185_v41 = vsel %vm3518_vm4, %v2780_v15, 0.0 }
 0x17d   : > { %v2200_v37 = vadd.f32 %v2779_v5, %v2120_v21  ;;  %v2121_v18 = vadd.f32 %v3461_v20, %v2041_v23  ;;  %v2183_v46 = vsel %vm3528_vm5, %v1747_v27, 0.0  ;;  %v1921_v21 = vand.u32 15, %v1835_v2 }
 0x17e   : > { %v2198_v40 = vadd.f32 %v2118_v29, %v1744_v10  ;;  %v2119_v43 = vadd.f32 %v3463_v22, %v2039_v31  ;;  %v1907_v31 = vand.u32 15, %v1833_v26  ;;  %v1942_v32 = vand.u32 15, %v1838_v11 }
 0x17f   : > { %2216 = vst.msk [vmem:[%s3543_s30 + $0x10] sm:$0xff] %vm399_vm0, %v2200_v37  ;;  %v2201_v20 = vadd.f32 %v2185_v41, %v2121_v18  ;;  %v2112_v18 = vsel %vm3585_vm10, %v3473_v33, 0.0  ;;  %vm3608_vm12 = vcmp.lt.s32.totalorder %v1921_v21, 15  ;;  %v2114_v10 = vsel %vm3639_vm15, %v3483_v48, 0.0 }
 0x180   : > { %2214 = vst.msk [vmem:[%s3543_s30] sm:$0xff] %vm399_vm0, %v2198_v40  ;;  %v2199_v22 = vadd.f32 %v2183_v46, %v2119_v43  ;;  %v2723_v50 = vpop.f32.mrb[20].mxu1  ;;  %vm3618_vm13 = vcmp.lt.s32.totalorder %v1907_v31, 15  ;;  %vm3628_vm14 = vcmp.gt.s32.totalorder %v1942_v32, 0 }
 0x181   : > { %v2783_v52 = vpop.f32.mrb[20].mxu0  ;;  %2217 = vst.msk [vmem:[%s3543_s30 + $0x18] sm:$0xff] %vm399_vm0, %v2201_v20  ;;  %v2044_v57 = vadd.f32 %v2723_v50, %v3500_v0  ;;  %v1300_v58 = vpop.f32.mrb[21].mxu1  ;;  %v2110_v20 = vsel %vm3593_vm11, %v3475_v36, 0.0 }
 0x182   : > { %v1760_v59 = vpop.f32.mrb[21].mxu0  ;;  %2215 = vst.msk [vmem:[%s3543_s30 + $0x8] sm:$0xff] %vm399_vm0, %v2199_v22  ;;  %v2042_v62 = vadd.f32 %v3500_v0, %v1300_v58  ;;  %v2724_v63 = vpop.f32.mrb[22].mxu1  ;;  %v1839_v22 = vadd.s32 120, %v3489_v56 }
 0x183   : > { %v2784_v1 = vpop.f32.mrb[22].mxu0  ;;  %v2124_v4 = vadd.f32 %v2108_v60, %v2044_v57  ;;  %v2045_v5 = vadd.f32 %v2724_v63, %v3500_v0  ;;  %v1303_v24 = vpop.f32.mrb[23].mxu1 }
 0x184   : > { %v1763_v7 = vpop.f32.mrb[23].mxu0  ;;  %v2122_v8 = vadd.f32 %v2106_v3, %v2042_v62  ;;  %v2043_v9 = vadd.f32 %v3500_v0, %v1303_v24  ;;  %v2189_v17 = vsel %vm3569_vm8, %v2784_v1, 0.0  ;;  %v1949_v63 = vand.u32 15, %v1839_v22 }
 0x185   : > { %v2204_v13 = vadd.f32 %v2783_v52, %v2124_v4  ;;  %v2125_v14 = vadd.f32 %v3469_v28, %v2045_v5  ;;  %v2187_v27 = vsel %vm3574_vm9, %v1763_v7, 0.0  ;;  %v1935_v3 = vand.u32 15, %v1837_v55 }
 0x186   : > { %v2202_v15 = vadd.f32 %v2122_v8, %v1760_v59  ;;  %v2123_v19 = vadd.f32 %v3471_v30, %v2043_v9  ;;  %v2116_v24 = vsel %vm3628_vm14, %v3481_v45, 0.0  ;;  %vm2149_vm1 = vcmp.lt.s32.totalorder %v1949_v63, 15 }
 0x187   : > { %2220 = vst.msk [vmem:[%s3543_s30 + $0x30] sm:$0xff] %vm399_vm0, %v2204_v13  ;;  %v2205_v25 = vadd.f32 %v2189_v17, %v2125_v14  ;;  %vm2147_vm2 = vcmp.lt.s32.totalorder %v1935_v3, 15 }
 0x188   : > { %2218 = vst.msk [vmem:[%s3543_s30 + $0x20] sm:$0xff] %vm399_vm0, %v2202_v15  ;;  %v2203_v16 = vadd.f32 %v2187_v27, %v2123_v19  ;;  %v2727_v30 = vpop.f32.mrb[24].mxu1 }
 0x189   : > { %v2787_v29 = vpop.f32.mrb[24].mxu0  ;;  %2221 = vst.msk [vmem:[%s3543_s30 + $0x38] sm:$0xff] %vm399_vm0, %v2205_v25  ;;  %v2048_v34 = vadd.f32 %v2727_v30, %v3500_v0  ;;  %v1316_v35 = vpop.f32.mrb[25].mxu1 }
 0x18a   : > { %v1776_v37 = vpop.f32.mrb[25].mxu0  ;;  %2219 = vst.msk [vmem:[%s3543_s30 + $0x28] sm:$0xff] %vm399_vm0, %v2203_v16  ;;  %v2046_v40 = vadd.f32 %v3500_v0, %v1316_v35  ;;  %v2728_v41 = vpop.f32.mrb[26].mxu1 }
 0x18b   : > { %v2788_v43 = vpop.f32.mrb[26].mxu0  ;;  %v2128_v46 = vadd.f32 %v2112_v18, %v2048_v34  ;;  %v2049_v33 = vadd.f32 %v2728_v41, %v3500_v0  ;;  %v1319_v47 = vpop.f32.mrb[27].mxu1 }
 0x18c   : > { %v1779_v49 = vpop.f32.mrb[27].mxu0  ;;  %v2126_v50 = vadd.f32 %v2110_v20, %v2046_v40  ;;  %v2047_v52 = vadd.f32 %v3500_v0, %v1319_v47  ;;  %v2193_v59 = vsel %vm3608_vm12, %v2788_v43, 0.0 }
 0x18d   : > { %v2208_v36 = vadd.f32 %v2787_v29, %v2128_v46  ;;  %v2129_v57 = vadd.f32 %v3477_v39, %v2049_v33  ;;  %v2191_v56 = vsel %vm3618_vm13, %v1779_v49, 0.0 }
 0x18e   : > { %v2206_v58 = vadd.f32 %v2126_v50, %v1776_v37  ;;  %v2127_v60 = vadd.f32 %v3479_v42, %v2047_v52 }
 0x18f   : > { %2224 = vst.msk [vmem:[%s3543_s30 + $0x50] sm:$0xff] %vm399_vm0, %v2208_v36  ;;  %v2209_v62 = vadd.f32 %v2193_v59, %v2129_v57 }
 0x190   : > { %2222 = vst.msk [vmem:[%s3543_s30 + $0x40] sm:$0xff] %vm399_vm0, %v2206_v58  ;;  %v2207_v42 = vadd.f32 %v2191_v56, %v2127_v60  ;;  %v2731_v1 = vpop.f32.mrb[28].mxu1 }
 0x191   : > { %v2791_v2 = vpop.f32.mrb[28].mxu0  ;;  %2225 = vst.msk [vmem:[%s3543_s30 + $0x58] sm:$0xff] %vm399_vm0, %v2209_v62  ;;  %v2052_v4 = vadd.f32 %v2731_v1, %v3500_v0  ;;  %v1332_v5 = vpop.f32.mrb[29].mxu1 }
 0x192   : > { %v1792_v6 = vpop.f32.mrb[29].mxu0  ;;  %2223 = vst.msk [vmem:[%s3543_s30 + $0x48] sm:$0xff] %vm399_vm0, %v2207_v42  ;;  %v2050_v7 = vadd.f32 %v3500_v0, %v1332_v5  ;;  %v2732_v8 = vpop.f32.mrb[30].mxu1 }
 0x193   : > { %v2792_v9 = vpop.f32.mrb[30].mxu0  ;;  %v2132_v26 = vadd.f32 %v2116_v24, %v2052_v4  ;;  %v2053_v11 = vadd.f32 %v2732_v8, %v3500_v0  ;;  %v1335_v12 = vpop.f32.mrb[31].mxu1 }
 0x194   : > { %v1795_v13 = vpop.f32.mrb[31].mxu0  ;;  %v2130_v45 = vadd.f32 %v2114_v10, %v2050_v7  ;;  %v2051_v14 = vadd.f32 %v3500_v0, %v1335_v12  ;;  %v2197_v19 = vsel %vm2149_vm1, %v2792_v9, 0.0 }
 0x195   : > { %v2212_v15 = vadd.f32 %v2791_v2, %v2132_v26  ;;  %v2133_v17 = vadd.f32 %v3485_v51, %v2053_v11  ;;  %v2195_v23 = vsel %vm2147_vm2, %v1795_v13, 0.0 }
 0x196   : > { %v2210_v48 = vadd.f32 %v2130_v45, %v1792_v6  ;;  %v2131_v21 = vadd.f32 %v3487_v54, %v2051_v14 }
 0x197   : > { %2228 = vst.msk [vmem:[%s3543_s30 + $0x70] sm:$0xff] %vm399_vm0, %v2212_v15  ;;  %v2213_v0 = vadd.f32 %v2197_v19, %v2133_v17 }
 0x198   : > { %2226 = vst.msk [vmem:[%s3543_s30 + $0x60] sm:$0xff] %vm399_vm0, %v2210_v48  ;;  %v2211_v51 = vadd.f32 %v2195_v23, %v2131_v21 }
 0x199   : > { %2229 = vst.msk [vmem:[%s3543_s30 + $0x78] sm:$0xff] %vm399_vm0, %v2213_v0 }
 0x19a   : > { %2227 = vst.msk [vmem:[%s3543_s30 + $0x68] sm:$0xff] %vm399_vm0, %v2211_v51 }
 0x19b   : > { %2998 = shalt.err (!%p2995_p0)
}
 0x19c   : > { %s2999_s15 = scalar_lea.hbm %s3665_s16, 2048  ;;  %s3003_s13 = scalar_lea.hbm %s3737_s5, 8192 }
 0x19d   : > { %p3000_p1 = scmp.ne.s32.totalorder %s3665_s16, %s2999_s15  ;;  %p3004_p5 = scmp.lt.u32.totalorder %s3665_s16, %s3737_s5 }
 0x19e   : > { %p3005_p6 = scmp.lt.u32.totalorder %s3003_s13, %s2999_s15  ;;  %p3007_p9 = scmp.lt.u32.totalorder %s2999_s15, %s3665_s16 }
 0x19f   : > { %p3001_p2 = pnand %p3000_p1, %p3166_p3 }
 0x1a0   : > { %p3006_p7 = por %p3005_p6, %p3004_p5 }
 0x1a1   : > { %p3002_p4 = pneg %p3001_p2 }
 0x1a2   : > { %p3008_p10 = por %p3007_p9, %p3006_p7 }
 0x1a4   : > { %p3009_p11 = pnand %p3008_p10, %p3002_p4 }
 0x1a6   : > { %3012 = shalt.err (!%p3009_p11)
}
 0x1a7   : > { %s3083_s9 = smov 128   ;;  %s3084_s21 = smov 8  }
 0x1a8   : > { %2893 = dma.vmem_to_hbm [thread:$0]  (%p3166_p3), %s3670_s8, 2048, %s3665_s16, %s3680_s12, %s3083_s9, %s3083_s9, %s3084_s21  }
 0x1a9 PF: > { %p2899_p12 = scmp.ge.s32.totalorder %s3079_s25, 2  ;;  %s2261_s17 = sand.u32 1, %s3051_s18  }
 0x1aa   : > { %s2262_s26 = scalar_lea.sflag [#allocation4], %s2261_s17 }
 0x1ab   : > { %p2896_p13 = pnand %p2899_p12, %p3175_p8 }
 0x1ad   : > { %3046 = dma.done.wait (!%p2896_p13), %s2262_s26, 2048  }
 0x1ae   : > { %3048 = vsyncadd (!%p2896_p13), %s2262_s26, 4294965248  ;;  %s18_s25 = sadd.s32 1, %s3079_s25   ;;  %s3771_s18 = smov %s3055_s19 }
 0x1af   : > { %p15_p0 = scmp.ge.s32.totalorder %s18_s25, 6   ;;  %s3772_s19 = smov %s3059_s20 }
 0x1b0   : > { %s3773_s20 = smov %s3184_s11  ;;  %s3774_s21 = smov %s3071_s23 }
 0x1b1   : > { %s3775_s22 = smov %s3075_s24  ;;  %s3776_s23 = smov %s3779_s28 }
 0x1b2   : > { %s3777_s24 = smov %s3783_s29  ;;  %17 = sbr.rel (!%p15_p0) target bundleno = 7 (0x7), region = 89 }
 0x1b9   :  { %2267 = vsyncpa [#allocation4], 1 }
 0x1ba   :  { %2269 = vsyncpa [#allocation4 + $0x1], 1 }

// kernel: fpn_forward.9
= control target key start
LH: loop header
LB: loop body
LE: loop exit
PB: predicated region body
PF: predicated region fallthrough
CT: control target
= control target key end

     0   :  { %s1134_s12 = smov 0   ;;  %s1136_s13 = smov 0   ;;  %s1280_s0 = inlined_call_operand.vmem [shape: f32[2,4,32], index: 0, kind: input, shape index: {}]   ;;  %s1281_s1 = inlined_call_operand.vmem [shape: bf16[9,32,32], index: 1, kind: input, shape index: {}]   ;;  %s1282_s2 = inlined_call_operand.vmem [shape: f32[1,32], index: 2, kind: input, shape index: {}]   ;;  %s1283_s3 = inlined_call_operand.vmem [shape: f32[2,4,32], index: 3, kind: output, shape index: {}]  }
   0x1   :  { %s1138_s14 = smov 0  }
   0x2 LB: > { %s25_s15 = sadd.s32 1, %s1106_s13  ;;  %p867_p0 = scmp.ge.s32.totalorder %s1110_s14, 1  ;;  %s1110_s14 = sphi %s1138_s14, %s13_s14   ;;  %s1106_s13 = sphi %s1136_s13, %s1285_s13   ;;  %s1102_s12 = sphi %s1134_s12, %s1284_s12  }
   0x3   : > { %p27_p1 = scmp.ge.s32.totalorder %s25_s15, 2  ;;  %p155_p2 = scmp.lt.s32.totalorder %s1110_s14, 3 }
   0x5   : > { %s1287_s15 = smov (%p27_p1, %s25_s15), 0  ;;  %p156_p3 = pnand %p867_p0, %p155_p2 }
   0x6   : > { %v1070_v0 = vld [vmem:[%s1281_s1] sm:$0xff] (!%p156_p3)   ;;  %v1112_v1 = vmov (!%p156_p3), 0.0   ;;  %v1071_v2 = vld [vmem:[%s1281_s1 + $0x30] sm:$0xff] (!%p156_p3)   ;;  %v1072_v3 = vld [vmem:[%s1281_s1 + $0x8] sm:$0xff] (!%p156_p3)   ;;  %vm1113_vm0 = vmmov (!%p156_p3), 0   ;;  %p183_p4 = scmp.lt.s32.totalorder (!%p156_p3), %s1102_s12, 1  ;;  %v757_v45 = vlaneseq (!%p156_p3) }
   0x7   : > { %159 = sbr.rel (%p156_p3) target bundleno = 291 (0x123), region = 32  ;;  %967 = vmatprep.subr.bf16.mxu0 (!%p156_p3), %v1112_v1  ;;  %959 = vmatprep.subr.bf16.mxu1 (!%p156_p3), %v1112_v1  ;;  %v1073_v4 = vld [vmem:[%s1281_s1 + $0x38] sm:$0xff] (!%p156_p3)   ;;  %vm200_vm1 = vcmask (!%p156_p3), 256000   ;;  %vm203_vm2 = vcmask (!%p156_p3), 257024   ;;  %v1074_v7 = vld [vmem:[%s1281_s1 + $0x60] sm:$0xff] (!%p156_p3)   ;;  %vm231_vm3 = vcmask (!%p156_p3), 261120  }
   0x8   : > { %968 = vmatpush3.bf16.msra.mxu0 (!%p156_p3), %v1070_v0  ;;  %963 = vmatprep.mubr.msk.bf16.mxu1 (!%p156_p3), %vm1113_vm0, %v1112_v1  ;;  %201 = vst.msk [vmem:[#allocation2] sm:$0x7] (!%p156_p3), %vm200_vm1, %v1112_v1  ;;  %202 = vst.msk [vmem:[#allocation2 + $0x7] sm:$0x7] (!%p156_p3), %vm200_vm1, %v1112_v1  ;;  %v1075_v10 = vld [vmem:[%s1281_s1 + $0x40] sm:$0xff] (!%p156_p3)   ;;  %v1076_v13 = vld [vmem:[%s1281_s1 + $0x48] sm:$0xff] (!%p156_p3)  }
   0x9   : > { %960 = vmatpush3.bf16.msra.mxu1 (!%p156_p3), %v1071_v2  ;;  %969 = vmatprep.subr.bf16.mxu0 (!%p156_p3), %v1112_v1  ;;  %v1077_v14 = vld [vmem:[%s1281_s1 + $0x68] sm:$0xff] (!%p156_p3)   ;;  %v1078_v17 = vld [vmem:[%s1281_s1 + $0x10] sm:$0xff] (!%p156_p3)   ;;  %v1080_v21 = vld [vmem:[%s1281_s1 + $0x18] sm:$0xff] (!%p156_p3)   ;;  %v758_v50 = vshrl.u32 (!%p156_p3), %v757_v45, 7 }
   0xa   : > { %961 = vmatprep.subr.bf16.mxu1 (!%p156_p3), %v1112_v1  ;;  %971 = vmatprep.mubr.msk.bf16.mxu0 (!%p156_p3), %vm1113_vm0, %v1112_v1  ;;  %v1079_v20 = vld [vmem:[%s1281_s1 + $0x50] sm:$0xff] (!%p156_p3)   ;;  %v1081_v24 = vld [vmem:[%s1281_s1 + $0x58] sm:$0xff] (!%p156_p3)   ;;  %v1083_v26 = vld [vmem:[%s1281_s1 + $0x20] sm:$0xff] (!%p156_p3)  }
   0xb   : > { %v1082_v25 = vld [vmem:[%s1281_s1 + $0x70] sm:$0xff] (!%p156_p3)   ;;  %v1084_v27 = vld [vmem:[%s1281_s1 + $0x78] sm:$0xff] (!%p156_p3)   ;;  %v1085_v30 = vld [vmem:[%s1281_s1 + $0x28] sm:$0xff] (!%p156_p3)   ;;  %v763_v55 = vand.u32 (!%p156_p3), 1, %v758_v50 }
   0xc   : > { %970 = vmatpush3.bf16.msra.mxu0 (!%p156_p3), %v1072_v3  ;;  %v1086_v31 = vld [vmem:[%s1281_s1 + $0x80] sm:$0xff] (!%p156_p3)   ;;  %v1087_v32 = vld [vmem:[%s1281_s1 + $0x88] sm:$0xff] (!%p156_p3)  }
   0xd   : > { %962 = vmatpush3.bf16.msra.mxu1 (!%p156_p3), %v1073_v4  ;;  %975 = vmatprep.subr.bf16.mxu0 (!%p156_p3), %v1112_v1  ;;  %v929_v56 = vld [vmem:[%s1282_s2] ss:$0 sm:$0xff] (!%p156_p3)  ;;  %vm778_vm4 = vcmp.gt.s32.totalorder (!%p156_p3), %v763_v55, 0  ;;  %vm783_vm5 = vcmp.lt.s32.totalorder (!%p156_p3), %v763_v55, 1 }
   0xe   : > { %s1289_s12 = smov (!%p183_p4, %s1102_s12), 1  ;;  %983 = vmatprep.subr.bf16.mxu1 %v1112_v1 }
   0xf   : > { %s868_s24 = sshll.u32 %s1289_s12, 2 }
  0x10   : > { %s189_s27 = scalar_lea.vmem %s1280_s0, %s868_s24  ;;  %s196_s11 = scalar_lea.vmem %s1283_s3, %s868_s24 }
  0x11   : > { %v198_v5 = vld [vmem:[%s189_s27] sm:$0xf] }
  0x12   : > { %v199_v6 = vmax.f32 %v198_v5, 0.0 }
  0x14   : > { %204 = vst.msk [vmem:[#allocation2 + $0x3] sm:$0xf] %vm203_vm2, %v199_v6 }
  0x1b   : > { %v212_v8 = vld [vmem:[#allocation2 + $0x2] sm:$0xf]  ;;  %v694_v33 = vld [vmem:[#allocation2 + $0x6] sm:$0xf] }
  0x1c   : > { %v206_v9 = vld [vmem:[#allocation2] sm:$0xf]  ;;  %v213_v11 = vpack.c.bf16 %v212_v8, %v212_v8  ;;  %v330_v18 = vld [vmem:[#allocation2 + $0x4] sm:$0xf]  ;;  %v695_v34 = vpack.c.bf16 %v694_v33, %v694_v33 }
  0x1d   : > { %v207_v12 = vpack.c.bf16 %v206_v9, %v206_v9  ;;  %v400_v15 = vld [vmem:[#allocation2 + $0x3] sm:$0xf]  ;;  %v331_v19 = vpack.c.bf16 %v330_v18, %v330_v18 }
  0x1e   : > { %964 = vmatmul.mubr.msk.bf16.vlgmr.msra.gmra.mrb[0].mxu1 %vm231_vm3, %v213_v11  ;;  %v401_v16 = vpack.c.bf16 %v400_v15, %v400_v15  ;;  %v393_v22 = vld [vmem:[#allocation2 + $0x1] sm:$0xf]  ;;  %v517_v28 = vld [vmem:[#allocation2 + $0x5] sm:$0xf] }
  0x1f   : > { %972 = vmatmul.mubr.msk.bf16.vlgmr.msra.gmra.mrb[0].mxu0 %vm231_vm3, %v207_v12  ;;  %984 = vmatpush3.bf16.msra.mxu1 %v1075_v10  ;;  %v394_v23 = vpack.c.bf16 %v393_v22, %v393_v22  ;;  %v518_v29 = vpack.c.bf16 %v517_v28, %v517_v28 }
  0x20   : > { %976 = vmatpush3.bf16.msra.mxu0 %v1074_v7  ;;  %985 = vmatprep.subr.bf16.mxu1 %v1112_v1 }
  0x21   : > { %977 = vmatprep.subr.bf16.mxu0 %v1112_v1  ;;  %987 = vmatprep.mubr.msk.bf16.mxu1 %vm1113_vm0, %v1112_v1 }
  0x22   : > { %979 = vmatprep.mubr.msk.bf16.mxu0 %vm1113_vm0, %v1112_v1 }
  0x23   : > { %986 = vmatpush3.bf16.msra.mxu1 %v1076_v13 }
  0x24   : > { %978 = vmatpush3.bf16.msra.mxu0 %v1077_v14  ;;  %991 = vmatprep.subr.bf16.mxu1 %v1112_v1 }
  0x25   : > { %1007 = vmatprep.subr.bf16.mxu0 %v1112_v1 }
  0x26   : > { %988 = vmatmul.mubr.msk.bf16.vlgmr.msra.gmra.mrb[4].mxu1 %vm231_vm3, %v401_v16 }
  0x27   : > { %992 = vmatpush3.bf16.msra.mxu1 %v1078_v17  ;;  %995 = vmatprep.mubr.msk.bf16.mxu1 %vm1113_vm0, %v1112_v1 }
  0x28   : > { %993 = vmatprep.subr.bf16.mxu1 %v1112_v1 }
  0x2b   : > { %980 = vmatmul.mubr.msk.bf16.vlgmr.msra.gmra.mrb[0].mxu0 %vm231_vm3, %v331_v19  ;;  %994 = vmatpush3.bf16.msra.mxu1 %v1080_v21 }
  0x2c   : > { %1008 = vmatpush3.bf16.msra.mxu0 %v1079_v20  ;;  %999 = vmatprep.subr.bf16.mxu1 %v1112_v1 }
  0x2d   : > { %1009 = vmatprep.subr.bf16.mxu0 %v1112_v1  ;;  %1011 = vmatprep.mubr.msk.bf16.mxu0 %vm1113_vm0, %v1112_v1 }
  0x2e   : > { %996 = vmatmul.mubr.msk.bf16.vlgmr.msra.gmra.mrb[8].mxu1 %vm231_vm3, %v394_v23 }
  0x2f   : > { %1000 = vmatpush3.bf16.msra.mxu1 %v1082_v25  ;;  %1003 = vmatprep.mubr.msk.bf16.mxu1 %vm1113_vm0, %v1112_v1 }
  0x30   : > { %1010 = vmatpush3.bf16.msra.mxu0 %v1081_v24  ;;  %1001 = vmatprep.subr.bf16.mxu1 %v1112_v1 }
  0x31   : > { %1015 = vmatprep.subr.bf16.mxu0 %v1112_v1 }
  0x33   : > { %1012 = vmatmul.mubr.msk.bf16.vlgmr.msra.gmra.mrb[4].mxu0 %vm231_vm3, %v331_v19  ;;  %1002 = vmatpush3.bf16.msra.mxu1 %v1084_v27 }
  0x34   : > { %1016 = vmatpush3.bf16.msra.mxu0 %v1083_v26  ;;  %1019 = vmatprep.mubr.msk.bf16.mxu0 %vm1113_vm0, %v1112_v1 }
  0x35   : > { %1017 = vmatprep.subr.bf16.mxu0 %v1112_v1 }
  0x36   : > { %1004 = vmatmul.mubr.msk.bf16.vlgmr.msra.gmra.mrb[12].mxu1 %vm231_vm3, %v518_v29 }
  0x38   : > { %1018 = vmatpush3.bf16.msra.mxu0 %v1085_v30 }
  0x39   : > { %1023 = vmatprep.subr.bf16.mxu0 %v1112_v1 }
  0x3f   : > { %1020 = vmatmul.mubr.msk.bf16.vlgmr.msra.gmra.mrb[4].mxu0 %vm231_vm3, %v213_v11 }
  0x40   : > { %1024 = vmatpush3.bf16.msra.mxu0 %v1086_v31  ;;  %1027 = vmatprep.mubr.msk.bf16.mxu0 %vm1113_vm0, %v1112_v1 }
  0x41   : > { %1025 = vmatprep.subr.bf16.mxu0 %v1112_v1 }
  0x44   : > { %1026 = vmatpush3.bf16.msra.mxu0 %v1087_v32 }
  0x4b   : > { %1028 = vmatmul.mubr.msk.bf16.vlgmr.msra.gmra.mrb[4].mxu0 %vm231_vm3, %v695_v34 }
  0xf1   : > { %v269_v35 = vpop.f32.mrb[0].mxu1 }
  0xf2   : > { %v965_v36 = vpop.f32.mrb[1].mxu1 }
  0xf3   : > { %v272_v37 = vpop.f32.mrb[2].mxu1 }
  0xf4   : > { %v966_v38 = vpop.f32.mrb[3].mxu1 }
  0xf9   : > { %v456_v39 = vpop.f32.mrb[4].mxu1 }
  0xfa   : > { %v989_v40 = vpop.f32.mrb[5].mxu1 }
  0xfb   : > { %v459_v41 = vpop.f32.mrb[6].mxu1 }
  0xfc   : > { %v990_v42 = vpop.f32.mrb[7].mxu1 }
  0xfe   : > { %v386_v43 = vpop.f32.mrb[0].mxu0 }
  0xff   : > { %v1031_v44 = vadd.f32 %v386_v43, %v269_v35  ;;  %v981_v46 = vpop.f32.mrb[1].mxu0 }
 0x100   : > { %v389_v47 = vpop.f32.mrb[2].mxu0 }
 0x101   : > { %v982_v48 = vpop.f32.mrb[3].mxu0  ;;  %v511_v49 = vpop.f32.mrb[8].mxu1  ;;  %v781_v63 = vsel %vm778_vm4, %v1031_v44, 0.0 }
 0x102   : > { %v512_v51 = vadd.f32 %v511_v49, %v456_v39  ;;  %v997_v52 = vpop.f32.mrb[9].mxu1 }
 0x103   : > { %v514_v53 = vpop.f32.mrb[10].mxu1 }
 0x104   : > { %v998_v54 = vpop.f32.mrb[11].mxu1 }
 0x109   : > { %v573_v57 = vpop.f32.mrb[12].mxu1 }
 0x10a   : > { %v579_v58 = vadd.f32 %v573_v57, %v512_v51  ;;  %v1005_v59 = vpop.f32.mrb[13].mxu1 }
 0x10b   : > { %v576_v60 = vpop.f32.mrb[14].mxu1 }
 0x10c   : > { %v777_v61 = vadd.f32 %v929_v56, %v579_v58  ;;  %v1006_v62 = vpop.f32.mrb[15].mxu1 }
 0x10e   : > { %v782_v0 = vadd.f32 %v781_v63, %v777_v61 }
 0x11e   : > { %v750_v1 = vpop.f32.mrb[4].mxu0 }
 0x11f   : > { %v786_v2 = vsel %vm783_vm5, %v750_v1, 0.0  ;;  %v1029_v3 = vpop.f32.mrb[5].mxu0 }
 0x120   : > { %v787_v4 = vadd.f32 %v786_v2, %v782_v0  ;;  %v753_v5 = vpop.f32.mrb[6].mxu0 }
 0x121   : > { %v1030_v6 = vpop.f32.mrb[7].mxu0 }
 0x122   : > { %788 = vst.msk [vmem:[%s196_s11] sm:$0xf] %vm203_vm2, %v787_v4 }
 0x123 PF: > { %s13_s14 = sadd.s32 1, %s1110_s14   ;;  %s1284_s12 = smov %s1106_s13 }
 0x124   : > { %p10_p5 = scmp.ge.s32.totalorder %s13_s14, 4   ;;  %s1285_s13 = smov %s1287_s15 }
 0x126   :  { %12 = sbr.rel (!%p10_p5) target bundleno = 2 (0x2), region = 70 }

// kernel: fpn_forward.11
= control target key start
LH: loop header
LB: loop body
LE: loop exit
PB: predicated region body
PF: predicated region fallthrough
CT: control target
= control target key end

     0   :  { %8 = vsyncpa [#allocation4], 0  ;;  %s1536_s0 = inlined_call_operand.vmem [shape: f32[2,16,32], index: 0, kind: input, shape index: {}]   ;;  %s1537_s1 = inlined_call_operand.vmem [shape: bf16[9,32,32], index: 1, kind: input, shape index: {}]   ;;  %s1538_s2 = inlined_call_operand.vmem [shape: f32[1,32], index: 2, kind: input, shape index: {}]   ;;  %s1539_s3 = inlined_call_operand.hbm [shape: f32[2,16,32], index: 3, kind: output, shape index: {}]  }
   0x1   :  { %10 = vsyncpa [#allocation4 + $0x1], 0  ;;  %s1313_s12 = smov 0   ;;  %s1315_s13 = smov 0  }
   0x2   :  { %s1317_s14 = smov 0   ;;  %s1319_s15 = smov 0  }
   0x3   :  { %s1321_s16 = smov 0   ;;  %s1323_s17 = smov 0  }
   0x4 LB: > { %s943_s18 = sadd.s32 4294967295, %s1286_s17   ;;  %s944_s19 = sadd.s32 4294967294, %s1286_s17   ;;  %s1286_s17 = sphi %s1323_s17, %s16_s17   ;;  %s1282_s16 = sphi %s1321_s16, %s1546_s16   ;;  %s1278_s15 = sphi %s1319_s15, %s1545_s15   ;;  %s1274_s14 = sphi %s1317_s14, %s1544_s14   ;;  %s1270_s13 = sphi %s1315_s13, %s1543_s13   ;;  %s1266_s12 = sphi %s1313_s12, %s1542_s12  }
   0x5   : > { %s28_s20 = sadd.s32 1, %s1282_s16  ;;  %s107_s21 = sadd.s32 1, %s1274_s14 }
   0x6   : > { %p30_p0 = scmp.ge.s32.totalorder %s28_s20, 2  ;;  %p117_p1 = scmp.ne.s32.totalorder %s1274_s14, %s1270_s13 }
   0x7   : > { %p118_p2 = scmp.eq.s32.totalorder %s943_s18, 1  ;;  %p123_p3 = scmp.ne.s32.totalorder %s1270_s13, %s1266_s12 }
   0x8   : > { %s1548_s20 = smov (%p30_p0, %s28_s20), 0  ;;  %p124_p5 = scmp.eq.s32.totalorder %s944_s19, 1 }
   0x9   : > { %p1353_p4 = por %p118_p2, %p117_p1  ;;  %s102_s23 = ssub.s32 %s1282_s16, %s1548_s20 }
   0xa   : > { %p947_p6 = scmp.ge.s32.totalorder %s1286_s17, 1  ;;  %p105_p7 = scmp.eq.s32.totalorder %s102_s23, 0 }
   0xb   : > { %p1360_p8 = por %p124_p5, %p123_p3  ;;  %p161_p9 = scmp.lt.s32.totalorder %s1286_s17, 3 }
   0xc   : > { %s1366_s25 = scalar_select %p105_p7, %s1274_s14, %s107_s21  }
   0xd   : > { %p162_p10 = pnand %p947_p6, %p161_p9 }
   0xe   : > { %v1190_v0 = vld [vmem:[%s1537_s1] sm:$0xff] (!%p162_p10)   ;;  %v1288_v1 = vmov (!%p162_p10), 0.0   ;;  %v1191_v2 = vld [vmem:[%s1537_s1 + $0x30] sm:$0xff] (!%p162_p10)   ;;  %v1192_v3 = vld [vmem:[%s1537_s1 + $0x8] sm:$0xff] (!%p162_p10)   ;;  %vm1289_vm0 = vmmov (!%p162_p10), 0   ;;  %p190_p11 = scmp.lt.s32.totalorder (!%p162_p10), %s1278_s15, 1  ;;  %v791_v52 = vlaneseq (!%p162_p10) }
   0xf   : > { %165 = sbr.rel (%p162_p10) target bundleno = 314 (0x13a), region = 32  ;;  %1053 = vmatprep.subr.bf16.mxu0 (!%p162_p10), %v1288_v1  ;;  %1045 = vmatprep.subr.bf16.mxu1 (!%p162_p10), %v1288_v1  ;;  %v1193_v4 = vld [vmem:[%s1537_s1 + $0x38] sm:$0xff] (!%p162_p10)   ;;  %vm203_vm1 = vcmask (!%p162_p10), 258048   ;;  %vm206_vm2 = vcmask (!%p162_p10), 261120   ;;  %v1195_v7 = vld [vmem:[%s1537_s1 + $0x40] sm:$0xff] (!%p162_p10)   ;;  %v1196_v15 = vld [vmem:[%s1537_s1 + $0x48] sm:$0xff] (!%p162_p10)  }
  0x10   : > { %1054 = vmatpush3.bf16.msra.mxu0 (!%p162_p10), %v1190_v0  ;;  %1049 = vmatprep.mubr.msk.bf16.mxu1 (!%p162_p10), %vm1289_vm0, %v1288_v1  ;;  %204 = vst.msk [vmem:[#allocation2] sm:$0x1f] (!%p162_p10), %vm203_vm1, %v1288_v1  ;;  %205 = vst.msk [vmem:[#allocation2 + $0x15] sm:$0x1f] (!%p162_p10), %vm203_vm1, %v1288_v1  ;;  %v1194_v13 = vld [vmem:[%s1537_s1 + $0x60] sm:$0xff] (!%p162_p10)   ;;  %v1197_v18 = vld [vmem:[%s1537_s1 + $0x68] sm:$0xff] (!%p162_p10)  }
  0x11   : > { %1046 = vmatpush3.bf16.msra.mxu1 (!%p162_p10), %v1191_v2  ;;  %1055 = vmatprep.subr.bf16.mxu0 (!%p162_p10), %v1288_v1  ;;  %v1198_v20 = vld [vmem:[%s1537_s1 + $0x10] sm:$0xff] (!%p162_p10)   ;;  %v1200_v23 = vld [vmem:[%s1537_s1 + $0x18] sm:$0xff] (!%p162_p10)   ;;  %v1203_v35 = vld [vmem:[%s1537_s1 + $0x20] sm:$0xff] (!%p162_p10)   ;;  %v792_v57 = vshrl.u32 (!%p162_p10), %v791_v52, 7  ;;  %s1017_s18 = sshll.u32 (!%p162_p10), %s1278_s15, 8  ;;  %s1290_s27 = smov (!%p162_p10), [#allocation3]  }
  0x12   : > { %1047 = vmatprep.subr.bf16.mxu1 (!%p162_p10), %v1288_v1  ;;  %1057 = vmatprep.mubr.msk.bf16.mxu0 (!%p162_p10), %vm1289_vm0, %v1288_v1  ;;  %v1199_v26 = vld [vmem:[%s1537_s1 + $0x50] sm:$0xff] (!%p162_p10)   ;;  %v1201_v29 = vld [vmem:[%s1537_s1 + $0x58] sm:$0xff] (!%p162_p10)   ;;  %v1205_v37 = vld [vmem:[%s1537_s1 + $0x28] sm:$0xff] (!%p162_p10)   ;;  %s1486_s23 = scalar_lea.hbm (!%p162_p10), %s1539_s3, %s1017_s18  ;;  %s1212_s28 = sshll.u32 (!%p162_p10), %s1290_s27, 4  ;;  %s1213_s28 = int_to_ptr.vmem [resolvable:$false] %s1212_s28 }
  0x13   : > { %v1202_v28 = vld [vmem:[%s1537_s1 + $0x70] sm:$0xff] (!%p162_p10)   ;;  %v1204_v33 = vld [vmem:[%s1537_s1 + $0x78] sm:$0xff] (!%p162_p10)   ;;  %v1206_v41 = vld [vmem:[%s1537_s1 + $0x80] sm:$0xff] (!%p162_p10)   ;;  %s1214_s29 = scalar_lea.vmem (!%p162_p10), %s1213_s28, 512 }
  0x14   : > { %1056 = vmatpush3.bf16.msra.mxu0 (!%p162_p10), %v1192_v3  ;;  %v1207_v42 = vld [vmem:[%s1537_s1 + $0x88] sm:$0xff] (!%p162_p10)  }
  0x15   : > { %1048 = vmatpush3.bf16.msra.mxu1 (!%p162_p10), %v1193_v4  ;;  %1061 = vmatprep.subr.bf16.mxu0 (!%p162_p10), %v1288_v1  ;;  %v798_v4 = vand.u32 (!%p162_p10), 3, %v792_v57 }
  0x16   : > { %s191_s7 = scalar_select %p190_p11, %s1278_s15, 1  ;;  %1069 = vmatprep.subr.bf16.mxu1 %v1288_v1 }
  0x17   : > { %vm826_vm3 = vcmp.gt.s32.totalorder %v798_v4, 0  ;;  %vm836_vm5 = vcmp.lt.s32.totalorder %v798_v4, 3 }
  0x18   : > { %s1016_s8 = sshll.u32 %s191_s7, 4 }
  0x19   : > { %s197_s11 = scalar_lea.vmem %s1536_s0, %s1016_s8  ;;  %s186_s8 = sand.u32 1, %s1270_s13  }
  0x1a   : > { %v201_v5 = vld [vmem:[%s197_s11] sm:$0xff]  ;;  %v202_v6 = vld [vmem:[%s197_s11 + $0x8] sm:$0xff]  ;;  %s948_s9 = sshll.u32 %s186_s8, 4  ;;  %s1490_s15 = scalar_lea.sflag [#allocation4], %s186_s8 }
  0x1b   : > { %207 = vst.msk [vmem:[#allocation2 + $0x5] sm:$0xff] %vm206_vm2, %v201_v5  ;;  %208 = vst.msk [vmem:[#allocation2 + $0xd] sm:$0xff] %vm206_vm2, %v202_v6  ;;  %v1010_v6 = vld [vmem:[%s1538_s2] ss:$0 sm:$0xff]  ;;  %s188_s10 = scalar_lea.vmem [#allocation3], %s948_s9 }
  0x1c   : > { %s864_s11 = sshll.u32 %s188_s10, 4  ;;  %s1481_s11 = int_to_ptr.vmem [resolvable:$true] %s864_s11 }
  0x1d   : > { %s1208_s26 = scalar_lea.vmem %s1481_s11, 256  ;;  %p1215_p1 = scmp.lt.s32.totalorder %s1481_s11, %s1213_s28 }
  0x1e   : > { %p1209_p12 = scmp.ne.s32.totalorder %s1481_s11, %s1208_s26  ;;  %p1216_p2 = scmp.lt.s32.totalorder %s1214_s29, %s1208_s26 }
  0x20   : > { %p1210_p13 = pnand %p1209_p12, %p1353_p4  ;;  %p1217_p3 = por %p1216_p2, %p1215_p1 }
  0x22   : > { %v217_v8 = vld [vmem:[#allocation2 + $0x4] sm:$0xff]  ;;  %v218_v9 = vld [vmem:[#allocation2 + $0xc] sm:$0xff]  ;;  %p1211_p0 = pneg %p1210_p13 }
  0x23   : > { %v210_v10 = vld [vmem:[#allocation2] sm:$0xff]  ;;  %v219_v11 = vpack.c.bf16 %v218_v9, %v217_v8  ;;  %v211_v12 = vld [vmem:[#allocation2 + $0x8] sm:$0xff]  ;;  %v338_v21 = vld [vmem:[#allocation2 + $0x10] sm:$0xff] }
  0x24   : > { %v212_v14 = vpack.c.bf16 %v211_v12, %v210_v10  ;;  %v411_v16 = vld [vmem:[#allocation2 + $0x5] sm:$0xff]  ;;  %v412_v17 = vld [vmem:[#allocation2 + $0xd] sm:$0xff]  ;;  %v339_v22 = vpack.c.bf16 %v338_v21, %v211_v12  ;;  %p1218_p5 = pnand %p1217_p3, %p1211_p0 }
  0x25   : > { %1050 = vmatmul.mubr.msk.bf16.vlgmr.msra.gmra.mrb[0].mxu1 %vm206_vm2, %v219_v11  ;;  %v413_v19 = vpack.c.bf16 %v412_v17, %v411_v16  ;;  %v403_v24 = vld [vmem:[#allocation2 + $0x1] sm:$0xff]  ;;  %v404_v25 = vld [vmem:[#allocation2 + $0x9] sm:$0xff]  ;;  %v532_v34 = vld [vmem:[#allocation2 + $0x11] sm:$0xff] }
  0x26   : > { %1058 = vmatmul.mubr.msk.bf16.vlgmr.msra.gmra.mrb[0].mxu0 %vm206_vm2, %v212_v14  ;;  %1070 = vmatpush3.bf16.msra.mxu1 %v1195_v7  ;;  %v405_v27 = vpack.c.bf16 %v404_v25, %v403_v24  ;;  %v605_v30 = vld [vmem:[#allocation2 + $0x6] sm:$0xff]  ;;  %v606_v31 = vld [vmem:[#allocation2 + $0xe] sm:$0xff]  ;;  %v533_v36 = vpack.c.bf16 %v532_v34, %v404_v25 }
  0x27   : > { %1062 = vmatpush3.bf16.msra.mxu0 %v1194_v13  ;;  %1071 = vmatprep.subr.bf16.mxu1 %v1288_v1  ;;  %v607_v32 = vpack.c.bf16 %v606_v31, %v605_v30  ;;  %v597_v38 = vld [vmem:[#allocation2 + $0x2] sm:$0xff]  ;;  %v598_v39 = vld [vmem:[#allocation2 + $0xa] sm:$0xff]  ;;  %v726_v43 = vld [vmem:[#allocation2 + $0x12] sm:$0xff] }
  0x28   : > { %1063 = vmatprep.subr.bf16.mxu0 %v1288_v1  ;;  %1073 = vmatprep.mubr.msk.bf16.mxu1 %vm1289_vm0, %v1288_v1  ;;  %v599_v40 = vpack.c.bf16 %v598_v39, %v597_v38  ;;  %v727_v44 = vpack.c.bf16 %v726_v43, %v598_v39 }
  0x29   : > { %1065 = vmatprep.mubr.msk.bf16.mxu0 %vm1289_vm0, %v1288_v1 }
  0x2a   : > { %1072 = vmatpush3.bf16.msra.mxu1 %v1196_v15 }
  0x2b   : > { %1064 = vmatpush3.bf16.msra.mxu0 %v1197_v18  ;;  %1077 = vmatprep.subr.bf16.mxu1 %v1288_v1 }
  0x2c   : > { %1093 = vmatprep.subr.bf16.mxu0 %v1288_v1 }
  0x2d   : > { %1074 = vmatmul.mubr.msk.bf16.vlgmr.msra.gmra.mrb[4].mxu1 %vm206_vm2, %v413_v19 }
  0x2e   : > { %1078 = vmatpush3.bf16.msra.mxu1 %v1198_v20  ;;  %1081 = vmatprep.mubr.msk.bf16.mxu1 %vm1289_vm0, %v1288_v1 }
  0x2f   : > { %1079 = vmatprep.subr.bf16.mxu1 %v1288_v1 }
  0x32   : > { %1066 = vmatmul.mubr.msk.bf16.vlgmr.msra.gmra.mrb[0].mxu0 %vm206_vm2, %v339_v22  ;;  %1080 = vmatpush3.bf16.msra.mxu1 %v1200_v23 }
  0x33   : > { %1094 = vmatpush3.bf16.msra.mxu0 %v1199_v26  ;;  %1085 = vmatprep.subr.bf16.mxu1 %v1288_v1 }
  0x34   : > { %1095 = vmatprep.subr.bf16.mxu0 %v1288_v1  ;;  %1097 = vmatprep.mubr.msk.bf16.mxu0 %vm1289_vm0, %v1288_v1 }
  0x35   : > { %1082 = vmatmul.mubr.msk.bf16.vlgmr.msra.gmra.mrb[8].mxu1 %vm206_vm2, %v405_v27 }
  0x36   : > { %1086 = vmatpush3.bf16.msra.mxu1 %v1202_v28  ;;  %1089 = vmatprep.mubr.msk.bf16.mxu1 %vm1289_vm0, %v1288_v1 }
  0x37   : > { %1096 = vmatpush3.bf16.msra.mxu0 %v1201_v29  ;;  %1087 = vmatprep.subr.bf16.mxu1 %v1288_v1 }
  0x38   : > { %1101 = vmatprep.subr.bf16.mxu0 %v1288_v1 }
  0x3a   : > { %1098 = vmatmul.mubr.msk.bf16.vlgmr.msra.gmra.mrb[4].mxu0 %vm206_vm2, %v607_v32  ;;  %1088 = vmatpush3.bf16.msra.mxu1 %v1204_v33 }
  0x3b   : > { %1102 = vmatpush3.bf16.msra.mxu0 %v1203_v35  ;;  %1105 = vmatprep.mubr.msk.bf16.mxu0 %vm1289_vm0, %v1288_v1 }
  0x3c   : > { %1103 = vmatprep.subr.bf16.mxu0 %v1288_v1 }
  0x3d   : > { %1090 = vmatmul.mubr.msk.bf16.vlgmr.msra.gmra.mrb[12].mxu1 %vm206_vm2, %v533_v36 }
  0x3f   : > { %1104 = vmatpush3.bf16.msra.mxu0 %v1205_v37 }
  0x40   : > { %1109 = vmatprep.subr.bf16.mxu0 %v1288_v1 }
  0x46   : > { %1106 = vmatmul.mubr.msk.bf16.vlgmr.msra.gmra.mrb[4].mxu0 %vm206_vm2, %v599_v40 }
  0x47   : > { %1110 = vmatpush3.bf16.msra.mxu0 %v1206_v41  ;;  %1113 = vmatprep.mubr.msk.bf16.mxu0 %vm1289_vm0, %v1288_v1 }
  0x48   : > { %1111 = vmatprep.subr.bf16.mxu0 %v1288_v1  ;;  %v793_v1 = vadd.s32 8, %v792_v57 }
  0x4a   : > { %v805_v5 = vand.u32 3, %v793_v1 }
  0x4b   : > { %1112 = vmatpush3.bf16.msra.mxu0 %v1207_v42 }
  0x4c   : > { %vm827_vm4 = vcmp.gt.s32.totalorder %v805_v5, 0  ;;  %vm837_vm6 = vcmp.lt.s32.totalorder %v805_v5, 3 }
  0x52   : > { %1114 = vmatmul.mubr.msk.bf16.vlgmr.msra.gmra.mrb[4].mxu0 %vm206_vm2, %v727_v44 }
  0xf8   : > { %v274_v45 = vpop.f32.mrb[0].mxu1 }
  0xf9   : > { %v1051_v46 = vpop.f32.mrb[1].mxu1 }
  0xfa   : > { %v277_v47 = vpop.f32.mrb[2].mxu1 }
  0xfb   : > { %v1052_v48 = vpop.f32.mrb[3].mxu1 }
 0x100   : > { %v468_v49 = vpop.f32.mrb[4].mxu1 }
 0x101   : > { %v1075_v50 = vpop.f32.mrb[5].mxu1 }
 0x102   : > { %v471_v51 = vpop.f32.mrb[6].mxu1 }
 0x103   : > { %v1076_v53 = vpop.f32.mrb[7].mxu1 }
 0x105   : > { %v394_v54 = vpop.f32.mrb[0].mxu0 }
 0x106   : > { %v1117_v55 = vadd.f32 %v394_v54, %v274_v45  ;;  %v1067_v56 = vpop.f32.mrb[1].mxu0 }
 0x107   : > { %v397_v58 = vpop.f32.mrb[2].mxu0 }
 0x108   : > { %v1118_v59 = vadd.f32 %v397_v58, %v277_v47  ;;  %v1068_v60 = vpop.f32.mrb[3].mxu0  ;;  %v524_v61 = vpop.f32.mrb[8].mxu1  ;;  %v832_v14 = vsel %vm826_vm3, %v1117_v55, 0.0 }
 0x109   : > { %v525_v62 = vadd.f32 %v524_v61, %v468_v49  ;;  %v1083_v63 = vpop.f32.mrb[9].mxu1 }
 0x10a   : > { %v527_v0 = vpop.f32.mrb[10].mxu1  ;;  %v833_v17 = vsel %vm827_vm4, %v1118_v59, 0.0 }
 0x10b   : > { %v528_v2 = vadd.f32 %v527_v0, %v471_v51  ;;  %v1084_v3 = vpop.f32.mrb[11].mxu1 }
 0x110   : > { %v588_v7 = vpop.f32.mrb[12].mxu1 }
 0x111   : > { %v595_v8 = vadd.f32 %v588_v7, %v525_v62  ;;  %v1091_v9 = vpop.f32.mrb[13].mxu1 }
 0x112   : > { %v591_v10 = vpop.f32.mrb[14].mxu1 }
 0x113   : > { %v824_v11 = vadd.f32 %v1010_v6, %v595_v8  ;;  %v596_v12 = vadd.f32 %v591_v10, %v528_v2  ;;  %v1092_v13 = vpop.f32.mrb[15].mxu1 }
 0x115   : > { %v825_v15 = vadd.f32 %v1010_v6, %v596_v12  ;;  %v834_v16 = vadd.f32 %v832_v14, %v824_v11 }
 0x117   : > { %v835_v18 = vadd.f32 %v833_v17, %v825_v15 }
 0x125   : > { %v782_v19 = vpop.f32.mrb[4].mxu0 }
 0x126   : > { %v842_v20 = vsel %vm836_vm5, %v782_v19, 0.0  ;;  %v1115_v21 = vpop.f32.mrb[5].mxu0 }
 0x127   : > { %v844_v22 = vadd.f32 %v842_v20, %v834_v16  ;;  %v785_v23 = vpop.f32.mrb[6].mxu0 }
 0x128   : > { %v843_v24 = vsel %vm837_vm6, %v785_v23, 0.0  ;;  %v1116_v25 = vpop.f32.mrb[7].mxu0 }
 0x129   : > { %846 = vst.msk [vmem:[%s188_s10] sm:$0xff] %vm206_vm2, %v844_v22  ;;  %v845_v26 = vadd.f32 %v843_v24, %v835_v18 }
 0x12b   : > { %847 = vst.msk [vmem:[%s188_s10 + $0x8] sm:$0xff] %vm206_vm2, %v845_v26 }
 0x12c   : > { %1221 = shalt.err (!%p1218_p5)
}
 0x12d   : > { %s1222_s30 = scalar_lea.hbm %s1486_s23, 256  ;;  %s1226_s6 = scalar_lea.hbm %s1539_s3, 512 }
 0x12e   : > { %p1223_p6 = scmp.ne.s32.totalorder %s1486_s23, %s1222_s30  ;;  %p1227_p10 = scmp.lt.u32.totalorder %s1486_s23, %s1539_s3 }
 0x12f   : > { %p1228_p11 = scmp.lt.u32.totalorder %s1226_s6, %s1222_s30  ;;  %p1230_p13 = scmp.lt.u32.totalorder %s1222_s30, %s1486_s23 }
 0x130   : > { %p1224_p7 = pnand %p1223_p6, %p1353_p4 }
 0x131   : > { %p1229_p12 = por %p1228_p11, %p1227_p10 }
 0x132   : > { %p1225_p9 = pneg %p1224_p7 }
 0x133   : > { %p1231_p0 = por %p1230_p13, %p1229_p12 }
 0x135   : > { %p1232_p1 = pnand %p1231_p0, %p1225_p9 }
 0x137   : > { %1235 = shalt.err (!%p1232_p1)
}
 0x138   : > { %s1291_s9 = smov 128   ;;  %s1292_s10 = smov 8  }
 0x139   : > { %1131 = dma.vmem_to_hbm [thread:$0]  (%p1353_p4), %s1481_s11, 256, %s1486_s23, %s1490_s15, %s1291_s9, %s1291_s9, %s1292_s10  }
 0x13a PF: > { %p1137_p2 = scmp.ge.s32.totalorder %s1286_s17, 2  ;;  %s879_s18 = sand.u32 1, %s1266_s12  }
 0x13b   : > { %s880_s19 = scalar_lea.sflag [#allocation4], %s879_s18 }
 0x13c   : > { %p1134_p3 = pnand %p1137_p2, %p1360_p8 }
 0x13e   : > { %1261 = dma.done.wait (!%p1134_p3), %s880_s19, 256  }
 0x13f   : > { %1263 = vsyncadd (!%p1134_p3), %s880_s19, 4294967040  ;;  %s16_s17 = sadd.s32 1, %s1286_s17   ;;  %s1542_s12 = smov %s1270_s13 }
 0x140   : > { %p13_p5 = scmp.ge.s32.totalorder %s16_s17, 4   ;;  %s1543_s13 = smov %s1274_s14 }
 0x141   : > { %s1544_s14 = smov %s1366_s25  ;;  %s1545_s15 = smov %s1282_s16 }
 0x142   : > { %s1546_s16 = smov %s1548_s20  ;;  %15 = sbr.rel (!%p13_p5) target bundleno = 4 (0x4), region = 75 }
 0x149   :  { %885 = vsyncpa [#allocation4], 1 }
 0x14a   :  { %887 = vsyncpa [#allocation4 + $0x1], 1 }

</bundles_post_ra>
